<compile_context>
chip_gen: v5e
topology: v5e:2x2
jax: 0.10.0
libtpu: 0.0.40
codegen_flags: <defaults>
</compile_context>

<pallas_src>
import functools

import numpy as np
import jax
import jax.numpy as jnp
from jax import lax
from jax.experimental import pallas as pl
from jax.experimental.pallas import tpu as pltpu


# ---------------------------------------------------------------------------
# Wrapper-side constant builders (numpy selection masks + tiny einsums).
# ---------------------------------------------------------------------------
def conv_band_matrices(w_hwio, w_in, w_out, upsample_w):
    """Fold a 3x3 SAME conv's width taps (and optionally a 2x nearest width
    upsample + the zero padding) into 3 banded matrices, one per dy tap.

    Returns (3, w_in*Cin, w_out*Cout).  lhs lane layout: src_col*Cin + c,
    output lane layout: out_col*Cout + o.
    """
    kh, kw, cin, cout = w_hwio.shape
    sel = np.zeros((kw, w_in, w_out), np.float32)
    for dx in range(kw):
        for j in range(w_out):
            q = j + dx - 1                       # column in (upsampled) padded image
            if 0 <= q < w_out:                   # outside -> zero pad -> no entry
                s = q // 2 if upsample_w else q  # source column in kernel input
                sel[dx, s, j] = 1.0
    sel = jnp.asarray(sel)
    mats = [
        jnp.einsum("xsu,xco->scuo", sel, w_hwio[dy],
                   precision=lax.Precision.HIGHEST).reshape(w_in * cin, w_out * cout)
        for dy in range(kh)
    ]
    return jnp.stack(mats)


def channel_sum_matrices(w_out, cout):
    # ssel[(j*cout + o), o] = 1  -> per-channel reduction over width positions.
    s = np.tile(np.eye(cout, dtype=np.float32), (w_out, 1))
    return jnp.asarray(s), jnp.asarray(s.T)


def glu_select_matrices(w_out, cout):
    # a picks channels [0, C), b picks channels [C, 2C) from the interleaved
    # (j*cout + o) lane layout, producing compact (j*C + c) lanes.
    c = cout // 2
    a = np.zeros((w_out * cout, w_out * c), np.float32)
    b = np.zeros((w_out * cout, w_out * c), np.float32)
    for j in range(w_out):
        for ch in range(c):
            a[j * cout + ch, j * c + ch] = 1.0
            b[j * cout + c + ch, j * c + ch] = 1.0
    return jnp.asarray(a), jnp.asarray(b)


# ---------------------------------------------------------------------------
# Fused kernel: (conv3x3 + BatchNorm(train stats) + GLU) x 2, whole batch.
# ---------------------------------------------------------------------------
def _upblock_kernel(x_ref, m1_ref, m2_ref, ssel_ref, sselT_ref, asel_ref,
                    bsel_ref, o_ref, xp1_ref, xp2_ref, *, batch, ho, eps):
    rows = batch * ho

    def conv_rows(xp_ref, m_ref):
        # xp_ref: (batch, ho+2, Lin) zero row-padded input; m_ref: (3, Lin, Lout)
        lin = xp_ref.shape[-1]
        acc = None
        for dy in range(3):
            lhs = xp_ref[:, dy:dy + ho, :].reshape(rows, lin)
            part = jnp.dot(lhs, m_ref[dy], preferred_element_type=jnp.float32)
            acc = part if acc is None else acc + part
        return acc                                        # (rows, Lout)

    def bn_glu(y):
        # y: (rows, Wo*Co2); channel o lives at lane j*Co2 + o.
        co2 = ssel_ref.shape[-1]
        wo = y.shape[-1] // co2
        n = rows * wo
        ssel = ssel_ref[...]
        cs = jnp.dot(y, ssel, preferred_element_type=jnp.float32)        # (rows, Co2)
        css = jnp.dot(y * y, ssel, preferred_element_type=jnp.float32)
        mean = jnp.sum(cs, axis=0, keepdims=True) / n                    # (1, Co2)
        var = jnp.sum(css, axis=0, keepdims=True) / n - mean * mean
        # TODO(synk): sumsq - mean^2 can cancel for large activations; switch to
        # a centered / Welford variance if this block is scaled up.
        scale = lax.rsqrt(var + eps)                                     # gamma = 1
        shift = -mean * scale                                            # beta  = 0
        scale_f = jnp.dot(scale, sselT_ref[...],
                          preferred_element_type=jnp.float32)            # (1, Wo*Co2)
        shift_f = jnp.dot(shift, sselT_ref[...],
                          preferred_element_type=jnp.float32)
        yn = y * scale_f + shift_f
        a = jnp.dot(yn, asel_ref[...], preferred_element_type=jnp.float32)
        b = jnp.dot(yn, bsel_ref[...], preferred_element_type=jnp.float32)
        return a * jax.nn.sigmoid(b)                                     # (rows, Wo*C)

    # ---- stage 1: (W-upsample + pad folded into m1) conv + BN + GLU ----
    xp1_ref[...] = jnp.zeros_like(xp1_ref)
    xp1_ref[:, 1:ho + 1, :] = x_ref[...]
    h1 = bn_glu(conv_rows(xp1_ref, m1_ref))

    # ---- stage 2: conv + BN + GLU (pad fused in-kernel) ----
    xp2_ref[...] = jnp.zeros_like(xp2_ref)
    xp2_ref[:, 1:ho + 1, :] = h1.reshape(batch, ho, -1)
    h2 = bn_glu(conv_rows(xp2_ref, m2_ref))

    o_ref[...] = h2


def upblock_forward(x_nhwc, w1_hwio, w2_hwio):
    b, h, w, cin = x_nhwc.shape
    co2 = w1_hwio.shape[-1]
    c = co2 // 2
    ho, wo = 2 * h, 2 * w
    rows = b * ho

    # H-direction nearest upsample only (one tiny XLA copy); the W-direction
    # upsample and all zero padding are fused into the kernel / band matrices,
    # so the 4x-upsampled, padded activations never hit HBM.
    x_up = jnp.repeat(x_nhwc, 2, axis=1).reshape(b, ho, w * cin)   # (B, Ho, W*Cin)

    m1 = conv_band_matrices(w1_hwio, w, wo, upsample_w=True)       # (3, W*Cin,  Wo*Co2)
    m2 = conv_band_matrices(w2_hwio, wo, wo, upsample_w=False)     # (3, Wo*C,   Wo*Co2)
    ssel, ssel_t = channel_sum_matrices(wo, co2)
    asel, bsel = glu_select_matrices(wo, co2)

    kernel = functools.partial(_upblock_kernel, batch=b, ho=ho, eps=1e-5)
    out = pl.pallas_call(
        kernel,
        out_shape=jax.ShapeDtypeStruct((rows, wo * c), jnp.float32),
        grid_spec=pltpu.PrefetchScalarGridSpec(
            num_scalar_prefetch=0,
            grid=(1,),
            in_specs=[
                pl.BlockSpec(x_up.shape, lambda i: (0, 0, 0)),
                pl.BlockSpec(m1.shape, lambda i: (0, 0, 0)),
                pl.BlockSpec(m2.shape, lambda i: (0, 0, 0)),
                pl.BlockSpec(ssel.shape, lambda i: (0, 0)),
                pl.BlockSpec(ssel_t.shape, lambda i: (0, 0)),
                pl.BlockSpec(asel.shape, lambda i: (0, 0)),
                pl.BlockSpec(bsel.shape, lambda i: (0, 0)),
            ],
            out_specs=pl.BlockSpec((rows, wo * c), lambda i: (0, 0)),
            scratch_shapes=[
                pltpu.VMEM((b, ho + 2, w * cin), jnp.float32),   # stage-1 row-padded in
                pltpu.VMEM((b, ho + 2, wo * c), jnp.float32),    # stage-2 row-padded in
            ],
        ),
        compiler_params=pltpu.CompilerParams(
            dimension_semantics=("arbitrary",)),
    )(x_up, m1, m2, ssel, ssel_t, asel, bsel)
    return out.reshape(b, ho, wo, c)


# ---------------------------------------------------------------------------
# Parameter setup (glue): spectral-norm weight normalization
# ---------------------------------------------------------------------------
def spectral_normalize(w_oihw, n_iter=30):
    # TODO(synk): PyTorch does 1 power iteration per forward with a random
    # persistent u; here we converge the power iteration deterministically.
    cout = w_oihw.shape[0]
    wm = w_oihw.reshape(cout, -1)
    v = jnp.ones((wm.shape[1],), jnp.float32)
    v = v / jnp.linalg.norm(v)
    u = jnp.ones((cout,), jnp.float32) / jnp.sqrt(cout)
    for _ in range(n_iter):
        u = wm @ v
        u = u / (jnp.linalg.norm(u) + 1e-12)
        v = wm.T @ u
        v = v / (jnp.linalg.norm(v) + 1e-12)
    sigma = u @ (wm @ v)
    return w_oihw / sigma


def oihw_to_hwio(w):
    return jnp.transpose(w, (2, 3, 1, 0))


# ---------------------------------------------------------------------------
# Pure-JAX reference (for correctness check)
# ---------------------------------------------------------------------------
def _ref_bn_glu(y, eps=1e-5):
    mean = jnp.mean(y, axis=(0, 1, 2), keepdims=True)
    var = jnp.mean((y - mean) ** 2, axis=(0, 1, 2), keepdims=True)
    yn = (y - mean) / jnp.sqrt(var + eps)
    c = y.shape[-1] // 2
    return yn[..., :c] * jax.nn.sigmoid(yn[..., c:])


def _ref_conv(x, w_hwio):
    return lax.conv_general_dilated(
        x, w_hwio, (1, 1), "SAME",
        dimension_numbers=("NHWC", "HWIO", "NHWC"),
        precision=lax.Precision.HIGHEST)


def upblock_reference(x_nhwc, w1_hwio, w2_hwio):
    x_up = jnp.repeat(jnp.repeat(x_nhwc, 2, axis=1), 2, axis=2)
    h1 = _ref_bn_glu(_ref_conv(x_up, w1_hwio))
    h2 = _ref_bn_glu(_ref_conv(h1, w2_hwio))
    return h2


# ---------------------------------------------------------------------------
if __name__ == "__main__":
    B, Cin, H, W = 2, 4, 16, 16
    out_planes = 4

    key = jax.random.PRNGKey(0)
    kx, k1, k2 = jax.random.split(key, 3)

    # input (NCHW in the PyTorch module; kernel works in NHWC / lane-flattened)
    x_nchw = jax.random.normal(kx, (B, Cin, H, W), jnp.float32)
    x_nhwc = jnp.transpose(x_nchw, (0, 2, 3, 1))

    # conv weights, PyTorch OIHW shapes: (out_planes*2, in, 3, 3)
    w1_oihw = 0.1 * jax.random.normal(k1, (out_planes * 2, Cin, 3, 3), jnp.float32)
    w2_oihw = 0.1 * jax.random.normal(k2, (out_planes * 2, out_planes, 3, 3), jnp.float32)
    w1_hwio = oihw_to_hwio(spectral_normalize(w1_oihw))
    w2_hwio = oihw_to_hwio(spectral_normalize(w2_oihw))

    out = jax.block_until_ready(jax.jit(upblock_forward)(x_nhwc, w1_hwio, w2_hwio))
    assert out.shape == (B, 2 * H, 2 * W, out_planes), out.shape

    ref = jax.block_until_ready(upblock_reference(x_nhwc, w1_hwio, w2_hwio))
    # tolerance covers MXU pass-count / summation-order differences; real
    # layout or indexing bugs would produce O(0.1-1) errors.
    assert jnp.allclose(out, ref, rtol=1e-2, atol=1e-2), (
        float(jnp.max(jnp.abs(out - ref))))

    print("KERNEL_OK")
</pallas_src>

<mosaic_0001>
module attributes {stable_mosaic.version = 11 : i64} {
  func.func @_upblock_kernel(%arg0: i32, %arg1: memref<2x32x64xf32, #tpu.memory_space<vmem>>, %arg2: memref<3x64x256xf32, #tpu.memory_space<vmem>>, %arg3: memref<3x128x256xf32, #tpu.memory_space<vmem>>, %arg4: memref<256x8xf32, #tpu.memory_space<vmem>>, %arg5: memref<8x256xf32, #tpu.memory_space<vmem>>, %arg6: memref<256x128xf32, #tpu.memory_space<vmem>>, %arg7: memref<256x128xf32, #tpu.memory_space<vmem>>, %arg8: memref<64x128xf32, #tpu.memory_space<vmem>>, %arg9: memref<2x34x64xf32, #tpu.memory_space<vmem>>, %arg10: memref<2x34x128xf32, #tpu.memory_space<vmem>>) attributes {dimension_semantics = [#tpu.dimension_semantics<arbitrary>], iteration_bounds = array<i64: 1>, scalar_prefetch = 0 : i64, scratch_operands = 2 : i64, tpu.core_type = #tpu.core_type<tc>, window_params = [{pipeline_mode = #tpu.pipeline_mode<synchronous>, transform_indices = @transform_0, window_bounds = array<i64: 2, 32, 64>}, {pipeline_mode = #tpu.pipeline_mode<synchronous>, transform_indices = @transform_1, window_bounds = array<i64: 3, 64, 256>}, {pipeline_mode = #tpu.pipeline_mode<synchronous>, transform_indices = @transform_2, window_bounds = array<i64: 3, 128, 256>}, {pipeline_mode = #tpu.pipeline_mode<synchronous>, transform_indices = @transform_3, window_bounds = array<i64: 256, 8>}, {pipeline_mode = #tpu.pipeline_mode<synchronous>, transform_indices = @transform_4, window_bounds = array<i64: 8, 256>}, {pipeline_mode = #tpu.pipeline_mode<synchronous>, transform_indices = @transform_5, window_bounds = array<i64: 256, 128>}, {pipeline_mode = #tpu.pipeline_mode<synchronous>, transform_indices = @transform_6, window_bounds = array<i64: 256, 128>}, {pipeline_mode = #tpu.pipeline_mode<synchronous>, transform_indices = @transform_7, window_bounds = array<i64: 64, 128>}]} {
    %cst = arith.constant 0.000000e+00 : f32
    %0 = vector.broadcast %cst : f32 to vector<2x34x64xf32>
    %c0 = arith.constant 0 : index
    %c0_0 = arith.constant 0 : index
    %c0_1 = arith.constant 0 : index
    %1 = vector.load %arg9[%c0, %c0_0, %c0_1] : memref<2x34x64xf32, #tpu.memory_space<vmem>>, vector<2x34x64xf32>
    tpu.vector_store %arg9[%c0, %c0_0, %c0_1], %0 {strides = array<i32>} : memref<2x34x64xf32, #tpu.memory_space<vmem>>, vector<2x34x64xf32>,
    %c0_2 = arith.constant 0 : index
    %c0_3 = arith.constant 0 : index
    %c0_4 = arith.constant 0 : index
    %2 = vector.load %arg1[%c0_2, %c0_3, %c0_4] : memref<2x32x64xf32, #tpu.memory_space<vmem>>, vector<2x32x64xf32>
    %c0_5 = arith.constant 0 : index
    %c1 = arith.constant 1 : index
    %c0_6 = arith.constant 0 : index
    %3 = vector.load %arg9[%c0_5, %c1, %c0_6] : memref<2x34x64xf32, #tpu.memory_space<vmem>>, vector<2x32x64xf32>
    tpu.vector_store %arg9[%c0_5, %c1, %c0_6], %2 {strides = array<i32>} : memref<2x34x64xf32, #tpu.memory_space<vmem>>, vector<2x32x64xf32>,
    %c0_7 = arith.constant 0 : index
    %c0_8 = arith.constant 0 : index
    %c0_9 = arith.constant 0 : index
    %4 = vector.load %arg9[%c0_7, %c0_8, %c0_9] : memref<2x34x64xf32, #tpu.memory_space<vmem>>, vector<2x32x64xf32>
    %5 = vector.shape_cast %4 : vector<2x32x64xf32> to vector<64x64xf32>
    %c0_10 = arith.constant 0 : index
    %c0_11 = arith.constant 0 : index
    %c0_12 = arith.constant 0 : index
    %6 = vector.load %arg2[%c0_10, %c0_11, %c0_12] : memref<3x64x256xf32, #tpu.memory_space<vmem>>, vector<1x64x256xf32>
    %7 = vector.shape_cast %6 : vector<1x64x256xf32> to vector<64x256xf32>
    %cst_13 = arith.constant dense<0.000000e+00> : vector<64x256xf32>
    %8 = tpu.matmul %5, %7, %cst_13 {dimension_numbers = #tpu.dot_dimension_numbers<[1], [0], [0], [1], [0, 0, 1, 1], [], []>} : vector<64x64xf32>, vector<64x256xf32>, vector<64x256xf32> -> vector<64x256xf32>
    %c0_14 = arith.constant 0 : index
    %c1_15 = arith.constant 1 : index
    %c0_16 = arith.constant 0 : index
    %9 = vector.load %arg9[%c0_14, %c1_15, %c0_16] : memref<2x34x64xf32, #tpu.memory_space<vmem>>, vector<2x32x64xf32>
    %10 = vector.shape_cast %9 : vector<2x32x64xf32> to vector<64x64xf32>
    %c1_17 = arith.constant 1 : index
    %c0_18 = arith.constant 0 : index
    %c0_19 = arith.constant 0 : index
    %11 = vector.load %arg2[%c1_17, %c0_18, %c0_19] : memref<3x64x256xf32, #tpu.memory_space<vmem>>, vector<1x64x256xf32>
    %12 = vector.shape_cast %11 : vector<1x64x256xf32> to vector<64x256xf32>
    %cst_20 = arith.constant dense<0.000000e+00> : vector<64x256xf32>
    %13 = tpu.matmul %10, %12, %cst_20 {dimension_numbers = #tpu.dot_dimension_numbers<[1], [0], [0], [1], [0, 0, 1, 1], [], []>} : vector<64x64xf32>, vector<64x256xf32>, vector<64x256xf32> -> vector<64x256xf32>
    %14 = arith.addf %8, %13 : vector<64x256xf32>
    %c0_21 = arith.constant 0 : index
    %c2 = arith.constant 2 : index
    %c0_22 = arith.constant 0 : index
    %15 = vector.load %arg9[%c0_21, %c2, %c0_22] : memref<2x34x64xf32, #tpu.memory_space<vmem>>, vector<2x32x64xf32>
    %16 = vector.shape_cast %15 : vector<2x32x64xf32> to vector<64x64xf32>
    %c2_23 = arith.constant 2 : index
    %c0_24 = arith.constant 0 : index
    %c0_25 = arith.constant 0 : index
    %17 = vector.load %arg2[%c2_23, %c0_24, %c0_25] : memref<3x64x256xf32, #tpu.memory_space<vmem>>, vector<1x64x256xf32>
    %18 = vector.shape_cast %17 : vector<1x64x256xf32> to vector<64x256xf32>
    %cst_26 = arith.constant dense<0.000000e+00> : vector<64x256xf32>
    %19 = tpu.matmul %16, %18, %cst_26 {dimension_numbers = #tpu.dot_dimension_numbers<[1], [0], [0], [1], [0, 0, 1, 1], [], []>} : vector<64x64xf32>, vector<64x256xf32>, vector<64x256xf32> -> vector<64x256xf32>
    %20 = arith.addf %14, %19 : vector<64x256xf32>
    %c0_27 = arith.constant 0 : index
    %c0_28 = arith.constant 0 : index
    %21 = vector.load %arg4[%c0_27, %c0_28] : memref<256x8xf32, #tpu.memory_space<vmem>>, vector<256x8xf32>
    %cst_29 = arith.constant dense<0.000000e+00> : vector<64x8xf32>
    %22 = tpu.matmul %20, %21, %cst_29 {dimension_numbers = #tpu.dot_dimension_numbers<[1], [0], [0], [1], [0, 0, 1, 1], [], []>} : vector<64x256xf32>, vector<256x8xf32>, vector<64x8xf32> -> vector<64x8xf32>
    %23 = arith.mulf %20, %20 : vector<64x256xf32>
    %cst_30 = arith.constant dense<0.000000e+00> : vector<64x8xf32>
    %24 = tpu.matmul %23, %21, %cst_30 {dimension_numbers = #tpu.dot_dimension_numbers<[1], [0], [0], [1], [0, 0, 1, 1], [], []>} : vector<64x256xf32>, vector<256x8xf32>, vector<64x8xf32> -> vector<64x8xf32>
    %cst_31 = arith.constant dense<0.000000e+00> : vector<8xf32>
    %25 = vector.multi_reduction <add>, %22, %cst_31 [0] : vector<64x8xf32> to vector<8xf32>
    %26 = vector.shape_cast %25 : vector<8xf32> to vector<1x8xf32>
    %cst_32 = arith.constant 2.048000e+03 : f32
    %27 = vector.broadcast %cst_32 : f32 to vector<1x8xf32>
    %28 = arith.divf %26, %27 : vector<1x8xf32>
    %cst_33 = arith.constant dense<0.000000e+00> : vector<8xf32>
    %29 = vector.multi_reduction <add>, %24, %cst_33 [0] : vector<64x8xf32> to vector<8xf32>
    %30 = vector.shape_cast %29 : vector<8xf32> to vector<1x8xf32>
    %cst_34 = arith.constant 2.048000e+03 : f32
    %31 = vector.broadcast %cst_34 : f32 to vector<1x8xf32>
    %32 = arith.divf %30, %31 : vector<1x8xf32>
    %33 = arith.mulf %28, %28 : vector<1x8xf32>
    %34 = arith.subf %32, %33 : vector<1x8xf32>
    %cst_35 = arith.constant 9.99999974E-6 : f32
    %35 = vector.broadcast %cst_35 : f32 to vector<1x8xf32>
    %36 = arith.addf %34, %35 : vector<1x8xf32>
    %37 = math.rsqrt %36 : vector<1x8xf32>
    %cst_36 = arith.constant 0.000000e+00 : f32
    %38 = vector.broadcast %cst_36 : f32 to vector<1x8xf32>
    %39 = arith.subf %38, %28 : vector<1x8xf32>
    %40 = arith.mulf %39, %37 : vector<1x8xf32>
    %c0_37 = arith.constant 0 : index
    %c0_38 = arith.constant 0 : index
    %41 = vector.load %arg5[%c0_37, %c0_38] : memref<8x256xf32, #tpu.memory_space<vmem>>, vector<8x256xf32>
    %cst_39 = arith.constant dense<0.000000e+00> : vector<1x256xf32>
    %42 = tpu.matmul %37, %41, %cst_39 {dimension_numbers = #tpu.dot_dimension_numbers<[1], [0], [0], [1], [0, 0, 1, 1], [], []>} : vector<1x8xf32>, vector<8x256xf32>, vector<1x256xf32> -> vector<1x256xf32>
    %c0_40 = arith.constant 0 : index
    %c0_41 = arith.constant 0 : index
    %43 = vector.load %arg5[%c0_40, %c0_41] : memref<8x256xf32, #tpu.memory_space<vmem>>, vector<8x256xf32>
    %cst_42 = arith.constant dense<0.000000e+00> : vector<1x256xf32>
    %44 = tpu.matmul %40, %43, %cst_42 {dimension_numbers = #tpu.dot_dimension_numbers<[1], [0], [0], [1], [0, 0, 1, 1], [], []>} : vector<1x8xf32>, vector<8x256xf32>, vector<1x256xf32> -> vector<1x256xf32>
    %45 = vector.broadcast %42 : vector<1x256xf32> to vector<64x256xf32>
    %46 = arith.mulf %20, %45 : vector<64x256xf32>
    %47 = vector.broadcast %44 : vector<1x256xf32> to vector<64x256xf32>
    %48 = arith.addf %46, %47 : vector<64x256xf32>
    %c0_43 = arith.constant 0 : index
    %c0_44 = arith.constant 0 : index
    %49 = vector.load %arg6[%c0_43, %c0_44] : memref<256x128xf32, #tpu.memory_space<vmem>>, vector<256x128xf32>
    %cst_45 = arith.constant dense<0.000000e+00> : vector<64x128xf32>
    %50 = tpu.matmul %48, %49, %cst_45 {dimension_numbers = #tpu.dot_dimension_numbers<[1], [0], [0], [1], [0, 0, 1, 1], [], []>} : vector<64x256xf32>, vector<256x128xf32>, vector<64x128xf32> -> vector<64x128xf32>
    %c0_46 = arith.constant 0 : index
    %c0_47 = arith.constant 0 : index
    %51 = vector.load %arg7[%c0_46, %c0_47] : memref<256x128xf32, #tpu.memory_space<vmem>>, vector<256x128xf32>
    %cst_48 = arith.constant dense<0.000000e+00> : vector<64x128xf32>
    %52 = tpu.matmul %48, %51, %cst_48 {dimension_numbers = #tpu.dot_dimension_numbers<[1], [0], [0], [1], [0, 0, 1, 1], [], []>} : vector<64x256xf32>, vector<256x128xf32>, vector<64x128xf32> -> vector<64x128xf32>
    %53 = arith.negf %52 : vector<64x128xf32>
    %54 = math.exp %53 : vector<64x128xf32>
    %cst_49 = arith.constant 1.000000e+00 : f32
    %55 = vector.broadcast %cst_49 : f32 to vector<64x128xf32>
    %56 = arith.addf %55, %54 : vector<64x128xf32>
    %57 = arith.divf %55, %56 : vector<64x128xf32>
    %58 = arith.mulf %50, %57 : vector<64x128xf32>
    %cst_50 = arith.constant 0.000000e+00 : f32
    %59 = vector.broadcast %cst_50 : f32 to vector<2x34x128xf32>
    %c0_51 = arith.constant 0 : index
    %c0_52 = arith.constant 0 : index
    %c0_53 = arith.constant 0 : index
    %60 = vector.load %arg10[%c0_51, %c0_52, %c0_53] : memref<2x34x128xf32, #tpu.memory_space<vmem>>, vector<2x34x128xf32>
    tpu.vector_store %arg10[%c0_51, %c0_52, %c0_53], %59 {strides = array<i32>} : memref<2x34x128xf32, #tpu.memory_space<vmem>>, vector<2x34x128xf32>,
    %61 = vector.shape_cast %58 : vector<64x128xf32> to vector<2x32x128xf32>
    %c0_54 = arith.constant 0 : index
    %c1_55 = arith.constant 1 : index
    %c0_56 = arith.constant 0 : index
    %62 = vector.load %arg10[%c0_54, %c1_55, %c0_56] : memref<2x34x128xf32, #tpu.memory_space<vmem>>, vector<2x32x128xf32>
    tpu.vector_store %arg10[%c0_54, %c1_55, %c0_56], %61 {strides = array<i32>} : memref<2x34x128xf32, #tpu.memory_space<vmem>>, vector<2x32x128xf32>,
    %c0_57 = arith.constant 0 : index
    %c0_58 = arith.constant 0 : index
    %c0_59 = arith.constant 0 : index
    %63 = vector.load %arg10[%c0_57, %c0_58, %c0_59] : memref<2x34x128xf32, #tpu.memory_space<vmem>>, vector<2x32x128xf32>
    %64 = vector.shape_cast %63 : vector<2x32x128xf32> to vector<64x128xf32>
    %c0_60 = arith.constant 0 : index
    %c0_61 = arith.constant 0 : index
    %c0_62 = arith.constant 0 : index
    %65 = vector.load %arg3[%c0_60, %c0_61, %c0_62] : memref<3x128x256xf32, #tpu.memory_space<vmem>>, vector<1x128x256xf32>
    %66 = vector.shape_cast %65 : vector<1x128x256xf32> to vector<128x256xf32>
    %cst_63 = arith.constant dense<0.000000e+00> : vector<64x256xf32>
    %67 = tpu.matmul %64, %66, %cst_63 {dimension_numbers = #tpu.dot_dimension_numbers<[1], [0], [0], [1], [0, 0, 1, 1], [], []>} : vector<64x128xf32>, vector<128x256xf32>, vector<64x256xf32> -> vector<64x256xf32>
    %c0_64 = arith.constant 0 : index
    %c1_65 = arith.constant 1 : index
    %c0_66 = arith.constant 0 : index
    %68 = vector.load %arg10[%c0_64, %c1_65, %c0_66] : memref<2x34x128xf32, #tpu.memory_space<vmem>>, vector<2x32x128xf32>
    %69 = vector.shape_cast %68 : vector<2x32x128xf32> to vector<64x128xf32>
    %c1_67 = arith.constant 1 : index
    %c0_68 = arith.constant 0 : index
    %c0_69 = arith.constant 0 : index
    %70 = vector.load %arg3[%c1_67, %c0_68, %c0_69] : memref<3x128x256xf32, #tpu.memory_space<vmem>>, vector<1x128x256xf32>
    %71 = vector.shape_cast %70 : vector<1x128x256xf32> to vector<128x256xf32>
    %cst_70 = arith.constant dense<0.000000e+00> : vector<64x256xf32>
    %72 = tpu.matmul %69, %71, %cst_70 {dimension_numbers = #tpu.dot_dimension_numbers<[1], [0], [0], [1], [0, 0, 1, 1], [], []>} : vector<64x128xf32>, vector<128x256xf32>, vector<64x256xf32> -> vector<64x256xf32>
    %73 = arith.addf %67, %72 : vector<64x256xf32>
    %c0_71 = arith.constant 0 : index
    %c2_72 = arith.constant 2 : index
    %c0_73 = arith.constant 0 : index
    %74 = vector.load %arg10[%c0_71, %c2_72, %c0_73] : memref<2x34x128xf32, #tpu.memory_space<vmem>>, vector<2x32x128xf32>
    %75 = vector.shape_cast %74 : vector<2x32x128xf32> to vector<64x128xf32>
    %c2_74 = arith.constant 2 : index
    %c0_75 = arith.constant 0 : index
    %c0_76 = arith.constant 0 : index
    %76 = vector.load %arg3[%c2_74, %c0_75, %c0_76] : memref<3x128x256xf32, #tpu.memory_space<vmem>>, vector<1x128x256xf32>
    %77 = vector.shape_cast %76 : vector<1x128x256xf32> to vector<128x256xf32>
    %cst_77 = arith.constant dense<0.000000e+00> : vector<64x256xf32>
    %78 = tpu.matmul %75, %77, %cst_77 {dimension_numbers = #tpu.dot_dimension_numbers<[1], [0], [0], [1], [0, 0, 1, 1], [], []>} : vector<64x128xf32>, vector<128x256xf32>, vector<64x256xf32> -> vector<64x256xf32>
    %79 = arith.addf %73, %78 : vector<64x256xf32>
    %c0_78 = arith.constant 0 : index
    %c0_79 = arith.constant 0 : index
    %80 = vector.load %arg4[%c0_78, %c0_79] : memref<256x8xf32, #tpu.memory_space<vmem>>, vector<256x8xf32>
    %cst_80 = arith.constant dense<0.000000e+00> : vector<64x8xf32>
    %81 = tpu.matmul %79, %80, %cst_80 {dimension_numbers = #tpu.dot_dimension_numbers<[1], [0], [0], [1], [0, 0, 1, 1], [], []>} : vector<64x256xf32>, vector<256x8xf32>, vector<64x8xf32> -> vector<64x8xf32>
    %82 = arith.mulf %79, %79 : vector<64x256xf32>
    %cst_81 = arith.constant dense<0.000000e+00> : vector<64x8xf32>
    %83 = tpu.matmul %82, %80, %cst_81 {dimension_numbers = #tpu.dot_dimension_numbers<[1], [0], [0], [1], [0, 0, 1, 1], [], []>} : vector<64x256xf32>, vector<256x8xf32>, vector<64x8xf32> -> vector<64x8xf32>
    %cst_82 = arith.constant dense<0.000000e+00> : vector<8xf32>
    %84 = vector.multi_reduction <add>, %81, %cst_82 [0] : vector<64x8xf32> to vector<8xf32>
    %85 = vector.shape_cast %84 : vector<8xf32> to vector<1x8xf32>
    %cst_83 = arith.constant 2.048000e+03 : f32
    %86 = vector.broadcast %cst_83 : f32 to vector<1x8xf32>
    %87 = arith.divf %85, %86 : vector<1x8xf32>
    %cst_84 = arith.constant dense<0.000000e+00> : vector<8xf32>
    %88 = vector.multi_reduction <add>, %83, %cst_84 [0] : vector<64x8xf32> to vector<8xf32>
    %89 = vector.shape_cast %88 : vector<8xf32> to vector<1x8xf32>
    %cst_85 = arith.constant 2.048000e+03 : f32
    %90 = vector.broadcast %cst_85 : f32 to vector<1x8xf32>
    %91 = arith.divf %89, %90 : vector<1x8xf32>
    %92 = arith.mulf %87, %87 : vector<1x8xf32>
    %93 = arith.subf %91, %92 : vector<1x8xf32>
    %cst_86 = arith.constant 9.99999974E-6 : f32
    %94 = vector.broadcast %cst_86 : f32 to vector<1x8xf32>
    %95 = arith.addf %93, %94 : vector<1x8xf32>
    %96 = math.rsqrt %95 : vector<1x8xf32>
    %cst_87 = arith.constant 0.000000e+00 : f32
    %97 = vector.broadcast %cst_87 : f32 to vector<1x8xf32>
    %98 = arith.subf %97, %87 : vector<1x8xf32>
    %99 = arith.mulf %98, %96 : vector<1x8xf32>
    %c0_88 = arith.constant 0 : index
    %c0_89 = arith.constant 0 : index
    %100 = vector.load %arg5[%c0_88, %c0_89] : memref<8x256xf32, #tpu.memory_space<vmem>>, vector<8x256xf32>
    %cst_90 = arith.constant dense<0.000000e+00> : vector<1x256xf32>
    %101 = tpu.matmul %96, %100, %cst_90 {dimension_numbers = #tpu.dot_dimension_numbers<[1], [0], [0], [1], [0, 0, 1, 1], [], []>} : vector<1x8xf32>, vector<8x256xf32>, vector<1x256xf32> -> vector<1x256xf32>
    %c0_91 = arith.constant 0 : index
    %c0_92 = arith.constant 0 : index
    %102 = vector.load %arg5[%c0_91, %c0_92] : memref<8x256xf32, #tpu.memory_space<vmem>>, vector<8x256xf32>
    %cst_93 = arith.constant dense<0.000000e+00> : vector<1x256xf32>
    %103 = tpu.matmul %99, %102, %cst_93 {dimension_numbers = #tpu.dot_dimension_numbers<[1], [0], [0], [1], [0, 0, 1, 1], [], []>} : vector<1x8xf32>, vector<8x256xf32>, vector<1x256xf32> -> vector<1x256xf32>
    %104 = vector.broadcast %101 : vector<1x256xf32> to vector<64x256xf32>
    %105 = arith.mulf %79, %104 : vector<64x256xf32>
    %106 = vector.broadcast %103 : vector<1x256xf32> to vector<64x256xf32>
    %107 = arith.addf %105, %106 : vector<64x256xf32>
    %c0_94 = arith.constant 0 : index
    %c0_95 = arith.constant 0 : index
    %108 = vector.load %arg6[%c0_94, %c0_95] : memref<256x128xf32, #tpu.memory_space<vmem>>, vector<256x128xf32>
    %cst_96 = arith.constant dense<0.000000e+00> : vector<64x128xf32>
    %109 = tpu.matmul %107, %108, %cst_96 {dimension_numbers = #tpu.dot_dimension_numbers<[1], [0], [0], [1], [0, 0, 1, 1], [], []>} : vector<64x256xf32>, vector<256x128xf32>, vector<64x128xf32> -> vector<64x128xf32>
    %c0_97 = arith.constant 0 : index
    %c0_98 = arith.constant 0 : index
    %110 = vector.load %arg7[%c0_97, %c0_98] : memref<256x128xf32, #tpu.memory_space<vmem>>, vector<256x128xf32>
    %cst_99 = arith.constant dense<0.000000e+00> : vector<64x128xf32>
    %111 = tpu.matmul %107, %110, %cst_99 {dimension_numbers = #tpu.dot_dimension_numbers<[1], [0], [0], [1], [0, 0, 1, 1], [], []>} : vector<64x256xf32>, vector<256x128xf32>, vector<64x128xf32> -> vector<64x128xf32>
    %112 = arith.negf %111 : vector<64x128xf32>
    %113 = math.exp %112 : vector<64x128xf32>
    %cst_100 = arith.constant 1.000000e+00 : f32
    %114 = vector.broadcast %cst_100 : f32 to vector<64x128xf32>
    %115 = arith.addf %114, %113 : vector<64x128xf32>
    %116 = arith.divf %114, %115 : vector<64x128xf32>
    %117 = arith.mulf %109, %116 : vector<64x128xf32>
    %c0_101 = arith.constant 0 : index
    %c0_102 = arith.constant 0 : index
    %118 = vector.load %arg8[%c0_101, %c0_102] : memref<64x128xf32, #tpu.memory_space<vmem>>, vector<64x128xf32>
    tpu.vector_store %arg8[%c0_101, %c0_102], %117 {strides = array<i32>} : memref<64x128xf32, #tpu.memory_space<vmem>>, vector<64x128xf32>,
    return
  }
  func.func @transform_0(%arg0: i32) -> (i32, i32, i32) {
    %c0_i32 = arith.constant 0 : i32
    %c0_i32_0 = arith.constant 0 : i32
    %c0_i32_1 = arith.constant 0 : i32
    %c0_i32_2 = arith.constant 0 : i32
    return %c0_i32, %c0_i32_0, %c0_i32_1 : i32, i32, i32
  }
  func.func @transform_1(%arg0: i32) -> (i32, i32, i32) {
    %c0_i32 = arith.constant 0 : i32
    %c0_i32_0 = arith.constant 0 : i32
    %c0_i32_1 = arith.constant 0 : i32
    %c0_i32_2 = arith.constant 0 : i32
    return %c0_i32, %c0_i32_0, %c0_i32_1 : i32, i32, i32
  }
  func.func @transform_2(%arg0: i32) -> (i32, i32, i32) {
    %c0_i32 = arith.constant 0 : i32
    %c0_i32_0 = arith.constant 0 : i32
    %c0_i32_1 = arith.constant 0 : i32
    %c0_i32_2 = arith.constant 0 : i32
    return %c0_i32, %c0_i32_0, %c0_i32_1 : i32, i32, i32
  }
  func.func @transform_3(%arg0: i32) -> (i32, i32) {
    %c0_i32 = arith.constant 0 : i32
    %c0_i32_0 = arith.constant 0 : i32
    %c0_i32_1 = arith.constant 0 : i32
    return %c0_i32, %c0_i32_0 : i32, i32
  }
  func.func @transform_4(%arg0: i32) -> (i32, i32) {
    %c0_i32 = arith.constant 0 : i32
    %c0_i32_0 = arith.constant 0 : i32
    %c0_i32_1 = arith.constant 0 : i32
    return %c0_i32, %c0_i32_0 : i32, i32
  }
  func.func @transform_5(%arg0: i32) -> (i32, i32) {
    %c0_i32 = arith.constant 0 : i32
    %c0_i32_0 = arith.constant 0 : i32
    %c0_i32_1 = arith.constant 0 : i32
    return %c0_i32, %c0_i32_0 : i32, i32
  }
  func.func @transform_6(%arg0: i32) -> (i32, i32) {
    %c0_i32 = arith.constant 0 : i32
    %c0_i32_0 = arith.constant 0 : i32
    %c0_i32_1 = arith.constant 0 : i32
    return %c0_i32, %c0_i32_0 : i32, i32
  }
  func.func @transform_7(%arg0: i32) -> (i32, i32) {
    %c0_i32 = arith.constant 0 : i32
    %c0_i32_0 = arith.constant 0 : i32
    %c0_i32_1 = arith.constant 0 : i32
    return %c0_i32, %c0_i32_0 : i32, i32
  }
}

</mosaic_0001>

<bundles_post_ra>
// kernel: upblock_forward.1
= control target key start
LH: loop header
LB: loop body
LE: loop exit
PB: predicated region body
PF: predicated region fallthrough
CT: control target
= control target key end

     0   :  { %vm26_vm0 = vcmask 523264   ;;  %v2690_v3 = vmov 0.0   ;;  %vm31_vm1 = vcmask 517120   ;;  %vm674_vm2 = vcmask 64512   ;;  %s4319_s1 = inlined_call_operand.vmem [shape: f32[3,64,256], index: 1, kind: input, shape index: {}]   ;;  %s4320_s0 = inlined_call_operand.vmem [shape: f32[2,32,64], index: 0, kind: input, shape index: {}]   ;;  %s4321_s3 = inlined_call_operand.vmem [shape: f32[256,8], index: 3, kind: input, shape index: {}]   ;;  %s4322_s4 = inlined_call_operand.vmem [shape: f32[8,256], index: 4, kind: input, shape index: {}]   ;;  %s4323_s6 = inlined_call_operand.vmem [shape: f32[256,128], index: 6, kind: input, shape index: {}]   ;;  %s4324_s5 = inlined_call_operand.vmem [shape: f32[256,128], index: 5, kind: input, shape index: {}]   ;;  %s4325_s2 = inlined_call_operand.vmem [shape: f32[3,128,256], index: 2, kind: input, shape index: {}]   ;;  %s4326_s7 = inlined_call_operand.vmem [shape: f32[64,128], index: 7, kind: output, shape index: {}]  }
   0x1   :  { %v2464_v0 = vld [vmem:[%s4319_s1 + $0xf0] sm:$0xff]  ;;  %v2465_v1 = vld [vmem:[%s4319_s1 + $0xf8] sm:$0xff]  ;;  %27 = vst.msk [vmem:[#allocation2] sm:$0xff] %vm26_vm0, %v2690_v3  ;;  %v2462_v5 = vld [vmem:[%s4319_s1 + $0xe0] sm:$0xff] }
   0x2   :  { %v76_v2 = vld [vmem:[%s4319_s1 + $0x70] sm:$0xff]  ;;  %135 = vmatpush.msra.mxu0 %v2464_v0  ;;  %176 = vmatpush.msra.mxu1 %v2465_v1  ;;  %v77_v4 = vld [vmem:[%s4319_s1 + $0x78] sm:$0xff]  ;;  %v2463_v6 = vld [vmem:[%s4319_s1 + $0xe8] sm:$0xff]  ;;  %28 = vst.msk [vmem:[#allocation2 + $0x8] sm:$0xff] %vm26_vm0, %v2690_v3 }
   0x3   :  { %241 = vmatpush.msra.mxu2 %v76_v2  ;;  %282 = vmatpush.msra.mxu3 %v77_v4  ;;  %v74_v7 = vld [vmem:[%s4319_s1 + $0x60] sm:$0xff]  ;;  %v75_v8 = vld [vmem:[%s4319_s1 + $0x68] sm:$0xff]  ;;  %v2460_v9 = vld [vmem:[%s4319_s1 + $0xd0] sm:$0xff]  ;;  %29 = vst.msk [vmem:[#allocation2 + $0x10] sm:$0xff] %vm26_vm0, %v2690_v3 }
   0x4   :  { %136 = vmatpush.msra.mxu0 %v2462_v5  ;;  %177 = vmatpush.msra.mxu1 %v2463_v6  ;;  %v2461_v10 = vld [vmem:[%s4319_s1 + $0xd8] sm:$0xff]  ;;  %v72_v11 = vld [vmem:[%s4319_s1 + $0x50] sm:$0xff]  ;;  %30 = vst.msk [vmem:[#allocation2 + $0x18] sm:$0xff] %vm26_vm0, %v2690_v3  ;;  %v2458_v13 = vld [vmem:[%s4319_s1 + $0xc0] sm:$0xff] }
   0x5   :  { %v73_v12 = vld [vmem:[%s4319_s1 + $0x58] sm:$0xff]  ;;  %242 = vmatpush.msra.mxu2 %v74_v7  ;;  %283 = vmatpush.msra.mxu3 %v75_v8  ;;  %v2459_v14 = vld [vmem:[%s4319_s1 + $0xc8] sm:$0xff]  ;;  %33 = vst.msk [vmem:[#allocation2 + $0x28] sm:$0xff] %vm26_vm0, %v2690_v3  ;;  %v70_v15 = vld [vmem:[%s4319_s1 + $0x40] sm:$0xff] }
   0x6   :  { %137 = vmatpush.msra.mxu0 %v2460_v9  ;;  %178 = vmatpush.msra.mxu1 %v2461_v10  ;;  %v71_v16 = vld [vmem:[%s4319_s1 + $0x48] sm:$0xff]  ;;  %34 = vst.msk [vmem:[#allocation2 + $0x30] sm:$0xff] %vm26_vm0, %v2690_v3  ;;  %v2456_v17 = vld [vmem:[%s4319_s1 + $0xb0] sm:$0xff]  ;;  %v2457_v18 = vld [vmem:[%s4319_s1 + $0xb8] sm:$0xff] }
   0x7   :  { %243 = vmatpush.msra.mxu2 %v72_v11  ;;  %284 = vmatpush.msra.mxu3 %v73_v12  ;;  %35 = vst.msk [vmem:[#allocation2 + $0x38] sm:$0xff] %vm26_vm0, %v2690_v3  ;;  %v68_v19 = vld [vmem:[%s4319_s1 + $0x30] sm:$0xff]  ;;  %v69_v20 = vld [vmem:[%s4319_s1 + $0x38] sm:$0xff]  ;;  %v2454_v21 = vld [vmem:[%s4319_s1 + $0xa0] sm:$0xff] }
   0x8   :  { %138 = vmatpush.msra.mxu0 %v2458_v13  ;;  %179 = vmatpush.msra.mxu1 %v2459_v14  ;;  %36 = vst.msk [vmem:[#allocation2 + $0x40] sm:$0xff] %vm26_vm0, %v2690_v3  ;;  %v2455_v22 = vld [vmem:[%s4319_s1 + $0xa8] sm:$0xff]  ;;  %v66_v23 = vld [vmem:[%s4319_s1 + $0x20] sm:$0xff]  ;;  %v2452_v25 = vld [vmem:[%s4319_s1 + $0x90] sm:$0xff] }
   0x9   :  { %244 = vmatpush.msra.mxu2 %v70_v15  ;;  %285 = vmatpush.msra.mxu3 %v71_v16  ;;  %1253 = vst [vmem:[#allocation3] sm:$0xff] %v2690_v3  ;;  %v67_v24 = vld [vmem:[%s4319_s1 + $0x28] sm:$0xff]  ;;  %v2453_v26 = vld [vmem:[%s4319_s1 + $0x98] sm:$0xff]  ;;  %v38_v27 = vld [vmem:[%s4320_s0] sm:$0xff] }
   0xa   :  { %139 = vmatpush.msra.mxu0 %v2456_v17  ;;  %180 = vmatpush.msra.mxu1 %v2457_v18  ;;  %1254 = vst [vmem:[#allocation3 + $0x8] sm:$0xff] %v2690_v3  ;;  %v64_v28 = vld [vmem:[%s4319_s1 + $0x10] sm:$0xff]  ;;  %v65_v29 = vld [vmem:[%s4319_s1 + $0x18] sm:$0xff]  ;;  %v2450_v30 = vld [vmem:[%s4319_s1 + $0x80] sm:$0xff] }
   0xb   :  { %245 = vmatpush.msra.mxu2 %v68_v19  ;;  %286 = vmatpush.msra.mxu3 %v69_v20  ;;  %1255 = vst [vmem:[#allocation3 + $0x10] sm:$0xff] %v2690_v3  ;;  %v2451_v31 = vld [vmem:[%s4319_s1 + $0x88] sm:$0xff]  ;;  %v62_v32 = vld [vmem:[%s4319_s1] sm:$0xff]  ;;  %v2512_v34 = vld [vmem:[%s4319_s1 + $0x170] sm:$0xff] }
   0xc   :  { %140 = vmatpush.msra.mxu0 %v2454_v21  ;;  %181 = vmatpush.msra.mxu1 %v2455_v22  ;;  %46 = vst.msk [vmem:[#allocation2 + $0x1] sm:$0xff] %vm26_vm0, %v38_v27  ;;  %v63_v33 = vld [vmem:[%s4319_s1 + $0x8] sm:$0xff]  ;;  %v2513_v35 = vld [vmem:[%s4319_s1 + $0x178] sm:$0xff]  ;;  %v2510_v37 = vld [vmem:[%s4319_s1 + $0x160] sm:$0xff] }
   0xd   :  { %246 = vmatpush.msra.mxu2 %v66_v23  ;;  %287 = vmatpush.msra.mxu3 %v67_v24  ;;  %1256 = vst [vmem:[#allocation3 + $0x18] sm:$0xff] %v2690_v3  ;;  %v39_v36 = vld [vmem:[%s4320_s0 + $0x8] sm:$0xff]  ;;  %v40_v38 = vld [vmem:[%s4320_s0 + $0x10] sm:$0xff]  ;;  %v41_v42 = vld [vmem:[%s4320_s0 + $0x18] sm:$0xff] }
   0xe   :  { %141 = vmatpush.msra.mxu0 %v2452_v25  ;;  %182 = vmatpush.msra.mxu1 %v2453_v26  ;;  %1257 = vst [vmem:[#allocation3 + $0x20] sm:$0x3] %v2690_v3  ;;  %v2511_v41 = vld [vmem:[%s4319_s1 + $0x168] sm:$0xff]  ;;  %v2508_v43 = vld [vmem:[%s4319_s1 + $0x150] sm:$0xff]  ;;  %v2509_v44 = vld [vmem:[%s4319_s1 + $0x158] sm:$0xff] }
   0xf   :  { %247 = vmatpush.msra.mxu2 %v64_v28  ;;  %288 = vmatpush.msra.mxu3 %v65_v29  ;;  %1258 = vst [vmem:[#allocation3 + $0x28] sm:$0xff] %v2690_v3  ;;  %v42_v45 = vld [vmem:[%s4320_s0 + $0x20] sm:$0xff]  ;;  %v2507_v47 = vld [vmem:[%s4319_s1 + $0x148] sm:$0xff]  ;;  %v2504_v49 = vld [vmem:[%s4319_s1 + $0x130] sm:$0xff] }
  0x10   :  { %142 = vmatpush.msra.mxu0 %v2450_v30  ;;  %183 = vmatpush.msra.mxu1 %v2451_v31  ;;  %1259 = vst [vmem:[#allocation3 + $0x30] sm:$0xff] %v2690_v3  ;;  %v2506_v46 = vld [vmem:[%s4319_s1 + $0x140] sm:$0xff]  ;;  %v43_v48 = vld [vmem:[%s4320_s0 + $0x28] sm:$0xff]  ;;  %v2505_v52 = vld [vmem:[%s4319_s1 + $0x138] sm:$0xff] }
  0x11   :  { %248 = vmatpush.msra.mxu2 %v62_v32  ;;  %289 = vmatpush.msra.mxu3 %v63_v33  ;;  %1260 = vst [vmem:[#allocation3 + $0x38] sm:$0xff] %v2690_v3  ;;  %v44_v53 = vld [vmem:[%s4320_s0 + $0x30] sm:$0xff]  ;;  %v2502_v54 = vld [vmem:[%s4319_s1 + $0x120] sm:$0xff]  ;;  %v2503_v55 = vld [vmem:[%s4319_s1 + $0x128] sm:$0xff] }
  0x12   :  { %1261 = vst [vmem:[#allocation3 + $0x40] sm:$0xff] %v2690_v3  ;;  %372 = vmatpush.msrb.mxu0 %v2512_v34  ;;  %413 = vmatpush.msrb.mxu1 %v2513_v35  ;;  %v45_v58 = vld [vmem:[%s4320_s0 + $0x38] sm:$0xff]  ;;  %v2500_v59 = vld [vmem:[%s4319_s1 + $0x110] sm:$0xff]  ;;  %v2498_v63 = vld [vmem:[%s4319_s1 + $0x100] sm:$0xff] }
  0x13   :  { %v78_v39 = vld [vmem:[#allocation2 + $0x1] sm:$0xff]  ;;  %1262 = vst [vmem:[#allocation3 + $0x48] sm:$0x3] %v2690_v3  ;;  %v2501_v60 = vld [vmem:[%s4319_s1 + $0x118] sm:$0xff]  ;;  %v476_v17 = vld [vmem:[%s4321_s3 + $0x70] sm:$0xff] }
  0x14   :  { %v54_v40 = vld [vmem:[#allocation2] sm:$0xff]  ;;  %2466 = vmatmul.msk.f32.vlgmr.msra.gmra.mxu0 %vm26_vm0, %v78_v39  ;;  %2474 = vmatmul.msk.f32.vlgmr.msra.gmra.mxu1 %vm26_vm0, %v78_v39  ;;  %47 = vst.msk [vmem:[#allocation2 + $0x9] sm:$0xff] %vm26_vm0, %v39_v36  ;;  %v2499_v0 = vld [vmem:[%s4319_s1 + $0x108] sm:$0xff]  ;;  %v477_v14 = vld [vmem:[%s4321_s3 + $0x78] sm:$0xff] }
  0x15   :  { %2482 = vmatmul.msk.f32.vlgmr.msra.gmra.mxu2 %vm26_vm0, %v54_v40  ;;  %2490 = vmatmul.msk.f32.vlgmr.msra.gmra.mxu3 %vm26_vm0, %v54_v40  ;;  %48 = vst.msk [vmem:[#allocation2 + $0x11] sm:$0xff] %vm26_vm0, %v40_v38  ;;  %v493_v15 = vld [vmem:[%s4321_s3 + $0xf8] sm:$0xff]  ;;  %v492_v18 = vld [vmem:[%s4321_s3 + $0xf0] sm:$0xff]  ;;  %v475_v19 = vld [vmem:[%s4321_s3 + $0x68] sm:$0xff] }
  0x16   :  { %373 = vmatpush.msrb.mxu0 %v2510_v37  ;;  %414 = vmatpush.msrb.mxu1 %v2511_v41  ;;  %32 = vst.msk [vmem:[#allocation2 + $0x20] sm:$0x3] %vm31_vm1, %v2690_v3  ;;  %v491_v20 = vld [vmem:[%s4321_s3 + $0xe8] sm:$0xff]  ;;  %v474_v22 = vld [vmem:[%s4321_s3 + $0x60] sm:$0xff]  ;;  %v473_v24 = vld [vmem:[%s4321_s3 + $0x58] sm:$0xff] }
  0x17   :  { %49 = vst.msk [vmem:[#allocation2 + $0x19] sm:$0xff] %vm26_vm0, %v41_v42  ;;  %494 = vmatpush.msrb.mxu2 %v477_v14  ;;  %535 = vmatpush.msrb.mxu3 %v493_v15  ;;  %v490_v23 = vld [vmem:[%s4321_s3 + $0xe0] sm:$0xff]  ;;  %v489_v25 = vld [vmem:[%s4321_s3 + $0xd8] sm:$0xff]  ;;  %v472_v27 = vld [vmem:[%s4321_s3 + $0x50] sm:$0xff] }
  0x18   :  { %374 = vmatpush.msrb.mxu0 %v2508_v43  ;;  %415 = vmatpush.msrb.mxu1 %v2509_v44  ;;  %37 = vst.msk [vmem:[#allocation2 + $0x48] sm:$0x3] %vm31_vm1, %v2690_v3  ;;  %v488_v28 = vld [vmem:[%s4321_s3 + $0xd0] sm:$0xff]  ;;  %v471_v29 = vld [vmem:[%s4321_s3 + $0x48] sm:$0xff]  ;;  %v470_v33 = vld [vmem:[%s4321_s3 + $0x40] sm:$0xff] }
  0x19   :  { %50 = vst.msk [vmem:[#allocation2 + $0x29] sm:$0xff] %vm26_vm0, %v42_v45  ;;  %495 = vmatpush.msrb.mxu2 %v476_v17  ;;  %536 = vmatpush.msrb.mxu3 %v492_v18  ;;  %v487_v30 = vld [vmem:[%s4321_s3 + $0xc8] sm:$0xff]  ;;  %v486_v34 = vld [vmem:[%s4321_s3 + $0xc0] sm:$0xff]  ;;  %v469_v35 = vld [vmem:[%s4321_s3 + $0x38] sm:$0xff] }
  0x1a   :  { %375 = vmatpush.msrb.mxu0 %v2506_v46  ;;  %416 = vmatpush.msrb.mxu1 %v2507_v47  ;;  %51 = vst.msk [vmem:[#allocation2 + $0x31] sm:$0xff] %vm26_vm0, %v43_v48  ;;  %v485_v36 = vld [vmem:[%s4321_s3 + $0xb8] sm:$0xff]  ;;  %v468_v39 = vld [vmem:[%s4321_s3 + $0x30] sm:$0xff]  ;;  %v467_v41 = vld [vmem:[%s4321_s3 + $0x28] sm:$0xff] }
  0x1b   :  { %v79_v50 = vld [vmem:[#allocation2 + $0x9] sm:$0xff]  ;;  %52 = vst.msk [vmem:[#allocation2 + $0x39] sm:$0xff] %vm26_vm0, %v44_v53  ;;  %496 = vmatpush.msrb.mxu2 %v475_v19  ;;  %537 = vmatpush.msrb.mxu3 %v491_v20  ;;  %v466_v45 = vld [vmem:[%s4321_s3 + $0x20] sm:$0xff]  ;;  %v465_v47 = vld [vmem:[%s4321_s3 + $0x18] sm:$0xff] }
  0x1c   :  { %v55_v51 = vld [vmem:[#allocation2 + $0x8] sm:$0xff]  ;;  %2467 = vmatmul.msk.f32.gmra.mxu0 %vm26_vm0, %v79_v50  ;;  %2475 = vmatmul.msk.f32.gmra.mxu1 %vm26_vm0, %v79_v50  ;;  %v80_v56 = vld [vmem:[#allocation2 + $0x11] sm:$0xff]  ;;  %53 = vst.msk [vmem:[#allocation2 + $0x41] sm:$0xff] %vm26_vm0, %v45_v58  ;;  %v482_v46 = vld [vmem:[%s4321_s3 + $0xa0] sm:$0xff] }
  0x1d   :  { %2483 = vmatmul.msk.f32.gmra.mxu2 %vm26_vm0, %v55_v51  ;;  %2491 = vmatmul.msk.f32.gmra.mxu3 %vm26_vm0, %v55_v51  ;;  %v56_v57 = vld [vmem:[#allocation2 + $0x10] sm:$0xff]  ;;  %v315_v9 = vld [vmem:[#allocation2 + $0x2] sm:$0xff]  ;;  %v481_v48 = vld [vmem:[%s4321_s3 + $0x98] sm:$0xff] }
  0x1e   :  { %376 = vmatpush.msrb.mxu0 %v2504_v49  ;;  %417 = vmatpush.msrb.mxu1 %v2505_v52  ;;  %v81_v61 = vld [vmem:[#allocation2 + $0x19] sm:$0xff]  ;;  %v316_v10 = vld [vmem:[#allocation2 + $0xa] sm:$0xff] }
  0x1f   :  { %v57_v62 = vld [vmem:[#allocation2 + $0x18] sm:$0xff]  ;;  %497 = vmatpush.msrb.mxu2 %v474_v22  ;;  %538 = vmatpush.msrb.mxu3 %v490_v23  ;;  %v484_v40 = vld [vmem:[%s4321_s3 + $0xb0] sm:$0xff]  ;;  %v483_v42 = vld [vmem:[%s4321_s3 + $0xa8] sm:$0xff] }
  0x20   :  { %377 = vmatpush.msrb.mxu0 %v2502_v54  ;;  %418 = vmatpush.msrb.mxu1 %v2503_v55  ;;  %v82_v1 = vld [vmem:[#allocation2 + $0x29] sm:$0xff]  ;;  %v317_v11 = vld [vmem:[#allocation2 + $0x12] sm:$0xff]  ;;  %v318_v12 = vld [vmem:[#allocation2 + $0x1a] sm:$0xff] }
  0x21   :  { %v58_v2 = vld [vmem:[#allocation2 + $0x28] sm:$0xff]  ;;  %v83_v3 = vld [vmem:[#allocation2 + $0x31] sm:$0xff]  ;;  %498 = vmatpush.msrb.mxu2 %v473_v24  ;;  %539 = vmatpush.msrb.mxu3 %v489_v25  ;;  %v478_v58 = vld [vmem:[%s4321_s3 + $0x80] sm:$0xff] }
  0x22   :  { %378 = vmatpush.msrb.mxu0 %v2500_v59  ;;  %419 = vmatpush.msrb.mxu1 %v2501_v60  ;;  %v59_v4 = vld [vmem:[#allocation2 + $0x30] sm:$0xff]  ;;  %v84_v5 = vld [vmem:[#allocation2 + $0x39] sm:$0xff]  ;;  %v463_v53 = vld [vmem:[%s4321_s3 + $0x8] sm:$0xff] }
  0x23   :  { %v60_v6 = vld [vmem:[#allocation2 + $0x38] sm:$0xff]  ;;  %v85_v7 = vld [vmem:[#allocation2 + $0x41] sm:$0xff]  ;;  %v319_v13 = vld [vmem:[#allocation2 + $0x2a] sm:$0xff]  ;;  %499 = vmatpush.msrb.mxu2 %v472_v27  ;;  %540 = vmatpush.msrb.mxu3 %v488_v28 }
  0x24   :  { %2468 = vmatmul.msk.f32.gmra.mxu0 %vm26_vm0, %v80_v56  ;;  %2476 = vmatmul.msk.f32.gmra.mxu1 %vm26_vm0, %v80_v56  ;;  %v61_v8 = vld [vmem:[#allocation2 + $0x40] sm:$0xff]  ;;  %v320_v16 = vld [vmem:[#allocation2 + $0x32] sm:$0xff]  ;;  %v479_v54 = vld [vmem:[%s4321_s3 + $0x88] sm:$0xff] }
  0x25   :  { %2484 = vmatmul.msk.f32.gmra.mxu2 %vm26_vm0, %v56_v57  ;;  %2492 = vmatmul.msk.f32.gmra.mxu3 %vm26_vm0, %v56_v57  ;;  %v321_v21 = vld [vmem:[#allocation2 + $0x3a] sm:$0xff]  ;;  %v322_v26 = vld [vmem:[#allocation2 + $0x42] sm:$0xff]  ;;  %v464_v51 = vld [vmem:[%s4321_s3 + $0x10] sm:$0xff] }
  0x26   :  { %379 = vmatpush.msrb.mxu0 %v2498_v63  ;;  %420 = vmatpush.msrb.mxu1 %v2499_v0  ;;  %v480_v52 = vld [vmem:[%s4321_s3 + $0x90] sm:$0xff]  ;;  %v462_v57 = vld [vmem:[%s4321_s3] sm:$0xff] }
  0x27   :  { %500 = vmatpush.msrb.mxu2 %v471_v29  ;;  %541 = vmatpush.msrb.mxu3 %v487_v30 }
  0x28   :  { %592 = vmatpush.msra.mxu0 %v477_v14  ;;  %633 = vmatpush.msra.mxu1 %v493_v15 }
  0x29   :  { %501 = vmatpush.msrb.mxu2 %v470_v33  ;;  %542 = vmatpush.msrb.mxu3 %v486_v34 }
  0x2a   :  { %593 = vmatpush.msra.mxu0 %v476_v17  ;;  %634 = vmatpush.msra.mxu1 %v492_v18 }
  0x2b   :  { %502 = vmatpush.msrb.mxu2 %v469_v35  ;;  %543 = vmatpush.msrb.mxu3 %v485_v36 }
  0x2c   :  { %2469 = vmatmul.msk.f32.gmra.mxu0 %vm26_vm0, %v81_v61  ;;  %2477 = vmatmul.msk.f32.gmra.mxu1 %vm26_vm0, %v81_v61 }
  0x2d   :  { %2485 = vmatmul.msk.f32.gmra.mxu2 %vm26_vm0, %v57_v62  ;;  %2493 = vmatmul.msk.f32.gmra.mxu3 %vm26_vm0, %v57_v62 }
  0x2e   :  { %594 = vmatpush.msra.mxu0 %v475_v19  ;;  %635 = vmatpush.msra.mxu1 %v491_v20 }
  0x2f   :  { %503 = vmatpush.msrb.mxu2 %v468_v39  ;;  %544 = vmatpush.msrb.mxu3 %v484_v40 }
  0x30   :  { %595 = vmatpush.msra.mxu0 %v474_v22  ;;  %636 = vmatpush.msra.mxu1 %v490_v23 }
  0x31   :  { %504 = vmatpush.msrb.mxu2 %v467_v41  ;;  %545 = vmatpush.msrb.mxu3 %v483_v42 }
  0x32   :  { %596 = vmatpush.msra.mxu0 %v473_v24  ;;  %637 = vmatpush.msra.mxu1 %v489_v25 }
  0x33   :  { %505 = vmatpush.msrb.mxu2 %v466_v45  ;;  %546 = vmatpush.msrb.mxu3 %v482_v46 }
  0x34   :  { %2470 = vmatmul.msk.f32.gmra.mxu0 %vm26_vm0, %v82_v1  ;;  %2478 = vmatmul.msk.f32.gmra.mxu1 %vm26_vm0, %v82_v1 }
  0x35   :  { %2486 = vmatmul.msk.f32.gmra.mxu2 %vm26_vm0, %v58_v2  ;;  %2494 = vmatmul.msk.f32.gmra.mxu3 %vm26_vm0, %v58_v2 }
  0x36   :  { %597 = vmatpush.msra.mxu0 %v472_v27  ;;  %638 = vmatpush.msra.mxu1 %v488_v28 }
  0x37   :  { %506 = vmatpush.msrb.mxu2 %v465_v47  ;;  %547 = vmatpush.msrb.mxu3 %v481_v48 }
  0x38   :  { %598 = vmatpush.msra.mxu0 %v471_v29  ;;  %639 = vmatpush.msra.mxu1 %v487_v30 }
  0x39   :  { %507 = vmatpush.msrb.mxu2 %v464_v51  ;;  %548 = vmatpush.msrb.mxu3 %v480_v52 }
  0x3a   :  { %599 = vmatpush.msra.mxu0 %v470_v33  ;;  %640 = vmatpush.msra.mxu1 %v486_v34 }
  0x3b   :  { %508 = vmatpush.msrb.mxu2 %v463_v53  ;;  %549 = vmatpush.msrb.mxu3 %v479_v54 }
  0x3c   :  { %2471 = vmatmul.msk.f32.gmra.mxu0 %vm26_vm0, %v83_v3  ;;  %2479 = vmatmul.msk.f32.gmra.mxu1 %vm26_vm0, %v83_v3 }
  0x3d   :  { %2487 = vmatmul.msk.f32.gmra.mxu2 %vm26_vm0, %v59_v4  ;;  %2495 = vmatmul.msk.f32.gmra.mxu3 %vm26_vm0, %v59_v4 }
  0x3e   :  { %600 = vmatpush.msra.mxu0 %v469_v35  ;;  %641 = vmatpush.msra.mxu1 %v485_v36 }
  0x3f   :  { %509 = vmatpush.msrb.mxu2 %v462_v57  ;;  %550 = vmatpush.msrb.mxu3 %v478_v58 }
  0x40   :  { %601 = vmatpush.msra.mxu0 %v468_v39  ;;  %642 = vmatpush.msra.mxu1 %v484_v40 }
  0x42   :  { %602 = vmatpush.msra.mxu0 %v467_v41  ;;  %643 = vmatpush.msra.mxu1 %v483_v42 }
  0x44   :  { %2472 = vmatmul.msk.f32.gmra.mxu0 %vm26_vm0, %v84_v5  ;;  %2480 = vmatmul.msk.f32.gmra.mxu1 %vm26_vm0, %v84_v5 }
  0x45   :  { %2488 = vmatmul.msk.f32.gmra.mxu2 %vm26_vm0, %v60_v6  ;;  %2496 = vmatmul.msk.f32.gmra.mxu3 %vm26_vm0, %v60_v6 }
  0x46   :  { %603 = vmatpush.msra.mxu0 %v466_v45  ;;  %644 = vmatpush.msra.mxu1 %v482_v46 }
  0x48   :  { %604 = vmatpush.msra.mxu0 %v465_v47  ;;  %645 = vmatpush.msra.mxu1 %v481_v48 }
  0x4a   :  { %605 = vmatpush.msra.mxu0 %v464_v51  ;;  %646 = vmatpush.msra.mxu1 %v480_v52 }
  0x4c   :  { %2473 = vmatmul.msk.f32.gmra.mxu0 %vm26_vm0, %v85_v7  ;;  %2481 = vmatmul.msk.f32.gmra.mxu1 %vm26_vm0, %v85_v7 }
  0x4d   :  { %2489 = vmatmul.msk.f32.gmra.mxu2 %vm26_vm0, %v61_v8  ;;  %2497 = vmatmul.msk.f32.gmra.mxu3 %vm26_vm0, %v61_v8 }
  0x4e   :  { %606 = vmatpush.msra.mxu0 %v463_v53  ;;  %647 = vmatpush.msra.mxu1 %v479_v54 }
  0x50   :  { %607 = vmatpush.msra.mxu0 %v462_v57  ;;  %648 = vmatpush.msra.mxu1 %v478_v58 }
  0x54   :  { %2514 = vmatmul.msk.f32.vlgmr.msrb.gmra.mxu0 %vm26_vm0, %v315_v9  ;;  %2522 = vmatmul.msk.f32.vlgmr.msrb.gmra.mxu1 %vm26_vm0, %v315_v9 }
  0x5c   :  { %2515 = vmatmul.msk.f32.gmra.mxu0 %vm26_vm0, %v316_v10  ;;  %2523 = vmatmul.msk.f32.gmra.mxu1 %vm26_vm0, %v316_v10 }
  0x64   :  { %2516 = vmatmul.msk.f32.gmra.mxu0 %vm26_vm0, %v317_v11  ;;  %2524 = vmatmul.msk.f32.gmra.mxu1 %vm26_vm0, %v317_v11 }
  0x6c   :  { %2517 = vmatmul.msk.f32.gmra.mxu0 %vm26_vm0, %v318_v12  ;;  %2525 = vmatmul.msk.f32.gmra.mxu1 %vm26_vm0, %v318_v12 }
  0x74   :  { %2518 = vmatmul.msk.f32.gmra.mxu0 %vm26_vm0, %v319_v13  ;;  %2526 = vmatmul.msk.f32.gmra.mxu1 %vm26_vm0, %v319_v13 }
  0x7c   :  { %2519 = vmatmul.msk.f32.gmra.mxu0 %vm26_vm0, %v320_v16  ;;  %2527 = vmatmul.msk.f32.gmra.mxu1 %vm26_vm0, %v320_v16 }
  0x84   :  { %2520 = vmatmul.msk.f32.gmra.mxu0 %vm26_vm0, %v321_v21  ;;  %2528 = vmatmul.msk.f32.gmra.mxu1 %vm26_vm0, %v321_v21 }
  0x8c   :  { %2521 = vmatmul.msk.f32.gmra.mxu0 %vm26_vm0, %v322_v26  ;;  %2529 = vmatmul.msk.f32.gmra.mxu1 %vm26_vm0, %v322_v26 }
  0x91   :  { %v3028_v31 = vpop.f32.mrf.mxu0  ;;  %v3030_v32 = vpop.f32.mrf.mxu1 }
  0x98   :  { %v250_v61 = vpop.f32.mrf.mxu2  ;;  %v291_v62 = vpop.f32.mrf.mxu3 }
  0x99   :  { %v3044_v37 = vpop.f32.mrf.mxu0  ;;  %v3046_v38 = vpop.f32.mrf.mxu1  ;;  %v251_v5 = vadd.f32 %v250_v61, %v3028_v31  ;;  %v292_v6 = vadd.f32 %v291_v62, %v3030_v32 }
  0xa0   :  { %v253_v1 = vpop.f32.mrf.mxu2  ;;  %v294_v2 = vpop.f32.mrf.mxu3 }
  0xa1   :  { %v3060_v43 = vpop.f32.mrf.mxu0  ;;  %v3062_v44 = vpop.f32.mrf.mxu1  ;;  %v254_v15 = vadd.f32 %v253_v1, %v3044_v37  ;;  %v295_v16 = vadd.f32 %v294_v2, %v3046_v38 }
  0xa8   :  { %v256_v9 = vpop.f32.mrf.mxu2  ;;  %v297_v10 = vpop.f32.mrf.mxu3 }
  0xa9   :  { %v3076_v49 = vpop.f32.mrf.mxu0  ;;  %v3078_v50 = vpop.f32.mrf.mxu1  ;;  %v257_v25 = vadd.f32 %v256_v9, %v3060_v43  ;;  %v298_v26 = vadd.f32 %v297_v10, %v3062_v44 }
  0xb0   :  { %v259_v21 = vpop.f32.mrf.mxu2  ;;  %v300_v22 = vpop.f32.mrf.mxu3 }
  0xb1   :  { %v3092_v55 = vpop.f32.mrf.mxu0  ;;  %v3094_v56 = vpop.f32.mrf.mxu1  ;;  %v260_v35 = vadd.f32 %v259_v21, %v3076_v49  ;;  %v301_v36 = vadd.f32 %v300_v22, %v3078_v50 }
  0xb8   :  { %v262_v33 = vpop.f32.mrf.mxu2  ;;  %v303_v34 = vpop.f32.mrf.mxu3 }
  0xb9   :  { %v3102_v59 = vpop.f32.mrf.mxu0  ;;  %v3104_v60 = vpop.f32.mrf.mxu1  ;;  %v263_v43 = vadd.f32 %v262_v33, %v3092_v55  ;;  %v304_v44 = vadd.f32 %v303_v34, %v3094_v56 }
  0xc0   :  { %v265_v45 = vpop.f32.mrf.mxu2  ;;  %v306_v46 = vpop.f32.mrf.mxu3 }
  0xc1   :  { %v3106_v63 = vpop.f32.mrf.mxu0  ;;  %v3108_v0 = vpop.f32.mrf.mxu1  ;;  %v266_v53 = vadd.f32 %v265_v45, %v3102_v59  ;;  %v307_v54 = vadd.f32 %v306_v46, %v3104_v60 }
  0xc8   :  { %v268_v61 = vpop.f32.mrf.mxu2  ;;  %v309_v62 = vpop.f32.mrf.mxu3 }
  0xc9   :  { %v3110_v3 = vpop.f32.mrf.mxu0  ;;  %v3112_v4 = vpop.f32.mrf.mxu1  ;;  %v269_v60 = vadd.f32 %v268_v61, %v3106_v63  ;;  %v310_v2 = vadd.f32 %v309_v62, %v3108_v0 }
  0xd0   :  { %v312_v63 = vpop.f32.mrf.mxu3 }
  0xd1   :  { %v381_v7 = vpop.f32.mrf.mxu0  ;;  %v422_v8 = vpop.f32.mrf.mxu1 }
  0xd2   :  { %v3116_v11 = vadd.f32 %v381_v7, %v251_v5  ;;  %v3118_v12 = vadd.f32 %v422_v8, %v292_v6 }
  0xd4   :  { %v576_v13 = vmul.f32 %v3116_v11, %v3116_v11  ;;  %v577_v14 = vmul.f32 %v3118_v12, %v3118_v12  ;;  %510 = vmatmul.f32.vlgmr.msrb.gmra.mxu2 %v3116_v11  ;;  %551 = vmatmul.f32.vlgmr.msrb.gmra.mxu3 %v3118_v12 }
  0xd6   :  { %608 = vmatmul.f32.vlgmr.msra.gmra.mxu0 %v576_v13  ;;  %649 = vmatmul.f32.vlgmr.msra.gmra.mxu1 %v577_v14  ;;  %v271_v13 = vpop.f32.mrf.mxu2  ;;  %v313_v14 = vadd.f32 %v312_v63, %v3112_v4 }
  0xd7   :  { %v272_v0 = vadd.f32 %v271_v13, %v3110_v3 }
  0xd9   :  { %v384_v17 = vpop.f32.mrf.mxu0  ;;  %v425_v18 = vpop.f32.mrf.mxu1 }
  0xda   :  { %v3128_v19 = vadd.f32 %v384_v17, %v254_v15  ;;  %v3130_v20 = vadd.f32 %v425_v18, %v295_v16 }
  0xdc   :  { %513 = vmatmul.f32.gmra.mxu2 %v3128_v19  ;;  %554 = vmatmul.f32.gmra.mxu3 %v3130_v20  ;;  %v578_v23 = vmul.f32 %v3128_v19, %v3128_v19  ;;  %v579_v24 = vmul.f32 %v3130_v20, %v3130_v20 }
  0xde   :  { %611 = vmatmul.f32.gmra.mxu0 %v578_v23  ;;  %652 = vmatmul.f32.gmra.mxu1 %v579_v24 }
  0xe1   :  { %v387_v27 = vpop.f32.mrf.mxu0  ;;  %v428_v28 = vpop.f32.mrf.mxu1 }
  0xe2   :  { %v3140_v29 = vadd.f32 %v387_v27, %v257_v25  ;;  %v3142_v30 = vadd.f32 %v428_v28, %v298_v26 }
  0xe4   :  { %516 = vmatmul.f32.gmra.mxu2 %v3140_v29  ;;  %557 = vmatmul.f32.gmra.mxu3 %v3142_v30  ;;  %v580_v31 = vmul.f32 %v3140_v29, %v3140_v29  ;;  %v581_v32 = vmul.f32 %v3142_v30, %v3142_v30 }
  0xe6   :  { %614 = vmatmul.f32.gmra.mxu0 %v580_v31  ;;  %655 = vmatmul.f32.gmra.mxu1 %v581_v32  ;;  %v741_v31 = vld [vmem:[%s4322_s4] sm:$0xff]  ;;  %v742_v32 = vld [vmem:[%s4322_s4 + $0x8] sm:$0xff] }
  0xe7   :  { %761 = vmatpush.msra.mxu2 %v741_v31  ;;  %781 = vmatpush.msra.mxu3 %v742_v32 }
  0xe9   :  { %v390_v37 = vpop.f32.mrf.mxu0  ;;  %v431_v38 = vpop.f32.mrf.mxu1  ;;  %804 = vmatpush.msrb.mxu2 %v741_v31  ;;  %824 = vmatpush.msrb.mxu3 %v742_v32 }
  0xea   :  { %v3152_v39 = vadd.f32 %v390_v37, %v260_v35  ;;  %v3154_v40 = vadd.f32 %v431_v38, %v301_v36 }
  0xec   :  { %519 = vmatmul.f32.gmra.mxu2 %v3152_v39  ;;  %560 = vmatmul.f32.gmra.mxu3 %v3154_v40  ;;  %v582_v41 = vmul.f32 %v3152_v39, %v3152_v39  ;;  %v583_v42 = vmul.f32 %v3154_v40, %v3154_v40 }
  0xee   :  { %617 = vmatmul.f32.gmra.mxu0 %v582_v41  ;;  %658 = vmatmul.f32.gmra.mxu1 %v583_v42 }
  0xf1   :  { %v393_v47 = vpop.f32.mrf.mxu0  ;;  %v434_v48 = vpop.f32.mrf.mxu1 }
  0xf2   :  { %v3164_v49 = vadd.f32 %v393_v47, %v263_v43  ;;  %v3166_v50 = vadd.f32 %v434_v48, %v304_v44 }
  0xf4   :  { %522 = vmatmul.f32.gmra.mxu2 %v3164_v49  ;;  %563 = vmatmul.f32.gmra.mxu3 %v3166_v50  ;;  %v584_v51 = vmul.f32 %v3164_v49, %v3164_v49  ;;  %v585_v52 = vmul.f32 %v3166_v50, %v3166_v50 }
  0xf6   :  { %620 = vmatmul.f32.gmra.mxu0 %v584_v51  ;;  %661 = vmatmul.f32.gmra.mxu1 %v585_v52 }
  0xf9   :  { %v396_v55 = vpop.f32.mrf.mxu0  ;;  %v437_v56 = vpop.f32.mrf.mxu1 }
  0xfa   :  { %v3176_v57 = vadd.f32 %v396_v55, %v266_v53  ;;  %v3178_v58 = vadd.f32 %v437_v56, %v307_v54 }
  0xfc   :  { %525 = vmatmul.f32.gmra.mxu2 %v3176_v57  ;;  %566 = vmatmul.f32.gmra.mxu3 %v3178_v58  ;;  %v586_v1 = vmul.f32 %v3176_v57, %v3176_v57  ;;  %v587_v59 = vmul.f32 %v3178_v58, %v3178_v58 }
  0xfe   :  { %623 = vmatmul.f32.gmra.mxu0 %v586_v1  ;;  %664 = vmatmul.f32.gmra.mxu1 %v587_v59 }
 0x101   :  { %v399_v5 = vpop.f32.mrf.mxu0  ;;  %v440_v6 = vpop.f32.mrf.mxu1 }
 0x102   :  { %v3188_v7 = vadd.f32 %v399_v5, %v269_v60  ;;  %v3190_v8 = vadd.f32 %v440_v6, %v310_v2 }
 0x104   :  { %528 = vmatmul.f32.gmra.mxu2 %v3188_v7  ;;  %569 = vmatmul.f32.gmra.mxu3 %v3190_v8  ;;  %v588_v9 = vmul.f32 %v3188_v7, %v3188_v7  ;;  %v589_v10 = vmul.f32 %v3190_v8, %v3190_v8 }
 0x106   :  { %626 = vmatmul.f32.gmra.mxu0 %v588_v9  ;;  %667 = vmatmul.f32.gmra.mxu1 %v589_v10 }
 0x109   :  { %v402_v15 = vpop.f32.mrf.mxu0  ;;  %v443_v16 = vpop.f32.mrf.mxu1 }
 0x10a   :  { %v3200_v17 = vadd.f32 %v402_v15, %v272_v0  ;;  %v3202_v18 = vadd.f32 %v443_v16, %v313_v14 }
 0x10c   :  { %531 = vmatmul.f32.gmra.mxu2 %v3200_v17  ;;  %572 = vmatmul.f32.gmra.mxu3 %v3202_v18  ;;  %v590_v21 = vmul.f32 %v3200_v17, %v3200_v17  ;;  %v591_v22 = vmul.f32 %v3202_v18, %v3202_v18 }
 0x10e   :  { %629 = vmatmul.f32.gmra.mxu0 %v590_v21  ;;  %670 = vmatmul.f32.gmra.mxu1 %v591_v22 }
 0x153   :  { %v609_v3 = vpop.f32.mrf.mxu0  ;;  %v650_v4 = vpop.f32.mrf.mxu1 }
 0x154   :  { %v651_v52 = vadd.f32 %v650_v4, %v609_v3 }
 0x156   :  { %v704_v59 = vsel %vm674_vm2, %v651_v52, 0.0 }
 0x157   :  { %v511_v23 = vpop.f32.mrf.mxu2  ;;  %v552_v24 = vpop.f32.mrf.mxu3 }
 0x158   :  { %v553_v1 = vadd.f32 %v552_v24, %v511_v23 }
 0x15a   :  { %v675_v15 = vsel %vm674_vm2, %v553_v1, 0.0 }
 0x15b   :  { %v612_v25 = vpop.f32.mrf.mxu0  ;;  %v653_v26 = vpop.f32.mrf.mxu1 }
 0x15c   :  { %v654_v51 = vadd.f32 %v653_v26, %v612_v25 }
 0x15e   :  { %v705_v61 = vsel %vm674_vm2, %v654_v51, 0.0 }
 0x15f   :  { %v514_v27 = vpop.f32.mrf.mxu2  ;;  %v555_v28 = vpop.f32.mrf.mxu3  ;;  %v706_v6 = vadd.f32 %v705_v61, %v704_v59 }
 0x160   :  { %v556_v54 = vadd.f32 %v555_v28, %v514_v27  ;;  %v2691_v27 = vmov 2048.0  }
 0x161   :  { %2620 = vrcp.f32 %v2691_v27  ;;  %v994_v27 = vld [vmem:[%s4323_s6 + $0x78] sm:$0xff] }
 0x162   :  { %v676_v9 = vsel %vm674_vm2, %v556_v54, 0.0  ;;  %1011 = vmatpush.msrb.mxu0 %v994_v27  ;;  %v892_v27 = vld [vmem:[%s4324_s5 + $0xd8] sm:$0xff] }
 0x163   :  { %v615_v33 = vpop.f32.mrf.mxu0  ;;  %v656_v34 = vpop.f32.mrf.mxu1  ;;  %v677_v23 = vadd.f32 %v676_v9, %v675_v15 }
 0x164   :  { %v657_v53 = vadd.f32 %v656_v34, %v615_v33 }
 0x166   :  { %v707_v60 = vsel %vm674_vm2, %v657_v53, 0.0 }
 0x167   :  { %v517_v35 = vpop.f32.mrf.mxu2  ;;  %v558_v36 = vpop.f32.mrf.mxu3  ;;  %v708_v16 = vadd.f32 %v707_v60, %v706_v6 }
 0x168   :  { %v559_v2 = vadd.f32 %v558_v36, %v517_v35 }
 0x16a   :  { %v678_v21 = vsel %vm674_vm2, %v559_v2, 0.0 }
 0x16b   :  { %v618_v37 = vpop.f32.mrf.mxu0  ;;  %v659_v38 = vpop.f32.mrf.mxu1  ;;  %v679_v33 = vadd.f32 %v678_v21, %v677_v23 }
 0x16c   :  { %v660_v62 = vadd.f32 %v659_v38, %v618_v37 }
 0x16e   :  { %v709_v63 = vsel %vm674_vm2, %v660_v62, 0.0 }
 0x16f   :  { %v520_v41 = vpop.f32.mrf.mxu2  ;;  %v561_v42 = vpop.f32.mrf.mxu3  ;;  %v710_v24 = vadd.f32 %v709_v63, %v708_v16 }
 0x170   :  { %v562_v0 = vadd.f32 %v561_v42, %v520_v41 }
 0x172   :  { %v680_v28 = vsel %vm674_vm2, %v562_v0, 0.0 }
 0x173   :  { %v621_v43 = vpop.f32.mrf.mxu0  ;;  %v662_v44 = vpop.f32.mrf.mxu1  ;;  %v681_v38 = vadd.f32 %v680_v28, %v679_v33  ;;  %v1010_v28 = vld [vmem:[%s4323_s6 + $0xf8] sm:$0xff] }
 0x174   :  { %v663_v5 = vadd.f32 %v662_v44, %v621_v43  ;;  %1052 = vmatpush.msrb.mxu1 %v1010_v28  ;;  %v891_v28 = vld [vmem:[%s4324_s5 + $0xd0] sm:$0xff] }
 0x176   :  { %v711_v22 = vsel %vm674_vm2, %v663_v5, 0.0 }
 0x177   :  { %v523_v45 = vpop.f32.mrf.mxu2  ;;  %v564_v46 = vpop.f32.mrf.mxu3  ;;  %v712_v34 = vadd.f32 %v711_v22, %v710_v24 }
 0x178   :  { %v565_v3 = vadd.f32 %v564_v46, %v523_v45  ;;  %v2621_v46 = vpop.eup %2620 }
 0x179   :  { %v697_v61 = vmul.f32 2048.0, %v2621_v46  ;;  %vm701_vm3 = vweird.f32 %v2621_v46 }
 0x17a   :  { %v682_v35 = vsel %vm674_vm2, %v565_v3, 0.0 }
 0x17b   :  { %v624_v47 = vpop.f32.mrf.mxu0  ;;  %v665_v48 = vpop.f32.mrf.mxu1  ;;  %v698_v6 = vsub.f32 1.0, %v697_v61  ;;  %v1001_v61 = vld [vmem:[%s4323_s6 + $0xb0] sm:$0xff] }
 0x17c   :  { %v666_v14 = vadd.f32 %v665_v48, %v624_v47  ;;  %v683_v47 = vadd.f32 %v682_v35, %v681_v38  ;;  %v1008_v35 = vld [vmem:[%s4323_s6 + $0xe8] sm:$0xff]  ;;  %v1007_v38 = vld [vmem:[%s4323_s6 + $0xe0] sm:$0xff] }
 0x17d   :  { %v699_v0 = vmul.f32 %v2621_v46, %v698_v6 }
 0x17e   :  { %v713_v31 = vsel %vm674_vm2, %v666_v14, 0.0 }
 0x17f   :  { %v526_v55 = vpop.f32.mrf.mxu2  ;;  %v567_v56 = vpop.f32.mrf.mxu3  ;;  %v714_v41 = vadd.f32 %v713_v31, %v712_v34  ;;  %v700_v21 = vadd.f32 %v2621_v46, %v699_v0  ;;  %v993_v31 = vld [vmem:[%s4323_s6 + $0x70] sm:$0xff]  ;;  %v992_v34 = vld [vmem:[%s4323_s6 + $0x68] sm:$0xff]  ;;  %v998_v0 = vld [vmem:[%s4323_s6 + $0x98] sm:$0xff] }
 0x180   :  { %v568_v32 = vadd.f32 %v567_v56, %v526_v55  ;;  %1012 = vmatpush.msrb.mxu0 %v993_v31  ;;  %v874_v31 = vld [vmem:[%s4324_s5 + $0x48] sm:$0xff] }
 0x181   :  { %v3232_v23 = vsel %vm701_vm3, %v2621_v46, %v700_v21  ;;  %v1004_v46 = vld [vmem:[%s4323_s6 + $0xc8] sm:$0xff] }
 0x182   :  { %v684_v44 = vsel %vm674_vm2, %v568_v32, 0.0  ;;  %v1009_v32 = vld [vmem:[%s4323_s6 + $0xf0] sm:$0xff]  ;;  %1013 = vmatpush.msrb.mxu0 %v992_v34  ;;  %v894_v21 = vld [vmem:[%s4324_s5 + $0xe8] sm:$0xff]  ;;  %v889_v34 = vld [vmem:[%s4324_s5 + $0xc0] sm:$0xff] }
 0x183   :  { %v627_v10 = vpop.f32.mrf.mxu0  ;;  %v668_v13 = vpop.f32.mrf.mxu1  ;;  %v685_v53 = vadd.f32 %v684_v44, %v683_v47  ;;  %1053 = vmatpush.msrb.mxu1 %v1009_v32  ;;  %v1005_v44 = vld [vmem:[%s4323_s6 + $0xd0] sm:$0xff]  ;;  %v890_v32 = vld [vmem:[%s4324_s5 + $0xc8] sm:$0xff] }
 0x184   :  { %v669_v4 = vadd.f32 %v668_v13, %v627_v10 }
 0x185   :  { %1054 = vmatpush.msrb.mxu1 %v1008_v35  ;;  %v872_v35 = vld [vmem:[%s4324_s5 + $0x38] sm:$0xff] }
 0x186   :  { %v715_v36 = vsel %vm674_vm2, %v669_v4, 0.0 }
 0x187   :  { %v529_v25 = vpop.f32.mrf.mxu2  ;;  %v570_v26 = vpop.f32.mrf.mxu3  ;;  %v716_v48 = vadd.f32 %v715_v36, %v714_v41  ;;  %v990_v41 = vld [vmem:[%s4323_s6 + $0x58] sm:$0xff]  ;;  %1055 = vmatpush.msrb.mxu1 %v1007_v38  ;;  %v887_v38 = vld [vmem:[%s4324_s5 + $0xb0] sm:$0xff] }
 0x188   :  { %v571_v37 = vadd.f32 %v570_v26, %v529_v25 }
 0x18a   :  { %v686_v51 = vsel %vm674_vm2, %v571_v37, 0.0  ;;  %v991_v37 = vld [vmem:[%s4323_s6 + $0x60] sm:$0xff] }
 0x18b   :  { %v630_v42 = vpop.f32.mrf.mxu0  ;;  %v671_v43 = vpop.f32.mrf.mxu1  ;;  %v687_v1 = vadd.f32 %v686_v51, %v685_v53  ;;  %1014 = vmatpush.msrb.mxu0 %v991_v37  ;;  %v1003_v51 = vld [vmem:[%s4323_s6 + $0xc0] sm:$0xff]  ;;  %v986_v53 = vld [vmem:[%s4323_s6 + $0x38] sm:$0xff]  ;;  %v871_v37 = vld [vmem:[%s4324_s5 + $0x30] sm:$0xff] }
 0x18c   :  { %v672_v45 = vadd.f32 %v671_v43, %v630_v42  ;;  %v1006_v42 = vld [vmem:[%s4323_s6 + $0xd8] sm:$0xff]  ;;  %v989_v43 = vld [vmem:[%s4323_s6 + $0x50] sm:$0xff] }
 0x18d   :  { %1015 = vmatpush.msrb.mxu0 %v990_v41  ;;  %1056 = vmatpush.msrb.mxu1 %v1006_v42  ;;  %v981_v41 = vld [vmem:[%s4323_s6 + $0x10] sm:$0xff] }
 0x18e   :  { %v717_v52 = vsel %vm674_vm2, %v672_v45, 0.0  ;;  %v988_v45 = vld [vmem:[%s4323_s6 + $0x48] sm:$0xff]  ;;  %v997_v42 = vld [vmem:[%s4323_s6 + $0x90] sm:$0xff] }
 0x18f   :  { %v718_v54 = vadd.f32 %v717_v52, %v716_v48  ;;  %v532_v55 = vpop.f32.mrf.mxu2  ;;  %v573_v56 = vpop.f32.mrf.mxu3  ;;  %1016 = vmatpush.msrb.mxu0 %v989_v43  ;;  %1057 = vmatpush.msrb.mxu1 %v1005_v44  ;;  %v987_v48 = vld [vmem:[%s4323_s6 + $0x40] sm:$0xff]  ;;  %v870_v43 = vld [vmem:[%s4324_s5 + $0x28] sm:$0xff] }
 0x190   :  { %v574_v62 = vadd.f32 %v573_v56, %v532_v55  ;;  %v985_v56 = vld [vmem:[%s4323_s6 + $0x30] sm:$0xff]  ;;  %v886_v44 = vld [vmem:[%s4324_s5 + $0xa8] sm:$0xff] }
 0x191   :  { %v719_v59 = vrot.slane %v718_v54, 4  ;;  %1017 = vmatpush.msrb.mxu0 %v988_v45  ;;  %1058 = vmatpush.msrb.mxu1 %v1004_v46  ;;  %v869_v45 = vld [vmem:[%s4324_s5 + $0x20] sm:$0xff] }
 0x192   :  { %v688_v60 = vsel %vm674_vm2, %v574_v62, 0.0  ;;  %v885_v46 = vld [vmem:[%s4324_s5 + $0xa0] sm:$0xff] }
 0x193   :  { %v720_v2 = vadd.f32 %v719_v59, %v718_v54  ;;  %v689_v5 = vadd.f32 %v688_v60, %v687_v1  ;;  %v1002_v54 = vld [vmem:[%s4323_s6 + $0xb8] sm:$0xff]  ;;  %1018 = vmatpush.msrb.mxu0 %v987_v48  ;;  %1059 = vmatpush.msrb.mxu1 %v1003_v51  ;;  %v984_v1 = vld [vmem:[%s4323_s6 + $0x28] sm:$0xff] }
 0x194   :  { %v1000_v59 = vld [vmem:[%s4323_s6 + $0xa8] sm:$0xff]  ;;  %v868_v51 = vld [vmem:[%s4324_s5 + $0x18] sm:$0xff] }
 0x195   :  { %v721_v9 = vrot.slane %v720_v2, 2  ;;  %v690_v10 = vrot.slane %v689_v5, 4  ;;  %1019 = vmatpush.msrb.mxu0 %v986_v53  ;;  %1060 = vmatpush.msrb.mxu1 %v1002_v54  ;;  %v996_v48 = vld [vmem:[%s4323_s6 + $0x88] sm:$0xff]  ;;  %v867_v53 = vld [vmem:[%s4324_s5 + $0x10] sm:$0xff] }
 0x196   :  { %v883_v54 = vld [vmem:[%s4324_s5 + $0x90] sm:$0xff] }
 0x197   :  { %v722_v13 = vadd.f32 %v721_v9, %v720_v2  ;;  %v691_v63 = vadd.f32 %v690_v10, %v689_v5  ;;  %1020 = vmatpush.msrb.mxu0 %v985_v56  ;;  %1061 = vmatpush.msrb.mxu1 %v1001_v61  ;;  %v983_v2 = vld [vmem:[%s4323_s6 + $0x20] sm:$0xff]  ;;  %v880_v9 = vld [vmem:[%s4324_s5 + $0x78] sm:$0xff]  ;;  %v866_v61 = vld [vmem:[%s4324_s5 + $0x8] sm:$0xff] }
 0x198   :  { %v999_v5 = vld [vmem:[%s4323_s6 + $0xa0] sm:$0xff]  ;;  %v896_v10 = vld [vmem:[%s4324_s5 + $0xf8] sm:$0xff] }
 0x199   :  { %v692_v14 = vrot.slane %v691_v63, 2  ;;  %v723_v15 = vrot.slane %v722_v13, 1  ;;  %1021 = vmatpush.msrb.mxu0 %v984_v1  ;;  %1062 = vmatpush.msrb.mxu1 %v1000_v59  ;;  %v995_v56 = vld [vmem:[%s4323_s6 + $0x80] sm:$0xff] }
 0x19a   :  { %v865_v1 = vld [vmem:[%s4324_s5] sm:$0xff] }
 0x19b   :  { %v693_v16 = vadd.f32 %v692_v14, %v691_v63  ;;  %v724_v3 = vadd.f32 %v723_v15, %v722_v13  ;;  %1022 = vmatpush.msrb.mxu0 %v983_v2  ;;  %1063 = vmatpush.msrb.mxu1 %v999_v5  ;;  %v982_v63 = vld [vmem:[%s4323_s6 + $0x18] sm:$0xff]  ;;  %v879_v14 = vld [vmem:[%s4324_s5 + $0x70] sm:$0xff]  ;;  %v881_v59 = vld [vmem:[%s4324_s5 + $0x80] sm:$0xff] }
 0x19c   :  { %v895_v15 = vld [vmem:[%s4324_s5 + $0xf0] sm:$0xff] }
 0x19d   :  { %v694_v22 = vrot.slane %v693_v16, 1  ;;  %v725_v25 = vmul.f32 %v724_v3, %v3232_v23  ;;  %1023 = vmatpush.msrb.mxu0 %v982_v63  ;;  %1064 = vmatpush.msrb.mxu1 %v998_v0  ;;  %v877_v3 = vld [vmem:[%s4324_s5 + $0x60] sm:$0xff] }
 0x19f   :  { %v695_v4 = vadd.f32 %v694_v22, %v693_v16  ;;  %v878_v16 = vld [vmem:[%s4324_s5 + $0x68] sm:$0xff]  ;;  %1024 = vmatpush.msrb.mxu0 %v981_v41  ;;  %1065 = vmatpush.msrb.mxu1 %v997_v42 }
 0x1a0   :  { %v2563_v41 = vld [vmem:[%s4325_s2 + $0x1a8] sm:$0xff] }
 0x1a1   :  { %v3235_v24 = vmul.f32 %v3232_v23, %v695_v4  ;;  %v893_v4 = vld [vmem:[%s4324_s5 + $0xe0] sm:$0xff]  ;;  %1066 = vmatpush.msrb.mxu1 %v996_v48 }
 0x1a3   :  { %v726_v26 = vmul.f32 %v3235_v24, %v3235_v24  ;;  %v739_v22 = vsub.f32 0.0, %v3235_v24  ;;  %v875_v24 = vld [vmem:[%s4324_s5 + $0x50] sm:$0xff]  ;;  %1067 = vmatpush.msrb.mxu1 %v995_v56  ;;  %v1307_v56 = vld [vmem:[%s4325_s2 + $0xe0] sm:$0xff] }
 0x1a5   :  { %v727_v33 = vsub.f32 %v725_v25, %v726_v26  ;;  %v876_v26 = vld [vmem:[%s4324_s5 + $0x58] sm:$0xff] }
 0x1a7   :  { %v728_v36 = vadd.f32 1e-05, %v727_v33  ;;  %v873_v33 = vld [vmem:[%s4324_s5 + $0x40] sm:$0xff] }
 0x1a9   :  { %2622 = vrsqrt.f32 %v728_v36  ;;  %vm735_vm5 = vweird.f32 %v728_v36 }
 0x1af   :  { %v2623_v47 = vpop.eup %2622 }
 0x1b0   :  { %v730_v52 = vmul.f32 %v2623_v47, %v728_v36  ;;  %vm736_vm4 = vweird.f32 %v2623_v47  ;;  %v888_v36 = vld [vmem:[%s4324_s5 + $0xb8] sm:$0xff] }
 0x1b1   :  { %vm737_vm6 = vmor %vm735_vm5, %vm736_vm4 }
 0x1b2   :  { %v731_v55 = vmul.f32 %v2623_v47, %v730_v52  ;;  %v884_v52 = vld [vmem:[%s4324_s5 + $0x98] sm:$0xff] }
 0x1b4   :  { %v732_v62 = vmul.f32 0.5, %v731_v55  ;;  %v979_v55 = vld [vmem:[%s4323_s6] sm:$0xff] }
 0x1b6   :  { %v733_v60 = vsub.f32 1.5, %v732_v62  ;;  %v882_v62 = vld [vmem:[%s4324_s5 + $0x88] sm:$0xff] }
 0x1b8   :  { %v734_v6 = vmul.f32 %v2623_v47, %v733_v60 }
 0x1ba   :  { %v738_v13 = vsel %vm737_vm6, %v2623_v47, %v734_v6  ;;  %v980_v47 = vld [vmem:[%s4323_s6 + $0x8] sm:$0xff] }
 0x1bb   :  { %2530 = vmatmul.msk.f32.vlgmr.msra.gmra.mxu2 %vm674_vm2, %v738_v13  ;;  %2531 = vmatmul.msk.f32.vlgmr.msra.gmra.mxu3 %vm674_vm2, %v738_v13  ;;  %v740_v25 = vmul.f32 %v739_v22, %v738_v13 }
 0x1bc   :  { %897 = vmatpush.msra.mxu2 %v880_v9  ;;  %938 = vmatpush.msra.mxu3 %v896_v10 }
 0x1bd   :  { %1025 = vmatpush.msrb.mxu0 %v980_v47 }
 0x1be   :  { %898 = vmatpush.msra.mxu2 %v879_v14  ;;  %939 = vmatpush.msra.mxu3 %v895_v15 }
 0x1bf   :  { %1026 = vmatpush.msrb.mxu0 %v979_v55  ;;  %v2559_v55 = vld [vmem:[%s4325_s2 + $0x188] sm:$0xff] }
 0x1c0   :  { %899 = vmatpush.msra.mxu2 %v878_v16  ;;  %940 = vmatpush.msra.mxu3 %v894_v21 }
 0x1c2   :  { %900 = vmatpush.msra.mxu2 %v877_v3  ;;  %941 = vmatpush.msra.mxu3 %v893_v4 }
 0x1c3   :  { %2532 = vmatmul.msk.f32.vlgmr.msrb.gmra.mxu2 %vm674_vm2, %v740_v25  ;;  %2533 = vmatmul.msk.f32.vlgmr.msrb.gmra.mxu3 %vm674_vm2, %v740_v25 }
 0x1c4   :  { %901 = vmatpush.msra.mxu2 %v876_v26  ;;  %942 = vmatpush.msra.mxu3 %v892_v27 }
 0x1c6   :  { %902 = vmatpush.msra.mxu2 %v875_v24  ;;  %943 = vmatpush.msra.mxu3 %v891_v28  ;;  %v2573_v24 = vld [vmem:[%s4325_s2 + $0x1f8] sm:$0xff]  ;;  %v2568_v28 = vld [vmem:[%s4325_s2 + $0x1d0] sm:$0xff] }
 0x1c8   :  { %903 = vmatpush.msra.mxu2 %v874_v31  ;;  %944 = vmatpush.msra.mxu3 %v890_v32  ;;  %v2569_v31 = vld [vmem:[%s4325_s2 + $0x1d8] sm:$0xff] }
 0x1ca   :  { %904 = vmatpush.msra.mxu2 %v873_v33  ;;  %945 = vmatpush.msra.mxu3 %v889_v34 }
 0x1cc   :  { %905 = vmatpush.msra.mxu2 %v872_v35  ;;  %946 = vmatpush.msra.mxu3 %v888_v36  ;;  %v2566_v36 = vld [vmem:[%s4325_s2 + $0x1c0] sm:$0xff] }
 0x1ce   :  { %906 = vmatpush.msra.mxu2 %v871_v37  ;;  %947 = vmatpush.msra.mxu3 %v887_v38  ;;  %v2567_v37 = vld [vmem:[%s4325_s2 + $0x1c8] sm:$0xff]  ;;  %v2562_v38 = vld [vmem:[%s4325_s2 + $0x1a0] sm:$0xff] }
 0x1d0   :  { %907 = vmatpush.msra.mxu2 %v870_v43  ;;  %948 = vmatpush.msra.mxu3 %v886_v44 }
 0x1d2   :  { %908 = vmatpush.msra.mxu2 %v869_v45  ;;  %949 = vmatpush.msra.mxu3 %v885_v46 }
 0x1d4   :  { %909 = vmatpush.msra.mxu2 %v868_v51  ;;  %950 = vmatpush.msra.mxu3 %v884_v52 }
 0x1d6   :  { %910 = vmatpush.msra.mxu2 %v867_v53  ;;  %951 = vmatpush.msra.mxu3 %v883_v54  ;;  %v1310_v53 = vld [vmem:[%s4325_s2 + $0xf8] sm:$0xff]  ;;  %v2558_v54 = vld [vmem:[%s4325_s2 + $0x180] sm:$0xff] }
 0x1d7   :  { %1475 = vmatpush.msra.mxu1 %v1310_v53 }
 0x1d8   :  { %911 = vmatpush.msra.mxu2 %v866_v61  ;;  %952 = vmatpush.msra.mxu3 %v882_v62  ;;  %v1308_v61 = vld [vmem:[%s4325_s2 + $0xe8] sm:$0xff]  ;;  %v1305_v62 = vld [vmem:[%s4325_s2 + $0xd0] sm:$0xff] }
 0x1d9   :  { %1476 = vmatpush.msra.mxu1 %v1308_v61 }
 0x1da   :  { %912 = vmatpush.msra.mxu2 %v865_v1  ;;  %953 = vmatpush.msra.mxu3 %v881_v59  ;;  %v1306_v1 = vld [vmem:[%s4325_s2 + $0xd8] sm:$0xff]  ;;  %v1303_v59 = vld [vmem:[%s4325_s2 + $0xc0] sm:$0xff] }
 0x1db   :  { %1477 = vmatpush.msra.mxu1 %v1306_v1 }
 0x1dc   :  { %1393 = vmatpush.msrb.mxu3 %v2573_v24 }
 0x23e   :  { %v763_v60 = vpop.f32.mrf.mxu2  ;;  %v783_v2 = vpop.f32.mrf.mxu3 }
 0x23f   :  { %v3437_v5 = vperm.slane %v763_v60, 0  ;;  %v3439_v6 = vperm.slane %v783_v2, 0  ;;  %v1304_v60 = vld [vmem:[%s4325_s2 + $0xc8] sm:$0xff]  ;;  %v2556_v2 = vld [vmem:[%s4325_s2 + $0x170] sm:$0xff] }
 0x240   :  { %1478 = vmatpush.msra.mxu1 %v1304_v60 }
 0x241   :  { %v831_v0 = vmul.f32 %v3437_v5, %v3116_v11  ;;  %v832_v14 = vmul.f32 %v3439_v6, %v3118_v12  ;;  %v833_v21 = vmul.f32 %v3437_v5, %v3128_v19  ;;  %v834_v22 = vmul.f32 %v3439_v6, %v3130_v20 }
 0x242   :  { %v835_v12 = vmul.f32 %v3437_v5, %v3140_v29  ;;  %v836_v4 = vmul.f32 %v3439_v6, %v3142_v30  ;;  %v837_v20 = vmul.f32 %v3437_v5, %v3152_v39  ;;  %v838_v26 = vmul.f32 %v3439_v6, %v3154_v40  ;;  %v2572_v30 = vld [vmem:[%s4325_s2 + $0x1f0] sm:$0xff]  ;;  %v2570_v39 = vld [vmem:[%s4325_s2 + $0x1e0] sm:$0xff]  ;;  %v2571_v40 = vld [vmem:[%s4325_s2 + $0x1e8] sm:$0xff] }
 0x243   :  { %1352 = vmatpush.msrb.mxu2 %v2572_v30  ;;  %v839_v32 = vmul.f32 %v3437_v5, %v3164_v49  ;;  %v840_v33 = vmul.f32 %v3439_v6, %v3166_v50  ;;  %1394 = vmatpush.msrb.mxu3 %v2571_v40  ;;  %v2564_v49 = vld [vmem:[%s4325_s2 + $0x1b0] sm:$0xff]  ;;  %v2565_v50 = vld [vmem:[%s4325_s2 + $0x1b8] sm:$0xff]  ;;  %v841_v42 = vmul.f32 %v3437_v5, %v3176_v57  ;;  %v2547_v30 = vld [vmem:[%s4325_s2 + $0x128] sm:$0xff] }
 0x244   :  { %v842_v43 = vmul.f32 %v3439_v6, %v3178_v58  ;;  %v843_v46 = vmul.f32 %v3437_v5, %v3188_v7  ;;  %v844_v57 = vmul.f32 %v3439_v6, %v3190_v8  ;;  %v845_v48 = vmul.f32 %v3437_v5, %v3200_v17  ;;  %v1309_v8 = vld [vmem:[%s4325_s2 + $0xf0] sm:$0xff]  ;;  %v2557_v5 = vld [vmem:[%s4325_s2 + $0x178] sm:$0xff] }
 0x245   :  { %1353 = vmatpush.msrb.mxu2 %v2570_v39  ;;  %1395 = vmatpush.msrb.mxu3 %v2569_v31  ;;  %v846_v51 = vmul.f32 %v3439_v6, %v3202_v18  ;;  %v2560_v17 = vld [vmem:[%s4325_s2 + $0x190] sm:$0xff]  ;;  %v2561_v18 = vld [vmem:[%s4325_s2 + $0x198] sm:$0xff] }
 0x246   :  { %v806_v9 = vpop.f32.mrf.mxu2  ;;  %v826_v10 = vpop.f32.mrf.mxu3  ;;  %1434 = vmatpush.msra.mxu0 %v1309_v8  ;;  %v1301_v6 = vld [vmem:[%s4325_s2 + $0xb0] sm:$0xff] }
 0x247   :  { %v3441_v13 = vperm.slane %v806_v9, 0  ;;  %v3443_v63 = vperm.slane %v826_v10, 0  ;;  %1354 = vmatpush.msrb.mxu2 %v2568_v28  ;;  %1396 = vmatpush.msrb.mxu3 %v2567_v37  ;;  %v1302_v9 = vld [vmem:[%s4325_s2 + $0xb8] sm:$0xff]  ;;  %v2554_v10 = vld [vmem:[%s4325_s2 + $0x160] sm:$0xff]  ;;  %v1289_v40 = vld [vmem:[%s4325_s2 + $0x50] sm:$0xff] }
 0x248   :  { %1435 = vmatpush.msra.mxu0 %v1307_v56  ;;  %1479 = vmatpush.msra.mxu1 %v1302_v9  ;;  %v1290_v28 = vld [vmem:[%s4325_s2 + $0x58] sm:$0xff]  ;;  %v2544_v31 = vld [vmem:[%s4325_s2 + $0x110] sm:$0xff] }
 0x249   :  { %v849_v15 = vadd.f32 %v3441_v13, %v831_v0  ;;  %v850_v16 = vadd.f32 %v3443_v63, %v832_v14  ;;  %v851_v3 = vadd.f32 %v3441_v13, %v833_v21  ;;  %v852_v11 = vadd.f32 %v3443_v63, %v834_v22  ;;  %1355 = vmatpush.msrb.mxu2 %v2566_v36  ;;  %v1300_v0 = vld [vmem:[%s4325_s2 + $0xa8] sm:$0xff]  ;;  %v2552_v14 = vld [vmem:[%s4325_s2 + $0x150] sm:$0xff]  ;;  %v1298_v21 = vld [vmem:[%s4325_s2 + $0x98] sm:$0xff] }
 0x24a   :  { %v853_v25 = vadd.f32 %v3441_v13, %v835_v12  ;;  %v854_v19 = vadd.f32 %v3443_v63, %v836_v4  ;;  %v855_v27 = vadd.f32 %v3441_v13, %v837_v20  ;;  %v856_v29 = vadd.f32 %v3443_v63, %v838_v26  ;;  %1397 = vmatpush.msrb.mxu3 %v2565_v50  ;;  %v2550_v22 = vld [vmem:[%s4325_s2 + $0x140] sm:$0xff]  ;;  %v1296_v12 = vld [vmem:[%s4325_s2 + $0x88] sm:$0xff]  ;;  %v2548_v4 = vld [vmem:[%s4325_s2 + $0x130] sm:$0xff] }
 0x24b   :  { %913 = vmatmul.f32.vlgmr.msra.gmra.mxu2 %v849_v15  ;;  %954 = vmatmul.f32.vlgmr.msra.gmra.mxu3 %v850_v16  ;;  %v857_v34 = vadd.f32 %v3441_v13, %v839_v32  ;;  %v858_v35 = vadd.f32 %v3443_v63, %v840_v33  ;;  %v859_v44 = vadd.f32 %v3441_v13, %v841_v42  ;;  %v1294_v20 = vld [vmem:[%s4325_s2 + $0x78] sm:$0xff]  ;;  %v1291_v26 = vld [vmem:[%s4325_s2 + $0x60] sm:$0xff]  ;;  %v1285_v50 = vld [vmem:[%s4325_s2 + $0x30] sm:$0xff] }
 0x24c   :  { %1027 = vmatmul.f32.vlgmr.msrb.gmra.mxu0 %v849_v15  ;;  %1068 = vmatmul.f32.vlgmr.msrb.gmra.mxu1 %v850_v16  ;;  %v860_v45 = vadd.f32 %v3443_v63, %v842_v43  ;;  %v861_v58 = vadd.f32 %v3441_v13, %v843_v46  ;;  %v862_v47 = vadd.f32 %v3443_v63, %v844_v57  ;;  %v2553_v15 = vld [vmem:[%s4325_s2 + $0x158] sm:$0xff]  ;;  %v1297_v16 = vld [vmem:[%s4325_s2 + $0x90] sm:$0xff]  ;;  %v2542_v36 = vld [vmem:[%s4325_s2 + $0x100] sm:$0xff] }
 0x24d   :  { %1356 = vmatpush.msrb.mxu2 %v2564_v49  ;;  %1398 = vmatpush.msrb.mxu3 %v2563_v41  ;;  %v863_v52 = vadd.f32 %v3441_v13, %v845_v48  ;;  %v864_v7 = vadd.f32 %v3443_v63, %v846_v51  ;;  %v2555_v13 = vld [vmem:[%s4325_s2 + $0x168] sm:$0xff]  ;;  %v1299_v63 = vld [vmem:[%s4325_s2 + $0xa0] sm:$0xff]  ;;  %v2545_v33 = vld [vmem:[%s4325_s2 + $0x118] sm:$0xff] }
 0x24e   :  { %1436 = vmatpush.msra.mxu0 %v1305_v62  ;;  %1480 = vmatpush.msra.mxu1 %v1300_v0  ;;  %v2543_v49 = vld [vmem:[%s4325_s2 + $0x108] sm:$0xff]  ;;  %v1283_v41 = vld [vmem:[%s4325_s2 + $0x20] sm:$0xff]  ;;  %v1282_v46 = vld [vmem:[%s4325_s2 + $0x18] sm:$0xff] }
 0x24f   :  { %1357 = vmatpush.msrb.mxu2 %v2562_v38  ;;  %1399 = vmatpush.msrb.mxu3 %v2561_v18  ;;  %v1286_v38 = vld [vmem:[%s4325_s2 + $0x38] sm:$0xff]  ;;  %v1284_v42 = vld [vmem:[%s4325_s2 + $0x28] sm:$0xff] }
 0x250   :  { %1437 = vmatpush.msra.mxu0 %v1303_v59  ;;  %1481 = vmatpush.msra.mxu1 %v1298_v21 }
 0x251   :  { %1358 = vmatpush.msrb.mxu2 %v2560_v17  ;;  %1400 = vmatpush.msrb.mxu3 %v2559_v55 }
 0x252   :  { %1438 = vmatpush.msra.mxu0 %v1301_v6  ;;  %1482 = vmatpush.msra.mxu1 %v1296_v12 }
 0x253   :  { %916 = vmatmul.f32.gmra.mxu2 %v851_v3  ;;  %957 = vmatmul.f32.gmra.mxu3 %v852_v11 }
 0x254   :  { %1030 = vmatmul.f32.gmra.mxu0 %v851_v3  ;;  %1071 = vmatmul.f32.gmra.mxu1 %v852_v11  ;;  %v2551_v3 = vld [vmem:[%s4325_s2 + $0x148] sm:$0xff]  ;;  %v1295_v11 = vld [vmem:[%s4325_s2 + $0x80] sm:$0xff] }
 0x255   :  { %1359 = vmatpush.msrb.mxu2 %v2558_v54  ;;  %1401 = vmatpush.msrb.mxu3 %v2557_v5 }
 0x256   :  { %1439 = vmatpush.msra.mxu0 %v1299_v63  ;;  %1483 = vmatpush.msra.mxu1 %v1294_v20 }
 0x257   :  { %1360 = vmatpush.msrb.mxu2 %v2556_v2  ;;  %1402 = vmatpush.msrb.mxu3 %v2555_v13 }
 0x258   :  { %1440 = vmatpush.msra.mxu0 %v1297_v16 }
 0x259   :  { %1361 = vmatpush.msrb.mxu2 %v2554_v10  ;;  %1403 = vmatpush.msrb.mxu3 %v2553_v15 }
 0x25a   :  { %1441 = vmatpush.msra.mxu0 %v1295_v11 }
 0x25b   :  { %919 = vmatmul.f32.gmra.mxu2 %v853_v25  ;;  %960 = vmatmul.f32.gmra.mxu3 %v854_v19 }
 0x25c   :  { %1033 = vmatmul.f32.gmra.mxu0 %v853_v25  ;;  %1074 = vmatmul.f32.gmra.mxu1 %v854_v19  ;;  %v2549_v25 = vld [vmem:[%s4325_s2 + $0x138] sm:$0xff]  ;;  %v1293_v19 = vld [vmem:[%s4325_s2 + $0x70] sm:$0xff] }
 0x25d   :  { %1362 = vmatpush.msrb.mxu2 %v2552_v14  ;;  %1404 = vmatpush.msrb.mxu3 %v2551_v3 }
 0x25e   :  { %1442 = vmatpush.msra.mxu0 %v1293_v19 }
 0x25f   :  { %1363 = vmatpush.msrb.mxu2 %v2550_v22  ;;  %1405 = vmatpush.msrb.mxu3 %v2549_v25 }
 0x260   :  { %1443 = vmatpush.msra.mxu0 %v1291_v26 }
 0x261   :  { %1364 = vmatpush.msrb.mxu2 %v2548_v4  ;;  %1406 = vmatpush.msrb.mxu3 %v2547_v30 }
 0x262   :  { %1444 = vmatpush.msra.mxu0 %v1289_v40  ;;  %v2604_v40 = vld [vmem:[%s4325_s2 + $0x2f0] sm:$0xff] }
 0x263   :  { %922 = vmatmul.f32.gmra.mxu2 %v855_v27  ;;  %963 = vmatmul.f32.gmra.mxu3 %v856_v29 }
 0x264   :  { %1036 = vmatmul.f32.gmra.mxu0 %v855_v27  ;;  %1077 = vmatmul.f32.gmra.mxu1 %v856_v29  ;;  %v1292_v27 = vld [vmem:[%s4325_s2 + $0x68] sm:$0xff]  ;;  %v2546_v29 = vld [vmem:[%s4325_s2 + $0x120] sm:$0xff] }
 0x265   :  { %1365 = vmatpush.msrb.mxu2 %v2546_v29  ;;  %1484 = vmatpush.msra.mxu1 %v1292_v27 }
 0x266   :  { %1407 = vmatpush.msrb.mxu3 %v2545_v33 }
 0x267   :  { %1366 = vmatpush.msrb.mxu2 %v2544_v31  ;;  %1485 = vmatpush.msra.mxu1 %v1290_v28  ;;  %v2605_v28 = vld [vmem:[%s4325_s2 + $0x2f8] sm:$0xff]  ;;  %v2602_v31 = vld [vmem:[%s4325_s2 + $0x2e0] sm:$0xff] }
 0x268   :  { %1408 = vmatpush.msrb.mxu3 %v2543_v49 }
 0x269   :  { %1367 = vmatpush.msrb.mxu2 %v2542_v36 }
 0x26a   :  { %1598 = vmatpush.msra.mxu3 %v2605_v28  ;;  %v2591_v28 = vld [vmem:[%s4325_s2 + $0x288] sm:$0xff] }
 0x26b   :  { %925 = vmatmul.f32.gmra.mxu2 %v857_v34  ;;  %966 = vmatmul.f32.gmra.mxu3 %v858_v35 }
 0x26c   :  { %1039 = vmatmul.f32.gmra.mxu0 %v857_v34  ;;  %1080 = vmatmul.f32.gmra.mxu1 %v858_v35  ;;  %v1287_v34 = vld [vmem:[%s4325_s2 + $0x40] sm:$0xff]  ;;  %v1288_v35 = vld [vmem:[%s4325_s2 + $0x48] sm:$0xff] }
 0x26d   :  { %1445 = vmatpush.msra.mxu0 %v1287_v34  ;;  %1486 = vmatpush.msra.mxu1 %v1288_v35 }
 0x26e   :  { %1557 = vmatpush.msra.mxu2 %v2604_v40  ;;  %v2590_v40 = vld [vmem:[%s4325_s2 + $0x280] sm:$0xff] }
 0x26f   :  { %1446 = vmatpush.msra.mxu0 %v1285_v50  ;;  %1487 = vmatpush.msra.mxu1 %v1286_v38 }
 0x270   :  { %1558 = vmatpush.msra.mxu2 %v2602_v31 }
 0x271   :  { %1447 = vmatpush.msra.mxu0 %v1283_v41  ;;  %1488 = vmatpush.msra.mxu1 %v1284_v42 }
 0x273   :  { %928 = vmatmul.f32.gmra.mxu2 %v859_v44  ;;  %969 = vmatmul.f32.gmra.mxu3 %v860_v45 }
 0x274   :  { %1042 = vmatmul.f32.gmra.mxu0 %v859_v44  ;;  %1083 = vmatmul.f32.gmra.mxu1 %v860_v45  ;;  %v1281_v45 = vld [vmem:[%s4325_s2 + $0x10] sm:$0xff] }
 0x275   :  { %1448 = vmatpush.msra.mxu0 %v1281_v45  ;;  %1489 = vmatpush.msra.mxu1 %v1282_v46 }
 0x27b   :  { %931 = vmatmul.f32.gmra.mxu2 %v861_v58  ;;  %972 = vmatmul.f32.gmra.mxu3 %v862_v47 }
 0x27c   :  { %1045 = vmatmul.f32.gmra.mxu0 %v861_v58  ;;  %1086 = vmatmul.f32.gmra.mxu1 %v862_v47  ;;  %v1279_v58 = vld [vmem:[%s4325_s2] sm:$0xff]  ;;  %v1280_v47 = vld [vmem:[%s4325_s2 + $0x8] sm:$0xff] }
 0x27d   :  { %1449 = vmatpush.msra.mxu0 %v1279_v58  ;;  %1490 = vmatpush.msra.mxu1 %v1280_v47  ;;  %v2600_v47 = vld [vmem:[%s4325_s2 + $0x2d0] sm:$0xff] }
 0x27e   :  { %1559 = vmatpush.msra.mxu2 %v2600_v47 }
 0x283   :  { %934 = vmatmul.f32.gmra.mxu2 %v863_v52  ;;  %975 = vmatmul.f32.gmra.mxu3 %v864_v7 }
 0x284   :  { %1048 = vmatmul.f32.gmra.mxu0 %v863_v52  ;;  %1089 = vmatmul.f32.gmra.mxu1 %v864_v7 }
 0x2c9   :  { %v1028_v24 = vpop.f32.mrf.mxu0  ;;  %v1069_v39 = vpop.f32.mrf.mxu1 }
 0x2ca   :  { %v1070_v32 = vadd.f32 %v1069_v39, %v1028_v24 }
 0x2cc   :  { %v2534_v37 = vmul.f32 -1.442695, %v1070_v32  ;;  %v2603_v32 = vld [vmem:[%s4325_s2 + $0x2e8] sm:$0xff] }
 0x2cd   :  { %1599 = vmatpush.msra.mxu3 %v2603_v32 }
 0x2ce   :  { %2624 = vpow2.f32 %v2534_v37  ;;  %v914_v51 = vpop.f32.mrf.mxu2  ;;  %v955_v52 = vpop.f32.mrf.mxu3 }
 0x2cf   :  { %v956_v16 = vadd.f32 %v955_v52, %v914_v51 }
 0x2d1   :  { %v1031_v43 = vpop.f32.mrf.mxu0  ;;  %v1072_v44 = vpop.f32.mrf.mxu1 }
 0x2d2   :  { %v1073_v57 = vadd.f32 %v1072_v44, %v1031_v43 }
 0x2d4   :  { %v2625_v48 = vpop.eup %2624  ;;  %v2535_v7 = vmul.f32 -1.442695, %v1073_v57 }
 0x2d5   :  { %v1117_v8 = vadd.f32 1.0, %v2625_v48  ;;  %v2601_v48 = vld [vmem:[%s4325_s2 + $0x2d8] sm:$0xff] }
 0x2d6   :  { %2626 = vpow2.f32 %v2535_v7  ;;  %v917_v1 = vpop.f32.mrf.mxu2  ;;  %v958_v59 = vpop.f32.mrf.mxu3  ;;  %1600 = vmatpush.msra.mxu3 %v2601_v48 }
 0x2d7   :  { %2628 = vrcp.f32 %v1117_v8  ;;  %v1136_v2 = vand.u32 2147483648, %v1117_v8  ;;  %v1134_v10 = vand.u32 2147483647, %v1117_v8  ;;  %vm1130_vm8 = vweird.f32 %v1117_v8 }
 0x2d8   :  { %v959_v37 = vadd.f32 %v958_v59, %v917_v1 }
 0x2d9   :  { %v1034_v53 = vpop.f32.mrf.mxu0  ;;  %v1075_v17 = vpop.f32.mrf.mxu1  ;;  %v1137_v21 = vor.u32 1.1754944e-38, %v1136_v2  ;;  %vm1135_vm10 = vcmp.eq.f32.partialorder %v1134_v10, 8.507059e+37  ;;  %v2597_v2 = vld [vmem:[%s4325_s2 + $0x2b8] sm:$0xff] }
 0x2da   :  { %v1076_v18 = vadd.f32 %v1075_v17, %v1034_v53  ;;  %v2598_v17 = vld [vmem:[%s4325_s2 + $0x2c0] sm:$0xff] }
 0x2db   :  { %1560 = vmatpush.msra.mxu2 %v2598_v17 }
 0x2dc   :  { %v2627_v54 = vpop.eup %2626  ;;  %v2536_v55 = vmul.f32 -1.442695, %v1076_v18  ;;  %v2599_v18 = vld [vmem:[%s4325_s2 + $0x2c8] sm:$0xff] }
 0x2dd   :  { %v2629_v56 = vpop.eup %2628  ;;  %v1118_v61 = vadd.f32 1.0, %v2627_v54  ;;  %1601 = vmatpush.msra.mxu3 %v2599_v18 }
 0x2de   :  { %v1126_v62 = vmul.f32 %v2629_v56, %v1117_v8  ;;  %2630 = vpow2.f32 %v2536_v55  ;;  %vm1131_vm7 = vweird.f32 %v2629_v56  ;;  %v3688_v19 = vpop.f32.mrf.mxu2  ;;  %v961_v20 = vpop.f32.mrf.mxu3 }
 0x2df   :  { %2632 = vrcp.f32 %v1118_v61  ;;  %vm1132_vm9 = vmor %vm1130_vm8, %vm1131_vm7  ;;  %v1151_v26 = vand.u32 2147483648, %v1118_v61  ;;  %v1149_v24 = vand.u32 2147483647, %v1118_v61  ;;  %vm1145_vm12 = vweird.f32 %v1118_v61  ;;  %1602 = vmatpush.msra.mxu3 %v2597_v2  ;;  %v2583_v2 = vld [vmem:[%s4325_s2 + $0x248] sm:$0xff] }
 0x2e0   :  { %v1127_v60 = vsub.f32 1.0, %v1126_v62  ;;  %v962_v62 = vadd.f32 %v961_v20, %v3688_v19 }
 0x2e1   :  { %v1037_v5 = vpop.f32.mrf.mxu0  ;;  %v1078_v6 = vpop.f32.mrf.mxu1  ;;  %v1152_v49 = vor.u32 1.1754944e-38, %v1151_v26  ;;  %vm1150_vm14 = vcmp.eq.f32.partialorder %v1149_v24, 8.507059e+37 }
 0x2e2   :  { %v1128_v9 = vmul.f32 %v2629_v56, %v1127_v60  ;;  %v1079_v13 = vadd.f32 %v1078_v6, %v1037_v5  ;;  %v2596_v60 = vld [vmem:[%s4325_s2 + $0x2b0] sm:$0xff] }
 0x2e3   :  { %1561 = vmatpush.msra.mxu2 %v2596_v60  ;;  %v2582_v60 = vld [vmem:[%s4325_s2 + $0x240] sm:$0xff] }
 0x2e4   :  { %v2631_v63 = vpop.eup %2630  ;;  %v1129_v0 = vadd.f32 %v2629_v56, %v1128_v9  ;;  %v2537_v14 = vmul.f32 -1.442695, %v1079_v13 }
 0x2e5   :  { %v2633_v15 = vpop.eup %2632  ;;  %v3685_v22 = vadd.f32 1.0, %v2631_v63 }
 0x2e6   :  { %v1133_v3 = vsel %vm1132_vm9, %v2629_v56, %v1129_v0  ;;  %v1141_v11 = vmul.f32 %v2633_v15, %v1118_v61  ;;  %2634 = vpow2.f32 %v2537_v14  ;;  %vm1146_vm11 = vweird.f32 %v2633_v15  ;;  %v923_v8 = vpop.f32.mrf.mxu2  ;;  %v964_v53 = vpop.f32.mrf.mxu3 }
 0x2e7   :  { %v1138_v12 = vsel %vm1135_vm10, %v1137_v21, %v1133_v3  ;;  %2636 = vrcp.f32 %v3685_v22  ;;  %vm1147_vm13 = vmor %vm1145_vm12, %vm1146_vm11  ;;  %v1166_v45 = vand.u32 2147483648, %v3685_v22  ;;  %v1164_v52 = vand.u32 2147483647, %v3685_v22  ;;  %v2595_v21 = vld [vmem:[%s4325_s2 + $0x2a8] sm:$0xff] }
 0x2e8   :  { %v1245_v4 = vmul.f32 %v1138_v12, %v956_v16  ;;  %v1142_v25 = vsub.f32 1.0, %v1141_v11  ;;  %vm1160_vm0 = vweird.f32 %v3685_v22  ;;  %v2594_v16 = vld [vmem:[%s4325_s2 + $0x2a0] sm:$0xff]  ;;  %v2592_v12 = vld [vmem:[%s4325_s2 + $0x290] sm:$0xff]  ;;  %1603 = vmatpush.msra.mxu3 %v2595_v21  ;;  %v2579_v21 = vld [vmem:[%s4325_s2 + $0x228] sm:$0xff] }
 0x2e9   :  { %v1040_v27 = vpop.f32.mrf.mxu0  ;;  %v1081_v29 = vpop.f32.mrf.mxu1  ;;  %v1167_v1 = vor.u32 1.1754944e-38, %v1166_v45  ;;  %vm1165_vm3 = vcmp.eq.f32.partialorder %v1164_v52, 8.507059e+37  ;;  %1562 = vmatpush.msra.mxu2 %v2594_v16  ;;  %v2586_v45 = vld [vmem:[%s4325_s2 + $0x260] sm:$0xff] }
 0x2ea   :  { %1263 = vst [vmem:[#allocation3 + $0x1] sm:$0xff] %v1245_v4  ;;  %v1143_v30 = vmul.f32 %v2633_v15, %v1142_v25  ;;  %v1082_v39 = vadd.f32 %v1081_v29, %v1040_v27  ;;  %1368 = vmatmul.f32.vlgmr.msrb.gmra.mxu2 %v1245_v4  ;;  %1409 = vmatmul.f32.vlgmr.msrb.gmra.mxu3 %v1245_v4  ;;  %v2593_v4 = vld [vmem:[%s4325_s2 + $0x298] sm:$0xff]  ;;  %v2578_v16 = vld [vmem:[%s4325_s2 + $0x220] sm:$0xff] }
 0x2eb   :  { %v965_v27 = vadd.f32 %v964_v53, %v923_v8  ;;  %1563 = vmatpush.msra.mxu2 %v2592_v12  ;;  %1604 = vmatpush.msra.mxu3 %v2593_v4  ;;  %v2584_v8 = vld [vmem:[%s4325_s2 + $0x250] sm:$0xff]  ;;  %v2585_v53 = vld [vmem:[%s4325_s2 + $0x258] sm:$0xff] }
 0x2ec   :  { %v2635_v33 = vpop.eup %2634  ;;  %v1144_v34 = vadd.f32 %v2633_v15, %v1143_v30  ;;  %v2538_v35 = vmul.f32 -1.442695, %v1082_v39 }
 0x2ed   :  { %v2637_v36 = vpop.eup %2636  ;;  %v3703_v50 = vadd.f32 1.0, %v2635_v33  ;;  %1564 = vmatpush.msra.mxu2 %v2590_v40  ;;  %1605 = vmatpush.msra.mxu3 %v2591_v28  ;;  %v2574_v40 = vld [vmem:[%s4325_s2 + $0x200] sm:$0xff]  ;;  %v2575_v28 = vld [vmem:[%s4325_s2 + $0x208] sm:$0xff] }
 0x2ee   :  { %v1148_v38 = vsel %vm1147_vm13, %v2633_v15, %v1144_v34  ;;  %v1156_v41 = vmul.f32 %v2637_v36, %v3685_v22  ;;  %2638 = vpow2.f32 %v2538_v35  ;;  %vm1161_vm15 = vweird.f32 %v2637_v36  ;;  %v926_v30 = vpop.f32.mrf.mxu2  ;;  %v967_v24 = vpop.f32.mrf.mxu3 }
 0x2ef   :  { %v1153_v42 = vsel %vm1150_vm14, %v1152_v49, %v1148_v38  ;;  %2640 = vrcp.f32 %v3703_v50  ;;  %vm1162_vm1 = vmor %vm1160_vm0, %vm1161_vm15  ;;  %v1181_v63 = vand.u32 2147483648, %v3703_v50  ;;  %v1179_v3 = vand.u32 2147483647, %v3703_v50  ;;  %v2588_v38 = vld [vmem:[%s4325_s2 + $0x270] sm:$0xff] }
 0x2f0   :  { %v1246_v43 = vmul.f32 %v1153_v42, %v959_v37  ;;  %v1157_v44 = vsub.f32 1.0, %v1156_v41  ;;  %vm1175_vm5 = vweird.f32 %v3703_v50  ;;  %v2589_v41 = vld [vmem:[%s4325_s2 + $0x278] sm:$0xff]  ;;  %1565 = vmatpush.msra.mxu2 %v2588_v38 }
 0x2f1   :  { %v1043_v46 = vpop.f32.mrf.mxu0  ;;  %v1084_v57 = vpop.f32.mrf.mxu1  ;;  %v1271_v58 = vld [vmem:[#allocation3] sm:$0xff]  ;;  %v1182_v29 = vor.u32 1.1754944e-38, %v1181_v63  ;;  %vm1180_vm7 = vcmp.eq.f32.partialorder %v1179_v3, 8.507059e+37  ;;  %1606 = vmatpush.msra.mxu3 %v2589_v41 }
 0x2f2   :  { %1264 = vst [vmem:[#allocation3 + $0x9] sm:$0xff] %v1246_v43  ;;  %v1158_v51 = vmul.f32 %v2637_v36, %v1157_v44  ;;  %v1085_v7 = vadd.f32 %v1084_v57, %v1043_v46  ;;  %1450 = vmatmul.f32.vlgmr.msra.gmra.mxu0 %v1271_v58  ;;  %1491 = vmatmul.f32.vlgmr.msra.gmra.mxu1 %v1271_v58  ;;  %v2587_v46 = vld [vmem:[%s4325_s2 + $0x268] sm:$0xff] }
 0x2f3   :  { %1371 = vmatmul.f32.gmra.mxu2 %v1246_v43  ;;  %1412 = vmatmul.f32.gmra.mxu3 %v1246_v43 }
 0x2f4   :  { %v2639_v54 = vpop.eup %2638  ;;  %v1159_v55 = vadd.f32 %v2637_v36, %v1158_v51  ;;  %v2539_v56 = vmul.f32 -1.442695, %v1085_v7  ;;  %v968_v51 = vadd.f32 %v967_v24, %v926_v30  ;;  %1566 = vmatpush.msra.mxu2 %v2586_v45  ;;  %1607 = vmatpush.msra.mxu3 %v2587_v46  ;;  %v2577_v30 = vld [vmem:[%s4325_s2 + $0x218] sm:$0xff] }
 0x2f5   :  { %v2641_v61 = vpop.eup %2640  ;;  %v3724_v59 = vadd.f32 1.0, %v2639_v54 }
 0x2f6   :  { %v1163_v5 = vsel %vm1162_vm1, %v2637_v36, %v1159_v55  ;;  %v1171_v6 = vmul.f32 %v2641_v61, %v3703_v50  ;;  %2642 = vpow2.f32 %v2539_v56  ;;  %vm1176_vm4 = vweird.f32 %v2641_v61  ;;  %v929_v55 = vpop.f32.mrf.mxu2  ;;  %v970_v56 = vpop.f32.mrf.mxu3  ;;  %1567 = vmatpush.msra.mxu2 %v2584_v8  ;;  %1608 = vmatpush.msra.mxu3 %v2585_v53 }
 0x2f7   :  { %v1168_v9 = vsel %vm1165_vm3, %v1167_v1, %v1163_v5  ;;  %2644 = vrcp.f32 %v3724_v59  ;;  %vm1177_vm6 = vmor %vm1175_vm5, %vm1176_vm4  ;;  %v1196_v36 = vand.u32 2147483648, %v3724_v59  ;;  %v1194_v43 = vand.u32 2147483647, %v3724_v59 }
 0x2f8   :  { %v1247_v10 = vmul.f32 %v1168_v9, %v962_v62  ;;  %v1172_v13 = vsub.f32 1.0, %v1171_v6  ;;  %vm1190_vm9 = vweird.f32 %v3724_v59  ;;  %v2580_v9 = vld [vmem:[%s4325_s2 + $0x230] sm:$0xff]  ;;  %1568 = vmatpush.msra.mxu2 %v2582_v60  ;;  %1609 = vmatpush.msra.mxu3 %v2583_v2  ;;  %v1668_v60 = vld [vmem:[%s4321_s3 + $0x68] sm:$0xff] }
 0x2f9   :  { %v1046_v0 = vpop.f32.mrf.mxu0  ;;  %v1087_v14 = vpop.f32.mrf.mxu1  ;;  %v1272_v15 = vld [vmem:[#allocation3 + $0x8] sm:$0xff]  ;;  %v1197_v52 = vor.u32 1.1754944e-38, %v1196_v36  ;;  %vm1195_vm11 = vcmp.eq.f32.partialorder %v1194_v43, 8.507059e+37  ;;  %v1684_v2 = vld [vmem:[%s4321_s3 + $0xe8] sm:$0xff] }
 0x2fa   :  { %1265 = vst [vmem:[#allocation3 + $0x11] sm:$0xff] %v1247_v10  ;;  %v1173_v22 = vmul.f32 %v2641_v61, %v1172_v13  ;;  %v1088_v11 = vadd.f32 %v1087_v14, %v1046_v0  ;;  %1453 = vmatmul.f32.gmra.mxu0 %v1272_v15  ;;  %1494 = vmatmul.f32.gmra.mxu1 %v1272_v15  ;;  %v1516_v8 = vld [vmem:[#allocation3 + $0x2] sm:$0xff] }
 0x2fb   :  { %1374 = vmatmul.f32.gmra.mxu2 %v1247_v10  ;;  %1415 = vmatmul.f32.gmra.mxu3 %v1247_v10  ;;  %v2581_v10 = vld [vmem:[%s4325_s2 + $0x238] sm:$0xff] }
 0x2fc   :  { %v2643_v25 = vpop.eup %2642  ;;  %v1174_v19 = vadd.f32 %v2641_v61, %v1173_v22  ;;  %v2540_v20 = vmul.f32 -1.442695, %v1088_v11  ;;  %v971_v22 = vadd.f32 %v970_v56, %v929_v55  ;;  %1569 = vmatpush.msra.mxu2 %v2580_v9  ;;  %1610 = vmatpush.msra.mxu3 %v2581_v10  ;;  %v1670_v56 = vld [vmem:[%s4321_s3 + $0x78] sm:$0xff] }
 0x2fd   :  { %v2645_v26 = vpop.eup %2644  ;;  %v3750_v39 = vadd.f32 1.0, %v2643_v25  ;;  %1687 = vmatpush.msrb.mxu0 %v1670_v56  ;;  %v1666_v10 = vld [vmem:[%s4321_s3 + $0x58] sm:$0xff] }
 0x2fe   :  { %v1178_v31 = vsel %vm1177_vm6, %v2641_v61, %v1174_v19  ;;  %v1186_v32 = vmul.f32 %v2645_v26, %v3724_v59  ;;  %2646 = vpow2.f32 %v2540_v20  ;;  %vm1191_vm8 = vweird.f32 %v2645_v26  ;;  %1570 = vmatpush.msra.mxu2 %v2578_v16  ;;  %1611 = vmatpush.msra.mxu3 %v2579_v21  ;;  %v932_v19 = vpop.f32.mrf.mxu2  ;;  %v973_v20 = vpop.f32.mrf.mxu3  ;;  %v1664_v16 = vld [vmem:[%s4321_s3 + $0x48] sm:$0xff] }
 0x2ff   :  { %v1183_v33 = vsel %vm1180_vm7, %v1182_v29, %v1178_v31  ;;  %2648 = vrcp.f32 %v3750_v39  ;;  %vm1192_vm10 = vmor %vm1190_vm9, %vm1191_vm8  ;;  %v1211_v1 = vand.u32 2147483648, %v3750_v39  ;;  %v1209_v6 = vand.u32 2147483647, %v3750_v39  ;;  %v2576_v29 = vld [vmem:[%s4325_s2 + $0x210] sm:$0xff]  ;;  %v1680_v21 = vld [vmem:[%s4321_s3 + $0xc8] sm:$0xff] }
 0x300   :  { %v1248_v34 = vmul.f32 %v1183_v33, %v965_v27  ;;  %v1187_v35 = vsub.f32 1.0, %v1186_v32  ;;  %vm1205_vm13 = vweird.f32 %v3750_v39  ;;  %1571 = vmatpush.msra.mxu2 %v2576_v29  ;;  %1612 = vmatpush.msra.mxu3 %v2577_v30  ;;  %v1660_v29 = vld [vmem:[%s4321_s3 + $0x28] sm:$0xff] }
 0x301   :  { %v1049_v37 = vpop.f32.mrf.mxu0  ;;  %v1090_v49 = vpop.f32.mrf.mxu1  ;;  %v1273_v50 = vld [vmem:[#allocation3 + $0x10] sm:$0xff]  ;;  %v1212_v14 = vor.u32 1.1754944e-38, %v1211_v1  ;;  %vm1210_vm15 = vcmp.eq.f32.partialorder %v1209_v6, 8.507059e+37  ;;  %v1685_v1 = vld [vmem:[%s4321_s3 + $0xf0] sm:$0xff]  ;;  %v1676_v30 = vld [vmem:[%s4321_s3 + $0xa8] sm:$0xff] }
 0x302   :  { %1266 = vst [vmem:[#allocation3 + $0x19] sm:$0xff] %v1248_v34  ;;  %v1188_v42 = vmul.f32 %v2645_v26, %v1187_v35  ;;  %v1091_v44 = vadd.f32 %v1090_v49, %v1049_v37  ;;  %1456 = vmatmul.f32.gmra.mxu0 %v1273_v50  ;;  %1497 = vmatmul.f32.gmra.mxu1 %v1273_v50  ;;  %v1517_v53 = vld [vmem:[#allocation3 + $0xa] sm:$0xff] }
 0x303   :  { %1377 = vmatmul.f32.gmra.mxu2 %v1248_v34  ;;  %1418 = vmatmul.f32.gmra.mxu3 %v1248_v34  ;;  %v974_v34 = vadd.f32 %v973_v20, %v932_v19  ;;  %v1683_v6 = vld [vmem:[%s4321_s3 + $0xe0] sm:$0xff]  ;;  %v1661_v19 = vld [vmem:[%s4321_s3 + $0x30] sm:$0xff] }
 0x304   :  { %v2647_v57 = vpop.eup %2646  ;;  %v1189_v58 = vadd.f32 %v2645_v26, %v1188_v42  ;;  %v2541_v47 = vmul.f32 -1.442695, %v1091_v44  ;;  %1572 = vmatpush.msra.mxu2 %v2574_v40  ;;  %1613 = vmatpush.msra.mxu3 %v2575_v28  ;;  %v1677_v20 = vld [vmem:[%s4321_s3 + $0xb0] sm:$0xff] }
 0x305   :  { %v2649_v48 = vpop.eup %2648  ;;  %v3776_v7 = vadd.f32 1.0, %v2647_v57 }
 0x306   :  { %v1193_v17 = vsel %vm1192_vm10, %v2645_v26, %v1189_v58  ;;  %v1201_v18 = vmul.f32 %v2649_v48, %v3750_v39  ;;  %2650 = vpow2.f32 %v2541_v47  ;;  %vm1206_vm12 = vweird.f32 %v2649_v48  ;;  %v935_v44 = vpop.f32.mrf.mxu2  ;;  %v976_v45 = vpop.f32.mrf.mxu3  ;;  %1785 = vmatpush.msrb.mxu2 %v1670_v56 }
 0x307   :  { %v1198_v54 = vsel %vm1195_vm11, %v1197_v52, %v1193_v17  ;;  %2652 = vrcp.f32 %v3776_v7  ;;  %vm1207_vm14 = vmor %vm1205_vm13, %vm1206_vm12  ;;  %v1226_v26 = vand.u32 2147483648, %v3776_v7  ;;  %v1224_v39 = vand.u32 2147483647, %v3776_v7 }
 0x308   :  { %v1249_v61 = vmul.f32 %v1198_v54, %v968_v51  ;;  %v1202_v62 = vsub.f32 1.0, %v1201_v18  ;;  %vm1220_vm1 = vweird.f32 %v3776_v7  ;;  %v977_v58 = vadd.f32 %v976_v45, %v935_v44 }
 0x309   :  { %v1274_v59 = vld [vmem:[#allocation3 + $0x18] sm:$0xff]  ;;  %v1227_v33 = vor.u32 1.1754944e-38, %v1226_v26  ;;  %vm1225_vm4 = vcmp.eq.f32.partialorder %v1224_v39, 8.507059e+37  ;;  %v1675_v39 = vld [vmem:[%s4321_s3 + $0xa0] sm:$0xff] }
 0x30a   :  { %1267 = vst [vmem:[#allocation3 + $0x29] sm:$0xff] %v1249_v61  ;;  %v1203_v5 = vmul.f32 %v2649_v48, %v1202_v62  ;;  %1459 = vmatmul.f32.gmra.mxu0 %v1274_v59  ;;  %1500 = vmatmul.f32.gmra.mxu1 %v1274_v59  ;;  %v1518_v17 = vld [vmem:[#allocation3 + $0x12] sm:$0xff]  ;;  %v1519_v18 = vld [vmem:[#allocation3 + $0x1a] sm:$0xff] }
 0x30b   :  { %1380 = vmatmul.f32.gmra.mxu2 %v1249_v61  ;;  %1421 = vmatmul.f32.gmra.mxu3 %v1249_v61  ;;  %v1686_v61 = vld [vmem:[%s4321_s3 + $0xf8] sm:$0xff]  ;;  %v1669_v62 = vld [vmem:[%s4321_s3 + $0x70] sm:$0xff] }
 0x30c   :  { %v2651_v13 = vpop.eup %2650  ;;  %v1204_v63 = vadd.f32 %v2649_v48, %v1203_v5  ;;  %1826 = vmatpush.msrb.mxu3 %v1686_v61  ;;  %1728 = vmatpush.msrb.mxu1 %v1686_v61  ;;  %v1667_v5 = vld [vmem:[%s4321_s3 + $0x60] sm:$0xff] }
 0x30d   :  { %v2653_v0 = vpop.eup %2652  ;;  %v3801_v15 = vadd.f32 1.0, %v2651_v13  ;;  %1786 = vmatpush.msrb.mxu2 %v1669_v62  ;;  %1688 = vmatpush.msrb.mxu0 %v1669_v62  ;;  %v1682_v13 = vld [vmem:[%s4321_s3 + $0xd8] sm:$0xff] }
 0x30e   :  { %v1208_v3 = vsel %vm1207_vm14, %v2649_v48, %v1204_v63  ;;  %v1216_v11 = vmul.f32 %v2653_v0, %v3776_v7  ;;  %vm1221_vm0 = vweird.f32 %v2653_v0  ;;  %1827 = vmatpush.msrb.mxu3 %v1685_v1  ;;  %1729 = vmatpush.msrb.mxu1 %v1685_v1  ;;  %v1665_v63 = vld [vmem:[%s4321_s3 + $0x50] sm:$0xff] }
 0x30f   :  { %v1213_v12 = vsel %vm1210_vm15, %v1212_v14, %v1208_v3  ;;  %2654 = vrcp.f32 %v3801_v15  ;;  %vm1222_vm3 = vmor %vm1220_vm1, %vm1221_vm0  ;;  %v1241_v38 = vand.u32 2147483648, %v3801_v15  ;;  %v1239_v43 = vand.u32 2147483647, %v3801_v15  ;;  %1787 = vmatpush.msrb.mxu2 %v1668_v60  ;;  %1689 = vmatpush.msrb.mxu0 %v1668_v60  ;;  %v1679_v3 = vld [vmem:[%s4321_s3 + $0xc0] sm:$0xff] }
 0x310   :  { %v1250_v4 = vmul.f32 %v1213_v12, %v971_v22  ;;  %v1217_v25 = vsub.f32 1.0, %v1216_v11  ;;  %vm1235_vm6 = vweird.f32 %v3801_v15  ;;  %1828 = vmatpush.msrb.mxu3 %v1684_v2  ;;  %1730 = vmatpush.msrb.mxu1 %v1684_v2  ;;  %v1663_v22 = vld [vmem:[%s4321_s3 + $0x40] sm:$0xff] }
 0x311   :  { %v1275_v27 = vld [vmem:[#allocation3 + $0x28] sm:$0xff]  ;;  %v1242_v57 = vor.u32 1.1754944e-38, %v1241_v38  ;;  %vm1240_vm8 = vcmp.eq.f32.partialorder %v1239_v43, 8.507059e+37  ;;  %1788 = vmatpush.msrb.mxu2 %v1667_v5  ;;  %1690 = vmatpush.msrb.mxu0 %v1667_v5  ;;  %v1671_v38 = vld [vmem:[%s4321_s3 + $0x80] sm:$0xff] }
 0x312   :  { %1268 = vst [vmem:[#allocation3 + $0x31] sm:$0xff] %v1250_v4  ;;  %v1218_v24 = vmul.f32 %v2653_v0, %v1217_v25  ;;  %1462 = vmatmul.f32.gmra.mxu0 %v1275_v27  ;;  %1503 = vmatmul.f32.gmra.mxu1 %v1275_v27  ;;  %v1678_v25 = vld [vmem:[%s4321_s3 + $0xb8] sm:$0xff] }
 0x313   :  { %1383 = vmatmul.f32.gmra.mxu2 %v1250_v4  ;;  %1424 = vmatmul.f32.gmra.mxu3 %v1250_v4  ;;  %v1662_v4 = vld [vmem:[%s4321_s3 + $0x38] sm:$0xff] }
 0x314   :  { %v1219_v31 = vadd.f32 %v2653_v0, %v1218_v24  ;;  %1829 = vmatpush.msrb.mxu3 %v1683_v6  ;;  %1731 = vmatpush.msrb.mxu1 %v1683_v6  ;;  %v1659_v24 = vld [vmem:[%s4321_s3 + $0x20] sm:$0xff] }
 0x315   :  { %v2655_v32 = vpop.eup %2654  ;;  %1789 = vmatpush.msrb.mxu2 %v1666_v10  ;;  %1691 = vmatpush.msrb.mxu0 %v1666_v10 }
 0x316   :  { %v1223_v35 = vsel %vm1222_vm3, %v2653_v0, %v1219_v31  ;;  %v1231_v36 = vmul.f32 %v2655_v32, %v3801_v15  ;;  %vm1236_vm5 = vweird.f32 %v2655_v32  ;;  %1830 = vmatpush.msrb.mxu3 %v1682_v13  ;;  %v1681_v0 = vld [vmem:[%s4321_s3 + $0xd0] sm:$0xff]  ;;  %1732 = vmatpush.msrb.mxu1 %v1682_v13  ;;  %v1658_v31 = vld [vmem:[%s4321_s3 + $0x18] sm:$0xff] }
 0x317   :  { %v1228_v37 = vsel %vm1225_vm4, %v1227_v33, %v1223_v35  ;;  %vm1237_vm7 = vmor %vm1235_vm6, %vm1236_vm5  ;;  %1790 = vmatpush.msrb.mxu2 %v1665_v63  ;;  %1692 = vmatpush.msrb.mxu0 %v1665_v63  ;;  %v1657_v33 = vld [vmem:[%s4321_s3 + $0x10] sm:$0xff]  ;;  %v1656_v35 = vld [vmem:[%s4321_s3 + $0x8] sm:$0xff] }
 0x318   :  { %v1251_v49 = vmul.f32 %v1228_v37, %v974_v34  ;;  %v1232_v50 = vsub.f32 1.0, %v1231_v36  ;;  %1831 = vmatpush.msrb.mxu3 %v1681_v0  ;;  %1733 = vmatpush.msrb.mxu1 %v1681_v0  ;;  %v1673_v34 = vld [vmem:[%s4321_s3 + $0x90] sm:$0xff]  ;;  %v1672_v36 = vld [vmem:[%s4321_s3 + $0x88] sm:$0xff] }
 0x319   :  { %v1276_v41 = vld [vmem:[#allocation3 + $0x30] sm:$0xff]  ;;  %1791 = vmatpush.msrb.mxu2 %v1664_v16  ;;  %1693 = vmatpush.msrb.mxu0 %v1664_v16 }
 0x31a   :  { %1269 = vst [vmem:[#allocation3 + $0x39] sm:$0xff] %v1251_v49  ;;  %v1233_v42 = vmul.f32 %v2655_v32, %v1232_v50  ;;  %1465 = vmatmul.f32.gmra.mxu0 %v1276_v41  ;;  %1506 = vmatmul.f32.gmra.mxu1 %v1276_v41  ;;  %v1520_v54 = vld [vmem:[#allocation3 + $0x2a] sm:$0xff] }
 0x31b   :  { %1386 = vmatmul.f32.gmra.mxu2 %v1251_v49  ;;  %1427 = vmatmul.f32.gmra.mxu3 %v1251_v49  ;;  %v1655_v50 = vld [vmem:[%s4321_s3] sm:$0xff] }
 0x31c   :  { %v1234_v46 = vadd.f32 %v2655_v32, %v1233_v42  ;;  %1832 = vmatpush.msrb.mxu3 %v1680_v21  ;;  %1734 = vmatpush.msrb.mxu1 %v1680_v21 }
 0x31d   :  { %1792 = vmatpush.msrb.mxu2 %v1663_v22  ;;  %1694 = vmatpush.msrb.mxu0 %v1663_v22 }
 0x31e   :  { %v1238_v47 = vsel %vm1237_vm7, %v2655_v32, %v1234_v46  ;;  %1833 = vmatpush.msrb.mxu3 %v1679_v3  ;;  %1735 = vmatpush.msrb.mxu1 %v1679_v3  ;;  %v1674_v32 = vld [vmem:[%s4321_s3 + $0x98] sm:$0xff] }
 0x31f   :  { %v1243_v48 = vsel %vm1240_vm8, %v1242_v57, %v1238_v47  ;;  %1793 = vmatpush.msrb.mxu2 %v1662_v4  ;;  %1695 = vmatpush.msrb.mxu0 %v1662_v4 }
 0x320   :  { %v1252_v51 = vmul.f32 %v1243_v48, %v977_v58  ;;  %1834 = vmatpush.msrb.mxu3 %v1678_v25  ;;  %1736 = vmatpush.msrb.mxu1 %v1678_v25 }
 0x321   :  { %v1277_v52 = vld [vmem:[#allocation3 + $0x38] sm:$0xff]  ;;  %1794 = vmatpush.msrb.mxu2 %v1661_v19  ;;  %1696 = vmatpush.msrb.mxu0 %v1661_v19 }
 0x322   :  { %1270 = vst [vmem:[#allocation3 + $0x41] sm:$0xff] %v1252_v51  ;;  %1468 = vmatmul.f32.gmra.mxu0 %v1277_v52  ;;  %1509 = vmatmul.f32.gmra.mxu1 %v1277_v52  ;;  %v1521_v55 = vld [vmem:[#allocation3 + $0x32] sm:$0xff] }
 0x323   :  { %1389 = vmatmul.f32.gmra.mxu2 %v1252_v51  ;;  %1430 = vmatmul.f32.gmra.mxu3 %v1252_v51 }
 0x324   :  { %1835 = vmatpush.msrb.mxu3 %v1677_v20  ;;  %1737 = vmatpush.msrb.mxu1 %v1677_v20 }
 0x325   :  { %1795 = vmatpush.msrb.mxu2 %v1660_v29  ;;  %1697 = vmatpush.msrb.mxu0 %v1660_v29 }
 0x326   :  { %1836 = vmatpush.msrb.mxu3 %v1676_v30  ;;  %1738 = vmatpush.msrb.mxu1 %v1676_v30 }
 0x327   :  { %1796 = vmatpush.msrb.mxu2 %v1659_v24  ;;  %1698 = vmatpush.msrb.mxu0 %v1659_v24 }
 0x328   :  { %1837 = vmatpush.msrb.mxu3 %v1675_v39  ;;  %1739 = vmatpush.msrb.mxu1 %v1675_v39 }
 0x329   :  { %v1278_v7 = vld [vmem:[#allocation3 + $0x40] sm:$0xff]  ;;  %1797 = vmatpush.msrb.mxu2 %v1658_v31  ;;  %1699 = vmatpush.msrb.mxu0 %v1658_v31 }
 0x32a   :  { %1471 = vmatmul.f32.gmra.mxu0 %v1278_v7  ;;  %1512 = vmatmul.f32.gmra.mxu1 %v1278_v7  ;;  %v1522_v59 = vld [vmem:[#allocation3 + $0x3a] sm:$0xff]  ;;  %v1523_v9 = vld [vmem:[#allocation3 + $0x42] sm:$0xff] }
 0x32b   :  { %1573 = vmatmul.f32.vlgmr.msra.gmra.mxu2 %v1516_v8  ;;  %1614 = vmatmul.f32.vlgmr.msra.gmra.mxu3 %v1516_v8 }
 0x32c   :  { %1838 = vmatpush.msrb.mxu3 %v1674_v32  ;;  %1740 = vmatpush.msrb.mxu1 %v1674_v32 }
 0x32d   :  { %1798 = vmatpush.msrb.mxu2 %v1657_v33  ;;  %1700 = vmatpush.msrb.mxu0 %v1657_v33 }
 0x32e   :  { %1839 = vmatpush.msrb.mxu3 %v1673_v34  ;;  %1741 = vmatpush.msrb.mxu1 %v1673_v34 }
 0x32f   :  { %1799 = vmatpush.msrb.mxu2 %v1656_v35  ;;  %1701 = vmatpush.msrb.mxu0 %v1656_v35 }
 0x330   :  { %1840 = vmatpush.msrb.mxu3 %v1672_v36  ;;  %1742 = vmatpush.msrb.mxu1 %v1672_v36 }
 0x331   :  { %1800 = vmatpush.msrb.mxu2 %v1655_v50  ;;  %1702 = vmatpush.msrb.mxu0 %v1655_v50 }
 0x332   :  { %1841 = vmatpush.msrb.mxu3 %v1671_v38  ;;  %1743 = vmatpush.msrb.mxu1 %v1671_v38 }
 0x333   :  { %1576 = vmatmul.f32.gmra.mxu2 %v1517_v53  ;;  %1617 = vmatmul.f32.gmra.mxu3 %v1517_v53 }
 0x33b   :  { %1579 = vmatmul.f32.gmra.mxu2 %v1518_v17  ;;  %1620 = vmatmul.f32.gmra.mxu3 %v1518_v17 }
 0x343   :  { %1582 = vmatmul.f32.gmra.mxu2 %v1519_v18  ;;  %1623 = vmatmul.f32.gmra.mxu3 %v1519_v18 }
 0x34b   :  { %1585 = vmatmul.f32.gmra.mxu2 %v1520_v54  ;;  %1626 = vmatmul.f32.gmra.mxu3 %v1520_v54 }
 0x353   :  { %1588 = vmatmul.f32.gmra.mxu2 %v1521_v55  ;;  %1629 = vmatmul.f32.gmra.mxu3 %v1521_v55 }
 0x35b   :  { %1591 = vmatmul.f32.gmra.mxu2 %v1522_v59  ;;  %1632 = vmatmul.f32.gmra.mxu3 %v1522_v59 }
 0x363   :  { %1594 = vmatmul.f32.gmra.mxu2 %v1523_v9  ;;  %1635 = vmatmul.f32.gmra.mxu3 %v1523_v9 }
 0x36d   :  { %v3866_v14 = vpop.f32.mrf.mxu2  ;;  %v3868_v15 = vpop.f32.mrf.mxu3 }
 0x36f   :  { %v1451_v43 = vpop.f32.mrf.mxu0  ;;  %v1492_v44 = vpop.f32.mrf.mxu1 }
 0x370   :  { %v1452_v51 = vadd.f32 %v1451_v43, %v3866_v14  ;;  %v1493_v52 = vadd.f32 %v1492_v44, %v3868_v15 }
 0x376   :  { %v3882_v11 = vpop.f32.mrf.mxu2  ;;  %v3884_v12 = vpop.f32.mrf.mxu3 }
 0x377   :  { %v1454_v57 = vpop.f32.mrf.mxu0  ;;  %v1495_v58 = vpop.f32.mrf.mxu1 }
 0x378   :  { %v1455_v61 = vadd.f32 %v1454_v57, %v3882_v11  ;;  %v1496_v62 = vadd.f32 %v1495_v58, %v3884_v12 }
 0x37e   :  { %v3898_v26 = vpop.f32.mrf.mxu2  ;;  %v3900_v27 = vpop.f32.mrf.mxu3 }
 0x37f   :  { %v1457_v53 = vpop.f32.mrf.mxu0  ;;  %v1498_v17 = vpop.f32.mrf.mxu1 }
 0x380   :  { %v1458_v13 = vadd.f32 %v1457_v53, %v3898_v26  ;;  %v1499_v63 = vadd.f32 %v1498_v17, %v3900_v27 }
 0x386   :  { %v3914_v40 = vpop.f32.mrf.mxu2  ;;  %v3916_v28 = vpop.f32.mrf.mxu3 }
 0x387   :  { %v1460_v5 = vpop.f32.mrf.mxu0  ;;  %v1501_v6 = vpop.f32.mrf.mxu1 }
 0x388   :  { %v1461_v12 = vadd.f32 %v1460_v5, %v3914_v40  ;;  %v1502_v4 = vadd.f32 %v1501_v6, %v3916_v28 }
 0x38e   :  { %v3936_v37 = vpop.f32.mrf.mxu2  ;;  %v3938_v49 = vpop.f32.mrf.mxu3 }
 0x38f   :  { %v1463_v3 = vpop.f32.mrf.mxu0  ;;  %v1504_v11 = vpop.f32.mrf.mxu1 }
 0x390   :  { %v1464_v30 = vadd.f32 %v1463_v3, %v3936_v37  ;;  %v1505_v24 = vadd.f32 %v1504_v11, %v3938_v49 }
 0x396   :  { %v3946_v41 = vpop.f32.mrf.mxu2  ;;  %v3948_v42 = vpop.f32.mrf.mxu3 }
 0x397   :  { %v1466_v39 = vpop.f32.mrf.mxu0  ;;  %v1507_v40 = vpop.f32.mrf.mxu1 }
 0x398   :  { %v1467_v36 = vadd.f32 %v1466_v39, %v3946_v41  ;;  %v1508_v37 = vadd.f32 %v1507_v40, %v3948_v42 }
 0x39e   :  { %v3950_v45 = vpop.f32.mrf.mxu2  ;;  %v3952_v46 = vpop.f32.mrf.mxu3 }
 0x39f   :  { %v1469_v44 = vpop.f32.mrf.mxu0  ;;  %v1510_v57 = vpop.f32.mrf.mxu1 }
 0x3a0   :  { %v1470_v42 = vadd.f32 %v1469_v44, %v3950_v45 }
 0x3a6   :  { %v3954_v47 = vpop.f32.mrf.mxu2  ;;  %v3956_v48 = vpop.f32.mrf.mxu3 }
 0x3a7   :  { %v1513_v45 = vpop.f32.mrf.mxu1 }
 0x3ae   :  { %v1574_v7 = vpop.f32.mrf.mxu2  ;;  %v1615_v8 = vpop.f32.mrf.mxu3 }
 0x3af   :  { %v3960_v18 = vadd.f32 %v1574_v7, %v1452_v51  ;;  %v3962_v54 = vadd.f32 %v1615_v8, %v1493_v52  ;;  %v1511_v51 = vadd.f32 %v1510_v57, %v3952_v46 }
 0x3b1   :  { %v1769_v55 = vmul.f32 %v3960_v18, %v3960_v18  ;;  %v1770_v56 = vmul.f32 %v3962_v54, %v3962_v54  ;;  %1703 = vmatmul.f32.vlgmr.msrb.gmra.mxu0 %v3960_v18  ;;  %1744 = vmatmul.f32.vlgmr.msrb.gmra.mxu1 %v3962_v54 }
 0x3b3   :  { %1801 = vmatmul.f32.vlgmr.msrb.gmra.mxu2 %v1769_v55  ;;  %1842 = vmatmul.f32.vlgmr.msrb.gmra.mxu3 %v1770_v56  ;;  %v1472_v56 = vpop.f32.mrf.mxu0 }
 0x3b4   :  { %v1473_v46 = vadd.f32 %v1472_v56, %v3954_v47 }
 0x3b6   :  { %v1577_v1 = vpop.f32.mrf.mxu2  ;;  %v1618_v59 = vpop.f32.mrf.mxu3 }
 0x3b7   :  { %v3972_v60 = vadd.f32 %v1577_v1, %v1455_v61  ;;  %v3974_v2 = vadd.f32 %v1618_v59, %v1496_v62  ;;  %v1514_v61 = vadd.f32 %v1513_v45, %v3956_v48 }
 0x3b9   :  { %1706 = vmatmul.f32.gmra.mxu0 %v3972_v60  ;;  %1747 = vmatmul.f32.gmra.mxu1 %v3974_v2  ;;  %v1771_v9 = vmul.f32 %v3972_v60, %v3972_v60  ;;  %v1772_v10 = vmul.f32 %v3974_v2, %v3974_v2 }
 0x3bb   :  { %1804 = vmatmul.f32.gmra.mxu2 %v1771_v9  ;;  %1845 = vmatmul.f32.gmra.mxu3 %v1772_v10 }
 0x3be   :  { %v1580_v0 = vpop.f32.mrf.mxu2  ;;  %v1621_v14 = vpop.f32.mrf.mxu3 }
 0x3bf   :  { %v3984_v15 = vadd.f32 %v1580_v0, %v1458_v13  ;;  %v3986_v16 = vadd.f32 %v1621_v14, %v1499_v63  ;;  %v1926_v14 = vld [vmem:[%s4322_s4] sm:$0xff] }
 0x3c0   :  { %1946 = vmatpush.msra.mxu0 %v1926_v14 }
 0x3c1   :  { %1709 = vmatmul.f32.gmra.mxu0 %v3984_v15  ;;  %1750 = vmatmul.f32.gmra.mxu1 %v3986_v16  ;;  %v1773_v21 = vmul.f32 %v3984_v15, %v3984_v15  ;;  %v1774_v22 = vmul.f32 %v3986_v16, %v3986_v16 }
 0x3c2   :  { %1989 = vmatpush.msrb.mxu0 %v1926_v14 }
 0x3c3   :  { %1807 = vmatmul.f32.gmra.mxu2 %v1773_v21  ;;  %1848 = vmatmul.f32.gmra.mxu3 %v1774_v22  ;;  %v1927_v21 = vld [vmem:[%s4322_s4 + $0x8] sm:$0xff] }
 0x3c4   :  { %1966 = vmatpush.msra.mxu1 %v1927_v21 }
 0x3c6   :  { %v1583_v25 = vpop.f32.mrf.mxu2  ;;  %v1624_v19 = vpop.f32.mrf.mxu3  ;;  %2009 = vmatpush.msrb.mxu1 %v1927_v21 }
 0x3c7   :  { %v3996_v20 = vadd.f32 %v1583_v25, %v1461_v12  ;;  %v3998_v26 = vadd.f32 %v1624_v19, %v1502_v4 }
 0x3c9   :  { %1712 = vmatmul.f32.gmra.mxu0 %v3996_v20  ;;  %1753 = vmatmul.f32.gmra.mxu1 %v3998_v26  ;;  %v1775_v27 = vmul.f32 %v3996_v20, %v3996_v20  ;;  %v1776_v29 = vmul.f32 %v3998_v26, %v3998_v26 }
 0x3cb   :  { %1810 = vmatmul.f32.gmra.mxu2 %v1775_v27  ;;  %1851 = vmatmul.f32.gmra.mxu3 %v1776_v29 }
 0x3ce   :  { %v1586_v28 = vpop.f32.mrf.mxu2  ;;  %v1627_v31 = vpop.f32.mrf.mxu3 }
 0x3cf   :  { %v4008_v32 = vadd.f32 %v1586_v28, %v1464_v30  ;;  %v4010_v33 = vadd.f32 %v1627_v31, %v1505_v24 }
 0x3d1   :  { %1715 = vmatmul.f32.gmra.mxu0 %v4008_v32  ;;  %1756 = vmatmul.f32.gmra.mxu1 %v4010_v33  ;;  %v1777_v34 = vmul.f32 %v4008_v32, %v4008_v32  ;;  %v1778_v35 = vmul.f32 %v4010_v33, %v4010_v33 }
 0x3d3   :  { %1813 = vmatmul.f32.gmra.mxu2 %v1777_v34  ;;  %1854 = vmatmul.f32.gmra.mxu3 %v1778_v35 }
 0x3d6   :  { %v1589_v49 = vpop.f32.mrf.mxu2  ;;  %v1630_v50 = vpop.f32.mrf.mxu3 }
 0x3d7   :  { %v4020_v38 = vadd.f32 %v1589_v49, %v1467_v36  ;;  %v4022_v43 = vadd.f32 %v1630_v50, %v1508_v37 }
 0x3d9   :  { %1718 = vmatmul.f32.gmra.mxu0 %v4020_v38  ;;  %1759 = vmatmul.f32.gmra.mxu1 %v4022_v43  ;;  %v1779_v58 = vmul.f32 %v4020_v38, %v4020_v38  ;;  %v1780_v41 = vmul.f32 %v4022_v43, %v4022_v43 }
 0x3db   :  { %1816 = vmatmul.f32.gmra.mxu2 %v1779_v58  ;;  %1857 = vmatmul.f32.gmra.mxu3 %v1780_v41 }
 0x3de   :  { %v1592_v52 = vpop.f32.mrf.mxu2  ;;  %v1633_v7 = vpop.f32.mrf.mxu3 }
 0x3df   :  { %v4032_v8 = vadd.f32 %v1592_v52, %v1470_v42  ;;  %v4034_v53 = vadd.f32 %v1633_v7, %v1511_v51 }
 0x3e1   :  { %1721 = vmatmul.f32.gmra.mxu0 %v4032_v8  ;;  %1762 = vmatmul.f32.gmra.mxu1 %v4034_v53  ;;  %v1781_v17 = vmul.f32 %v4032_v8, %v4032_v8  ;;  %v1782_v55 = vmul.f32 %v4034_v53, %v4034_v53 }
 0x3e3   :  { %1819 = vmatmul.f32.gmra.mxu2 %v1781_v17  ;;  %1860 = vmatmul.f32.gmra.mxu3 %v1782_v55 }
 0x3e6   :  { %v1595_v62 = vpop.f32.mrf.mxu2  ;;  %v1636_v1 = vpop.f32.mrf.mxu3 }
 0x3e7   :  { %v4044_v59 = vadd.f32 %v1595_v62, %v1473_v46  ;;  %v4046_v5 = vadd.f32 %v1636_v1, %v1514_v61 }
 0x3e9   :  { %1724 = vmatmul.f32.gmra.mxu0 %v4044_v59  ;;  %1765 = vmatmul.f32.gmra.mxu1 %v4046_v5  ;;  %v1783_v6 = vmul.f32 %v4044_v59, %v4044_v59  ;;  %v1784_v9 = vmul.f32 %v4046_v5, %v4046_v5 }
 0x3eb   :  { %1822 = vmatmul.f32.gmra.mxu2 %v1783_v6  ;;  %1863 = vmatmul.f32.gmra.mxu3 %v1784_v9 }
 0x42e   :  { %v1704_v47 = vpop.f32.mrf.mxu0  ;;  %v1745_v48 = vpop.f32.mrf.mxu1 }
 0x42f   :  { %v1746_v36 = vadd.f32 %v1745_v48, %v1704_v47 }
 0x431   :  { %v1867_v44 = vsel %vm674_vm2, %v1746_v36, 0.0 }
 0x436   :  { %v1707_v10 = vpop.f32.mrf.mxu0  ;;  %v1748_v13 = vpop.f32.mrf.mxu1 }
 0x437   :  { %v1802_v63 = vpop.f32.mrf.mxu2  ;;  %v1843_v0 = vpop.f32.mrf.mxu3  ;;  %v1749_v31 = vadd.f32 %v1748_v13, %v1707_v10 }
 0x438   :  { %v1844_v62 = vadd.f32 %v1843_v0, %v1802_v63 }
 0x439   :  { %v1868_v49 = vsel %vm674_vm2, %v1749_v31, 0.0 }
 0x43a   :  { %v1869_v41 = vadd.f32 %v1868_v49, %v1867_v44  ;;  %v1889_v14 = vsel %vm674_vm2, %v1844_v62, 0.0 }
 0x43e   :  { %v1710_v22 = vpop.f32.mrf.mxu0  ;;  %v1751_v3 = vpop.f32.mrf.mxu1 }
 0x43f   :  { %v1805_v11 = vpop.f32.mrf.mxu2  ;;  %v1846_v12 = vpop.f32.mrf.mxu3  ;;  %v1752_v37 = vadd.f32 %v1751_v3, %v1710_v22 }
 0x440   :  { %v1847_v45 = vadd.f32 %v1846_v12, %v1805_v11 }
 0x441   :  { %v1870_v57 = vsel %vm674_vm2, %v1752_v37, 0.0 }
 0x442   :  { %v1871_v56 = vadd.f32 %v1870_v57, %v1869_v41  ;;  %v1890_v47 = vsel %vm674_vm2, %v1847_v45, 0.0 }
 0x446   :  { %v1713_v4 = vpop.f32.mrf.mxu0  ;;  %v1754_v25 = vpop.f32.mrf.mxu1 }
 0x447   :  { %v1808_v19 = vpop.f32.mrf.mxu2  ;;  %v1849_v27 = vpop.f32.mrf.mxu3  ;;  %v1755_v50 = vadd.f32 %v1754_v25, %v1713_v4  ;;  %v1891_v4 = vadd.f32 %v1890_v47, %v1889_v14  ;;  %v2194_v14 = vld [vmem:[%s4323_s6 + $0xf0] sm:$0xff] }
 0x448   :  { %v1850_v6 = vadd.f32 %v1849_v27, %v1808_v19 }
 0x449   :  { %v1872_v52 = vsel %vm674_vm2, %v1755_v50, 0.0 }
 0x44a   :  { %v1873_v1 = vadd.f32 %v1872_v52, %v1871_v56  ;;  %v1892_v21 = vsel %vm674_vm2, %v1850_v6, 0.0 }
 0x44e   :  { %v1716_v29 = vpop.f32.mrf.mxu0  ;;  %v1757_v30 = vpop.f32.mrf.mxu1 }
 0x44f   :  { %v1811_v24 = vpop.f32.mrf.mxu2  ;;  %v1852_v39 = vpop.f32.mrf.mxu3  ;;  %v1758_v58 = vadd.f32 %v1757_v30, %v1716_v29  ;;  %v1893_v30 = vadd.f32 %v1892_v21, %v1891_v4  ;;  %v2175_v4 = vld [vmem:[%s4323_s6 + $0x58] sm:$0xff] }
 0x450   :  { %v1853_v10 = vadd.f32 %v1852_v39, %v1811_v24 }
 0x451   :  { %v1874_v46 = vsel %vm674_vm2, %v1758_v58, 0.0 }
 0x452   :  { %v1875_v48 = vadd.f32 %v1874_v46, %v1873_v1  ;;  %v1894_v19 = vsel %vm674_vm2, %v1853_v10, 0.0  ;;  %v2195_v10 = vld [vmem:[%s4323_s6 + $0xf8] sm:$0xff] }
 0x453   :  { %v1895_v31 = vadd.f32 %v1894_v19, %v1893_v30  ;;  %2237 = vmatpush.msra.mxu3 %v2195_v10  ;;  %v2173_v19 = vld [vmem:[%s4323_s6 + $0x48] sm:$0xff]  ;;  %v2172_v30 = vld [vmem:[%s4323_s6 + $0x40] sm:$0xff] }
 0x454   :  { %v2059_v10 = vld [vmem:[%s4324_s5 + $0x48] sm:$0xff] }
 0x455   :  { %2238 = vmatpush.msra.mxu3 %v2194_v14  ;;  %v2058_v14 = vld [vmem:[%s4324_s5 + $0x40] sm:$0xff] }
 0x456   :  { %v1719_v40 = vpop.f32.mrf.mxu0  ;;  %v1760_v28 = vpop.f32.mrf.mxu1 }
 0x457   :  { %v1814_v34 = vpop.f32.mrf.mxu2  ;;  %v1855_v35 = vpop.f32.mrf.mxu3  ;;  %v1761_v7 = vadd.f32 %v1760_v28, %v1719_v40 }
 0x458   :  { %v1856_v3 = vadd.f32 %v1855_v35, %v1814_v34 }
 0x459   :  { %v1876_v9 = vsel %vm674_vm2, %v1761_v7, 0.0 }
 0x45a   :  { %v1877_v22 = vadd.f32 %v1876_v9, %v1875_v48  ;;  %v1896_v39 = vsel %vm674_vm2, %v1856_v3, 0.0  ;;  %v2179_v48 = vld [vmem:[%s4323_s6 + $0x78] sm:$0xff] }
 0x45b   :  { %v1897_v36 = vadd.f32 %v1896_v39, %v1895_v31  ;;  %2196 = vmatpush.msra.mxu2 %v2179_v48  ;;  %v2076_v48 = vld [vmem:[%s4324_s5 + $0xd0] sm:$0xff] }
 0x45e   :  { %v1722_v42 = vpop.f32.mrf.mxu0  ;;  %v1763_v51 = vpop.f32.mrf.mxu1 }
 0x45f   :  { %v1817_v17 = vpop.f32.mrf.mxu2  ;;  %v1858_v55 = vpop.f32.mrf.mxu3  ;;  %v1764_v61 = vadd.f32 %v1763_v51, %v1722_v42 }
 0x460   :  { %v1859_v29 = vadd.f32 %v1858_v55, %v1817_v17 }
 0x461   :  { %v1878_v13 = vsel %vm674_vm2, %v1764_v61, 0.0 }
 0x462   :  { %v1879_v27 = vadd.f32 %v1878_v13, %v1877_v22  ;;  %v1898_v34 = vsel %vm674_vm2, %v1859_v29, 0.0  ;;  %v2178_v13 = vld [vmem:[%s4323_s6 + $0x70] sm:$0xff]  ;;  %v2193_v22 = vld [vmem:[%s4323_s6 + $0xe8] sm:$0xff] }
 0x463   :  { %v1899_v50 = vadd.f32 %v1898_v34, %v1897_v36  ;;  %2197 = vmatpush.msra.mxu2 %v2178_v13  ;;  %2239 = vmatpush.msra.mxu3 %v2193_v22  ;;  %v2170_v34 = vld [vmem:[%s4323_s6 + $0x30] sm:$0xff]  ;;  %v2075_v13 = vld [vmem:[%s4324_s5 + $0xc8] sm:$0xff]  ;;  %v2073_v22 = vld [vmem:[%s4324_s5 + $0xb8] sm:$0xff] }
 0x466   :  { %v1725_v11 = vpop.f32.mrf.mxu0  ;;  %v1766_v12 = vpop.f32.mrf.mxu1 }
 0x467   :  { %v1767_v63 = vadd.f32 %v1766_v12, %v1725_v11  ;;  %v1820_v0 = vpop.f32.mrf.mxu2  ;;  %v1861_v25 = vpop.f32.mrf.mxu3  ;;  %v2176_v11 = vld [vmem:[%s4323_s6 + $0x60] sm:$0xff] }
 0x468   :  { %v1862_v28 = vadd.f32 %v1861_v25, %v1820_v0  ;;  %v2192_v12 = vld [vmem:[%s4323_s6 + $0xe0] sm:$0xff]  ;;  %v2174_v0 = vld [vmem:[%s4323_s6 + $0x50] sm:$0xff] }
 0x469   :  { %v1880_v24 = vsel %vm674_vm2, %v1767_v63, 0.0  ;;  %v2191_v63 = vld [vmem:[%s4323_s6 + $0xd8] sm:$0xff]  ;;  %2240 = vmatpush.msra.mxu3 %v2192_v12  ;;  %v2190_v25 = vld [vmem:[%s4323_s6 + $0xd0] sm:$0xff] }
 0x46a   :  { %v1881_v40 = vadd.f32 %v1880_v24, %v1879_v27  ;;  %v1900_v49 = vsel %vm674_vm2, %v1862_v28, 0.0  ;;  %v2189_v27 = vld [vmem:[%s4323_s6 + $0xc8] sm:$0xff]  ;;  %v2188_v24 = vld [vmem:[%s4323_s6 + $0xc0] sm:$0xff]  ;;  %v2187_v28 = vld [vmem:[%s4323_s6 + $0xb8] sm:$0xff] }
 0x46b   :  { %v1901_v42 = vadd.f32 %v1900_v49, %v1899_v50  ;;  %2241 = vmatpush.msra.mxu3 %v2191_v63  ;;  %v2185_v49 = vld [vmem:[%s4323_s6 + $0xa8] sm:$0xff]  ;;  %v2166_v12 = vld [vmem:[%s4323_s6 + $0x10] sm:$0xff] }
 0x46c   :  { %v1882_v35 = vrot.slane %v1881_v40, 4  ;;  %v2055_v63 = vld [vmem:[%s4324_s5 + $0x28] sm:$0xff] }
 0x46d   :  { %2242 = vmatpush.msra.mxu3 %v2190_v25  ;;  %v2054_v25 = vld [vmem:[%s4324_s5 + $0x20] sm:$0xff] }
 0x46e   :  { %v1883_v37 = vadd.f32 %v1882_v35, %v1881_v40  ;;  %v2171_v40 = vld [vmem:[%s4323_s6 + $0x38] sm:$0xff]  ;;  %v2186_v35 = vld [vmem:[%s4323_s6 + $0xb0] sm:$0xff] }
 0x46f   :  { %v1823_v44 = vpop.f32.mrf.mxu2  ;;  %v1864_v57 = vpop.f32.mrf.mxu3  ;;  %2243 = vmatpush.msra.mxu3 %v2189_v27  ;;  %v2165_v27 = vld [vmem:[%s4323_s6 + $0x8] sm:$0xff] }
 0x470   :  { %v1884_v58 = vrot.slane %v1883_v37, 2  ;;  %v1865_v41 = vadd.f32 %v1864_v57, %v1823_v44  ;;  %v2168_v44 = vld [vmem:[%s4323_s6 + $0x20] sm:$0xff] }
 0x471   :  { %2244 = vmatpush.msra.mxu3 %v2188_v24  ;;  %v2184_v57 = vld [vmem:[%s4323_s6 + $0xa0] sm:$0xff]  ;;  %v2069_v24 = vld [vmem:[%s4324_s5 + $0x98] sm:$0xff] }
 0x472   :  { %v1885_v51 = vadd.f32 %v1884_v58, %v1883_v37  ;;  %v1902_v52 = vsel %vm674_vm2, %v1865_v41, 0.0  ;;  %v2169_v37 = vld [vmem:[%s4323_s6 + $0x28] sm:$0xff]  ;;  %v2065_v41 = vld [vmem:[%s4324_s5 + $0x78] sm:$0xff] }
 0x473   :  { %v1903_v7 = vadd.f32 %v1902_v52, %v1901_v42  ;;  %2245 = vmatpush.msra.mxu3 %v2187_v28  ;;  %v2081_v42 = vld [vmem:[%s4324_s5 + $0xf8] sm:$0xff]  ;;  %v2164_v28 = vld [vmem:[%s4323_s6] sm:$0xff] }
 0x474   :  { %v1886_v17 = vrot.slane %v1885_v51, 1  ;;  %v2167_v52 = vld [vmem:[%s4323_s6 + $0x18] sm:$0xff] }
 0x475   :  { %v1904_v55 = vrot.slane %v1903_v7, 4  ;;  %2246 = vmatpush.msra.mxu3 %v2186_v35  ;;  %v2067_v35 = vld [vmem:[%s4324_s5 + $0x88] sm:$0xff] }
 0x476   :  { %v1887_v45 = vadd.f32 %v1886_v17, %v1885_v51  ;;  %v2064_v17 = vld [vmem:[%s4324_s5 + $0x70] sm:$0xff] }
 0x477   :  { %v1905_v56 = vadd.f32 %v1904_v55, %v1903_v7  ;;  %2247 = vmatpush.msra.mxu3 %v2185_v49  ;;  %v2183_v7 = vld [vmem:[%s4323_s6 + $0x98] sm:$0xff]  ;;  %v2080_v55 = vld [vmem:[%s4324_s5 + $0xf0] sm:$0xff] }
 0x478   :  { %v4077_v62 = vmul.f32 %v1887_v45, %v3232_v23  ;;  %v2079_v45 = vld [vmem:[%s4324_s5 + $0xe8] sm:$0xff] }
 0x479   :  { %v1906_v46 = vrot.slane %v1905_v56, 2  ;;  %2248 = vmatpush.msra.mxu3 %v2184_v57 }
 0x47a   :  { %v1911_v9 = vmul.f32 %v4077_v62, %v4077_v62 }
 0x47b   :  { %v1907_v61 = vadd.f32 %v1906_v46, %v1905_v56  ;;  %v2063_v56 = vld [vmem:[%s4324_s5 + $0x68] sm:$0xff]  ;;  %2249 = vmatpush.msra.mxu3 %v2183_v7  ;;  %v1924_v46 = vsub.f32 0.0, %v4077_v62  ;;  %v2060_v62 = vld [vmem:[%s4324_s5 + $0x50] sm:$0xff] }
 0x47d   :  { %v1908_v1 = vrot.slane %v1907_v61, 1 }
 0x47f   :  { %v1909_v6 = vadd.f32 %v1908_v1, %v1907_v61  ;;  %v2062_v61 = vld [vmem:[%s4324_s5 + $0x60] sm:$0xff] }
 0x480   :  { %v2078_v1 = vld [vmem:[%s4324_s5 + $0xe0] sm:$0xff] }
 0x481   :  { %v1910_v47 = vmul.f32 %v1909_v6, %v3232_v23  ;;  %v2177_v23 = vld [vmem:[%s4323_s6 + $0x68] sm:$0xff] }
 0x482   :  { %2198 = vmatpush.msra.mxu2 %v2177_v23  ;;  %v2057_v23 = vld [vmem:[%s4324_s5 + $0x38] sm:$0xff] }
 0x483   :  { %v1912_v21 = vsub.f32 %v1910_v47, %v1911_v9  ;;  %v2061_v9 = vld [vmem:[%s4324_s5 + $0x58] sm:$0xff] }
 0x484   :  { %2199 = vmatpush.msra.mxu2 %v2176_v11  ;;  %v2077_v47 = vld [vmem:[%s4324_s5 + $0xd8] sm:$0xff]  ;;  %v2072_v11 = vld [vmem:[%s4324_s5 + $0xb0] sm:$0xff] }
 0x485   :  { %v1913_v3 = vadd.f32 1e-05, %v1912_v21  ;;  %v2074_v21 = vld [vmem:[%s4324_s5 + $0xc0] sm:$0xff] }
 0x486   :  { %2200 = vmatpush.msra.mxu2 %v2175_v4  ;;  %v2182_v4 = vld [vmem:[%s4323_s6 + $0x90] sm:$0xff] }
 0x487   :  { %2656 = vrsqrt.f32 %v1913_v3  ;;  %vm1920_vm10 = vweird.f32 %v1913_v3  ;;  %2250 = vmatpush.msra.mxu3 %v2182_v4 }
 0x488   :  { %2201 = vmatpush.msra.mxu2 %v2174_v0  ;;  %v2071_v0 = vld [vmem:[%s4324_s5 + $0xa8] sm:$0xff] }
 0x48a   :  { %2202 = vmatpush.msra.mxu2 %v2173_v19  ;;  %v2070_v19 = vld [vmem:[%s4324_s5 + $0xa0] sm:$0xff] }
 0x48c   :  { %2203 = vmatpush.msra.mxu2 %v2172_v30  ;;  %v2053_v30 = vld [vmem:[%s4324_s5 + $0x18] sm:$0xff] }
 0x48d   :  { %v2657_v29 = vpop.eup %2656 }
 0x48e   :  { %v1915_v39 = vmul.f32 %v2657_v29, %v1913_v3  ;;  %2204 = vmatpush.msra.mxu2 %v2171_v40  ;;  %vm1921_vm9 = vweird.f32 %v2657_v29  ;;  %v2056_v3 = vld [vmem:[%s4324_s5 + $0x30] sm:$0xff] }
 0x48f   :  { %vm1922_vm11 = vmor %vm1920_vm10, %vm1921_vm9  ;;  %v2068_v40 = vld [vmem:[%s4324_s5 + $0x90] sm:$0xff] }
 0x490   :  { %v1916_v31 = vmul.f32 %v2657_v29, %v1915_v39  ;;  %2205 = vmatpush.msra.mxu2 %v2170_v34  ;;  %v2052_v39 = vld [vmem:[%s4324_s5 + $0x10] sm:$0xff]  ;;  %v2051_v34 = vld [vmem:[%s4324_s5 + $0x8] sm:$0xff] }
 0x492   :  { %v1917_v36 = vmul.f32 0.5, %v1916_v31  ;;  %2206 = vmatpush.msra.mxu2 %v2169_v37  ;;  %v2180_v31 = vld [vmem:[%s4323_s6 + $0x80] sm:$0xff] }
 0x493   :  { %v2066_v37 = vld [vmem:[%s4324_s5 + $0x80] sm:$0xff] }
 0x494   :  { %v1918_v50 = vsub.f32 1.5, %v1917_v36  ;;  %2207 = vmatpush.msra.mxu2 %v2168_v44  ;;  %v2050_v36 = vld [vmem:[%s4324_s5] sm:$0xff] }
 0x496   :  { %v1919_v58 = vmul.f32 %v2657_v29, %v1918_v50  ;;  %2208 = vmatpush.msra.mxu2 %v2167_v52 }
 0x498   :  { %v1923_v51 = vsel %vm1922_vm11, %v2657_v29, %v1919_v58  ;;  %2209 = vmatpush.msra.mxu2 %v2166_v12  ;;  %v2181_v29 = vld [vmem:[%s4323_s6 + $0x88] sm:$0xff] }
 0x499   :  { %2606 = vmatmul.msk.f32.vlgmr.msra.gmra.mxu0 %vm674_vm2, %v1923_v51  ;;  %2607 = vmatmul.msk.f32.vlgmr.msra.gmra.mxu1 %vm674_vm2, %v1923_v51  ;;  %v1925_v6 = vmul.f32 %v1924_v46, %v1923_v51 }
 0x49a   :  { %2082 = vmatpush.msra.mxu0 %v2065_v41  ;;  %2123 = vmatpush.msra.mxu1 %v2081_v42 }
 0x49b   :  { %2210 = vmatpush.msra.mxu2 %v2165_v27  ;;  %2251 = vmatpush.msra.mxu3 %v2181_v29 }
 0x49c   :  { %2083 = vmatpush.msra.mxu0 %v2064_v17  ;;  %2124 = vmatpush.msra.mxu1 %v2080_v55 }
 0x49d   :  { %2211 = vmatpush.msra.mxu2 %v2164_v28  ;;  %2252 = vmatpush.msra.mxu3 %v2180_v31 }
 0x49e   :  { %2084 = vmatpush.msra.mxu0 %v2063_v56  ;;  %2125 = vmatpush.msra.mxu1 %v2079_v45 }
 0x4a0   :  { %2085 = vmatpush.msra.mxu0 %v2062_v61  ;;  %2126 = vmatpush.msra.mxu1 %v2078_v1 }
 0x4a1   :  { %2608 = vmatmul.msk.f32.vlgmr.msrb.gmra.mxu0 %vm674_vm2, %v1925_v6  ;;  %2609 = vmatmul.msk.f32.vlgmr.msrb.gmra.mxu1 %vm674_vm2, %v1925_v6 }
 0x4a2   :  { %2086 = vmatpush.msra.mxu0 %v2061_v9  ;;  %2127 = vmatpush.msra.mxu1 %v2077_v47 }
 0x4a4   :  { %2087 = vmatpush.msra.mxu0 %v2060_v62  ;;  %2128 = vmatpush.msra.mxu1 %v2076_v48 }
 0x4a6   :  { %2088 = vmatpush.msra.mxu0 %v2059_v10  ;;  %2129 = vmatpush.msra.mxu1 %v2075_v13 }
 0x4a8   :  { %2089 = vmatpush.msra.mxu0 %v2058_v14  ;;  %2130 = vmatpush.msra.mxu1 %v2074_v21 }
 0x4aa   :  { %2090 = vmatpush.msra.mxu0 %v2057_v23  ;;  %2131 = vmatpush.msra.mxu1 %v2073_v22 }
 0x4ac   :  { %2091 = vmatpush.msra.mxu0 %v2056_v3  ;;  %2132 = vmatpush.msra.mxu1 %v2072_v11 }
 0x4ae   :  { %2092 = vmatpush.msra.mxu0 %v2055_v63  ;;  %2133 = vmatpush.msra.mxu1 %v2071_v0 }
 0x4b0   :  { %2093 = vmatpush.msra.mxu0 %v2054_v25  ;;  %2134 = vmatpush.msra.mxu1 %v2070_v19 }
 0x4b2   :  { %2094 = vmatpush.msra.mxu0 %v2053_v30  ;;  %2135 = vmatpush.msra.mxu1 %v2069_v24 }
 0x4b4   :  { %2095 = vmatpush.msra.mxu0 %v2052_v39  ;;  %2136 = vmatpush.msra.mxu1 %v2068_v40 }
 0x4b6   :  { %2096 = vmatpush.msra.mxu0 %v2051_v34  ;;  %2137 = vmatpush.msra.mxu1 %v2067_v35 }
 0x4b8   :  { %2097 = vmatpush.msra.mxu0 %v2050_v36  ;;  %2138 = vmatpush.msra.mxu1 %v2066_v37 }
 0x516   :  { %v1948_v49 = vpop.f32.mrf.mxu0  ;;  %v1968_v50 = vpop.f32.mrf.mxu1 }
 0x517   :  { %v2014_v44 = vperm.slane %v1948_v49, 0  ;;  %v2015_v57 = vperm.slane %v1968_v50, 0 }
 0x519   :  { %v2016_v52 = vmul.f32 %v2014_v44, %v3960_v18  ;;  %v2017_v7 = vmul.f32 %v2015_v57, %v3962_v54  ;;  %v2018_v56 = vmul.f32 %v2014_v44, %v3972_v60  ;;  %v2019_v45 = vmul.f32 %v2015_v57, %v3974_v2 }
 0x51a   :  { %v2020_v18 = vmul.f32 %v2014_v44, %v3984_v15  ;;  %v2021_v54 = vmul.f32 %v2015_v57, %v3986_v16  ;;  %v2022_v60 = vmul.f32 %v2014_v44, %v3996_v20  ;;  %v2023_v2 = vmul.f32 %v2015_v57, %v3998_v26 }
 0x51b   :  { %v2024_v15 = vmul.f32 %v2014_v44, %v4008_v32  ;;  %v2025_v16 = vmul.f32 %v2015_v57, %v4010_v33  ;;  %v2026_v20 = vmul.f32 %v2014_v44, %v4020_v38  ;;  %v2027_v26 = vmul.f32 %v2015_v57, %v4022_v43 }
 0x51c   :  { %v2028_v32 = vmul.f32 %v2014_v44, %v4032_v8  ;;  %v2029_v33 = vmul.f32 %v2015_v57, %v4034_v53  ;;  %v2030_v38 = vmul.f32 %v2014_v44, %v4044_v59  ;;  %v2031_v43 = vmul.f32 %v2015_v57, %v4046_v5 }
 0x51e   :  { %v1991_v58 = vpop.f32.mrf.mxu0  ;;  %v2011_v41 = vpop.f32.mrf.mxu1 }
 0x51f   :  { %v2032_v42 = vperm.slane %v1991_v58, 0  ;;  %v2033_v51 = vperm.slane %v2011_v41, 0 }
 0x521   :  { %v2034_v17 = vadd.f32 %v2032_v42, %v2016_v52  ;;  %v2035_v55 = vadd.f32 %v2033_v51, %v2017_v7  ;;  %v2036_v46 = vadd.f32 %v2032_v42, %v2018_v56  ;;  %v2037_v61 = vadd.f32 %v2033_v51, %v2019_v45 }
 0x522   :  { %v2038_v1 = vadd.f32 %v2032_v42, %v2020_v18  ;;  %v2039_v6 = vadd.f32 %v2033_v51, %v2021_v54  ;;  %v2040_v9 = vadd.f32 %v2032_v42, %v2022_v60  ;;  %v2041_v47 = vadd.f32 %v2033_v51, %v2023_v2 }
 0x523   :  { %2098 = vmatmul.f32.vlgmr.msra.gmra.mxu0 %v2034_v17  ;;  %2139 = vmatmul.f32.vlgmr.msra.gmra.mxu1 %v2035_v55  ;;  %v2042_v62 = vadd.f32 %v2032_v42, %v2024_v15  ;;  %v2043_v48 = vadd.f32 %v2033_v51, %v2025_v16  ;;  %v2044_v10 = vadd.f32 %v2032_v42, %v2026_v20 }
 0x524   :  { %2212 = vmatmul.f32.vlgmr.msra.gmra.mxu2 %v2034_v17  ;;  %2253 = vmatmul.f32.vlgmr.msra.gmra.mxu3 %v2035_v55  ;;  %v2045_v13 = vadd.f32 %v2033_v51, %v2027_v26  ;;  %v2046_v14 = vadd.f32 %v2032_v42, %v2028_v32  ;;  %v2047_v21 = vadd.f32 %v2033_v51, %v2029_v33 }
 0x525   :  { %v2048_v23 = vadd.f32 %v2032_v42, %v2030_v38  ;;  %v2049_v22 = vadd.f32 %v2033_v51, %v2031_v43 }
 0x52b   :  { %2101 = vmatmul.f32.gmra.mxu0 %v2036_v46  ;;  %2142 = vmatmul.f32.gmra.mxu1 %v2037_v61 }
 0x52c   :  { %2215 = vmatmul.f32.gmra.mxu2 %v2036_v46  ;;  %2256 = vmatmul.f32.gmra.mxu3 %v2037_v61 }
 0x533   :  { %2104 = vmatmul.f32.gmra.mxu0 %v2038_v1  ;;  %2145 = vmatmul.f32.gmra.mxu1 %v2039_v6 }
 0x534   :  { %2218 = vmatmul.f32.gmra.mxu2 %v2038_v1  ;;  %2259 = vmatmul.f32.gmra.mxu3 %v2039_v6 }
 0x53b   :  { %2107 = vmatmul.f32.gmra.mxu0 %v2040_v9  ;;  %2148 = vmatmul.f32.gmra.mxu1 %v2041_v47 }
 0x53c   :  { %2221 = vmatmul.f32.gmra.mxu2 %v2040_v9  ;;  %2262 = vmatmul.f32.gmra.mxu3 %v2041_v47 }
 0x543   :  { %2110 = vmatmul.f32.gmra.mxu0 %v2042_v62  ;;  %2151 = vmatmul.f32.gmra.mxu1 %v2043_v48 }
 0x544   :  { %2224 = vmatmul.f32.gmra.mxu2 %v2042_v62  ;;  %2265 = vmatmul.f32.gmra.mxu3 %v2043_v48 }
 0x54b   :  { %2113 = vmatmul.f32.gmra.mxu0 %v2044_v10  ;;  %2154 = vmatmul.f32.gmra.mxu1 %v2045_v13 }
 0x54c   :  { %2227 = vmatmul.f32.gmra.mxu2 %v2044_v10  ;;  %2268 = vmatmul.f32.gmra.mxu3 %v2045_v13 }
 0x553   :  { %2116 = vmatmul.f32.gmra.mxu0 %v2046_v14  ;;  %2157 = vmatmul.f32.gmra.mxu1 %v2047_v21 }
 0x554   :  { %2230 = vmatmul.f32.gmra.mxu2 %v2046_v14  ;;  %2271 = vmatmul.f32.gmra.mxu3 %v2047_v21 }
 0x55b   :  { %2119 = vmatmul.f32.gmra.mxu0 %v2048_v23  ;;  %2160 = vmatmul.f32.gmra.mxu1 %v2049_v22 }
 0x55c   :  { %2233 = vmatmul.f32.gmra.mxu2 %v2048_v23  ;;  %2274 = vmatmul.f32.gmra.mxu3 %v2049_v22 }
 0x5a0   :  { %v2099_v25 = vpop.f32.mrf.mxu0  ;;  %v2140_v19 = vpop.f32.mrf.mxu1 }
 0x5a1   :  { %v2141_v7 = vadd.f32 %v2140_v19, %v2099_v25 }
 0x5a7   :  { %v2213_v3 = vpop.f32.mrf.mxu2  ;;  %v2254_v8 = vpop.f32.mrf.mxu3 }
 0x5a8   :  { %v2255_v11 = vadd.f32 %v2254_v8, %v2213_v3  ;;  %v2102_v34 = vpop.f32.mrf.mxu0  ;;  %v2143_v35 = vpop.f32.mrf.mxu1 }
 0x5a9   :  { %v2144_v26 = vadd.f32 %v2143_v35, %v2102_v34 }
 0x5aa   :  { %v2610_v53 = vmul.f32 -1.442695, %v2255_v11 }
 0x5ac   :  { %2658 = vpow2.f32 %v2610_v53 }
 0x5af   :  { %v2216_v12 = vpop.f32.mrf.mxu2  ;;  %v2257_v4 = vpop.f32.mrf.mxu3 }
 0x5b0   :  { %v2258_v63 = vadd.f32 %v2257_v4, %v2216_v12  ;;  %v2105_v54 = vpop.f32.mrf.mxu0  ;;  %v2146_v1 = vpop.f32.mrf.mxu1 }
 0x5b1   :  { %v2147_v19 = vadd.f32 %v2146_v1, %v2105_v54 }
 0x5b2   :  { %v2659_v0 = vpop.eup %2658  ;;  %v2611_v59 = vmul.f32 -1.442695, %v2258_v63 }
 0x5b3   :  { %v2302_v27 = vadd.f32 1.0, %v2659_v0 }
 0x5b4   :  { %2660 = vpow2.f32 %v2611_v59 }
 0x5b5   :  { %2662 = vrcp.f32 %v2302_v27  ;;  %v2321_v37 = vand.u32 2147483648, %v2302_v27  ;;  %v2319_v57 = vand.u32 2147483647, %v2302_v27  ;;  %vm2315_vm12 = vweird.f32 %v2302_v27 }
 0x5b7   :  { %v2219_v5 = vpop.f32.mrf.mxu2  ;;  %v2260_v29 = vpop.f32.mrf.mxu3  ;;  %v2322_v17 = vor.u32 1.1754944e-38, %v2321_v37  ;;  %vm2320_vm14 = vcmp.eq.f32.partialorder %v2319_v57, 8.507059e+37 }
 0x5b8   :  { %v2261_v30 = vadd.f32 %v2260_v29, %v2219_v5  ;;  %v2108_v53 = vpop.f32.mrf.mxu0  ;;  %v2149_v12 = vpop.f32.mrf.mxu1 }
 0x5b9   :  { %v2150_v57 = vadd.f32 %v2149_v12, %v2108_v53 }
 0x5ba   :  { %v2661_v24 = vpop.eup %2660  ;;  %v2612_v39 = vmul.f32 -1.442695, %v2261_v30 }
 0x5bb   :  { %v2663_v40 = vpop.eup %2662  ;;  %v2303_v28 = vadd.f32 1.0, %v2661_v24 }
 0x5bc   :  { %v2311_v31 = vmul.f32 %v2663_v40, %v2302_v27  ;;  %2664 = vpow2.f32 %v2612_v39  ;;  %vm2316_vm2 = vweird.f32 %v2663_v40 }
 0x5bd   :  { %2666 = vrcp.f32 %v2303_v28  ;;  %vm2317_vm13 = vmor %vm2315_vm12, %vm2316_vm2  ;;  %v2336_v6 = vand.u32 2147483648, %v2303_v28  ;;  %v2334_v47 = vand.u32 2147483647, %v2303_v28  ;;  %vm2330_vm0 = vweird.f32 %v2303_v28 }
 0x5be   :  { %v2312_v36 = vsub.f32 1.0, %v2311_v31 }
 0x5bf   :  { %v2222_v49 = vpop.f32.mrf.mxu2  ;;  %v2263_v50 = vpop.f32.mrf.mxu3  ;;  %v2337_v10 = vor.u32 1.1754944e-38, %v2336_v6  ;;  %vm2335_vm3 = vcmp.eq.f32.partialorder %v2334_v47, 8.507059e+37 }
 0x5c0   :  { %v2313_v44 = vmul.f32 %v2663_v40, %v2312_v36  ;;  %v2264_v58 = vadd.f32 %v2263_v50, %v2222_v49 }
 0x5c2   :  { %v2665_v41 = vpop.eup %2664  ;;  %v2314_v42 = vadd.f32 %v2663_v40, %v2313_v44  ;;  %v2613_v51 = vmul.f32 -1.442695, %v2264_v58 }
 0x5c3   :  { %v2667_v52 = vpop.eup %2666  ;;  %v2304_v55 = vadd.f32 1.0, %v2665_v41  ;;  %v2111_v41 = vpop.f32.mrf.mxu0 }
 0x5c4   :  { %v2318_v56 = vsel %vm2317_vm13, %v2663_v40, %v2314_v42  ;;  %v2326_v45 = vmul.f32 %v2667_v52, %v2303_v28  ;;  %2668 = vpow2.f32 %v2613_v51  ;;  %vm2331_vm15 = vweird.f32 %v2667_v52  ;;  %v2152_v42 = vpop.f32.mrf.mxu1 }
 0x5c5   :  { %v2323_v46 = vsel %vm2320_vm14, %v2322_v17, %v2318_v56  ;;  %2670 = vrcp.f32 %v2304_v55  ;;  %vm2332_vm1 = vmor %vm2330_vm0, %vm2331_vm15  ;;  %v2351_v43 = vand.u32 2147483648, %v2304_v55  ;;  %v2349_v8 = vand.u32 2147483647, %v2304_v55 }
 0x5c6   :  { %v2430_v61 = vmul.f32 %v2323_v46, %v2141_v7  ;;  %v2327_v18 = vsub.f32 1.0, %v2326_v45  ;;  %vm2345_vm5 = vweird.f32 %v2304_v55  ;;  %v2153_v47 = vadd.f32 %v2152_v42, %v2111_v41 }
 0x5c7   :  { %v2225_v60 = vpop.f32.mrf.mxu2  ;;  %v2266_v2 = vpop.f32.mrf.mxu3  ;;  %v2352_v59 = vor.u32 1.1754944e-38, %v2351_v43  ;;  %vm2350_vm7 = vcmp.eq.f32.partialorder %v2349_v8, 8.507059e+37 }
 0x5c8   :  { %2438 = vst [vmem:[%s4326_s7] sm:$0xff] %v2430_v61  ;;  %v2328_v9 = vmul.f32 %v2667_v52, %v2327_v18  ;;  %v2267_v15 = vadd.f32 %v2266_v2, %v2225_v60 }
 0x5ca   :  { %v2669_v16 = vpop.eup %2668  ;;  %v2329_v62 = vadd.f32 %v2667_v52, %v2328_v9  ;;  %v2614_v48 = vmul.f32 -1.442695, %v2267_v15 }
 0x5cb   :  { %v2671_v20 = vpop.eup %2670  ;;  %v2305_v13 = vadd.f32 1.0, %v2669_v16 }
 0x5cc   :  { %v2333_v32 = vsel %vm2332_vm1, %v2667_v52, %v2329_v62  ;;  %v2341_v33 = vmul.f32 %v2671_v20, %v2304_v55  ;;  %2672 = vpow2.f32 %v2614_v48  ;;  %vm2346_vm4 = vweird.f32 %v2671_v20 }
 0x5cd   :  { %v2338_v14 = vsel %vm2335_vm3, %v2337_v10, %v2333_v32  ;;  %2674 = vrcp.f32 %v2305_v13  ;;  %vm2347_vm6 = vmor %vm2345_vm5, %vm2346_vm4  ;;  %v2366_v40 = vand.u32 2147483648, %v2305_v13  ;;  %v2364_v35 = vand.u32 2147483647, %v2305_v13  ;;  %v2155_v10 = vpop.f32.mrf.mxu1 }
 0x5ce   :  { %v2431_v21 = vmul.f32 %v2338_v14, %v2144_v26  ;;  %v2342_v38 = vsub.f32 1.0, %v2341_v33  ;;  %vm2360_vm9 = vweird.f32 %v2305_v13  ;;  %v2114_v26 = vpop.f32.mrf.mxu0 }
 0x5cf   :  { %v2228_v23 = vpop.f32.mrf.mxu2  ;;  %v2269_v22 = vpop.f32.mrf.mxu3  ;;  %v2367_v58 = vor.u32 1.1754944e-38, %v2366_v40  ;;  %vm2365_vm11 = vcmp.eq.f32.partialorder %v2364_v35, 8.507059e+37  ;;  %v2156_v8 = vadd.f32 %v2155_v10, %v2114_v26 }
 0x5d0   :  { %2439 = vst [vmem:[%s4326_s7 + $0x8] sm:$0xff] %v2431_v21  ;;  %v2343_v3 = vmul.f32 %v2671_v20, %v2342_v38  ;;  %v2270_v11 = vadd.f32 %v2269_v22, %v2228_v23 }
 0x5d2   :  { %v2673_v4 = vpop.eup %2672  ;;  %v2344_v63 = vadd.f32 %v2671_v20, %v2343_v3  ;;  %v2615_v0 = vmul.f32 -1.442695, %v2270_v11 }
 0x5d3   :  { %v2675_v25 = vpop.eup %2674  ;;  %v2306_v27 = vadd.f32 1.0, %v2673_v4 }
 0x5d4   :  { %v2348_v5 = vsel %vm2347_vm6, %v2671_v20, %v2344_v63  ;;  %v2356_v29 = vmul.f32 %v2675_v25, %v2305_v13  ;;  %2676 = vpow2.f32 %v2615_v0  ;;  %vm2361_vm8 = vweird.f32 %v2675_v25 }
 0x5d5   :  { %v2353_v30 = vsel %vm2350_vm7, %v2352_v59, %v2348_v5  ;;  %2678 = vrcp.f32 %v2306_v27  ;;  %vm2362_vm10 = vmor %vm2360_vm9, %vm2361_vm8  ;;  %v2381_v45 = vand.u32 2147483648, %v2306_v27  ;;  %v2379_v54 = vand.u32 2147483647, %v2306_v27 }
 0x5d6   :  { %v2432_v24 = vmul.f32 %v2353_v30, %v2147_v19  ;;  %v2357_v39 = vsub.f32 1.0, %v2356_v29  ;;  %vm2375_vm12 = vweird.f32 %v2306_v27  ;;  %v2117_v0 = vpop.f32.mrf.mxu0 }
 0x5d7   :  { %v2231_v28 = vpop.f32.mrf.mxu2  ;;  %v2272_v31 = vpop.f32.mrf.mxu3  ;;  %v2382_v15 = vor.u32 1.1754944e-38, %v2381_v45  ;;  %vm2380_vm14 = vcmp.eq.f32.partialorder %v2379_v54, 8.507059e+37 }
 0x5d8   :  { %2440 = vst [vmem:[%s4326_s7 + $0x10] sm:$0xff] %v2432_v24  ;;  %v2358_v34 = vmul.f32 %v2675_v25, %v2357_v39  ;;  %v2273_v36 = vadd.f32 %v2272_v31, %v2231_v28 }
 0x5da   :  { %v2677_v37 = vpop.eup %2676  ;;  %v2359_v49 = vadd.f32 %v2675_v25, %v2358_v34  ;;  %v2616_v50 = vmul.f32 -1.442695, %v2273_v36 }
 0x5db   :  { %v2679_v44 = vpop.eup %2678  ;;  %v2307_v51 = vadd.f32 1.0, %v2677_v37 }
 0x5dc   :  { %v2363_v52 = vsel %vm2362_vm10, %v2675_v25, %v2359_v49  ;;  %v2371_v7 = vmul.f32 %v2679_v44, %v2306_v27  ;;  %2680 = vpow2.f32 %v2616_v50  ;;  %vm2376_vm2 = vweird.f32 %v2679_v44  ;;  %v2158_v25 = vpop.f32.mrf.mxu1 }
 0x5dd   :  { %v2368_v17 = vsel %vm2365_vm11, %v2367_v58, %v2363_v52  ;;  %2682 = vrcp.f32 %v2307_v51  ;;  %vm2377_vm13 = vmor %vm2375_vm12, %vm2376_vm2  ;;  %v2396_v33 = vand.u32 2147483648, %v2307_v51  ;;  %v2394_v21 = vand.u32 2147483647, %v2307_v51 }
 0x5de   :  { %v2433_v55 = vmul.f32 %v2368_v17, %v2150_v57  ;;  %v2372_v56 = vsub.f32 1.0, %v2371_v7  ;;  %vm2390_vm0 = vweird.f32 %v2307_v51  ;;  %v2159_v24 = vadd.f32 %v2158_v25, %v2117_v0  ;;  %v2120_v49 = vpop.f32.mrf.mxu0 }
 0x5df   :  { %v2234_v46 = vpop.f32.mrf.mxu2  ;;  %v2275_v61 = vpop.f32.mrf.mxu3  ;;  %v2397_v22 = vor.u32 1.1754944e-38, %v2396_v33  ;;  %vm2395_vm3 = vcmp.eq.f32.partialorder %v2394_v21, 8.507059e+37 }
 0x5e0   :  { %2441 = vst [vmem:[%s4326_s7 + $0x18] sm:$0xff] %v2433_v55  ;;  %v2373_v18 = vmul.f32 %v2679_v44, %v2372_v56  ;;  %v2276_v1 = vadd.f32 %v2275_v61, %v2234_v46 }
 0x5e2   :  { %v2681_v6 = vpop.eup %2680  ;;  %v2374_v60 = vadd.f32 %v2679_v44, %v2373_v18  ;;  %v2617_v2 = vmul.f32 -1.442695, %v2276_v1 }
 0x5e3   :  { %v2683_v9 = vpop.eup %2682  ;;  %v2308_v16 = vadd.f32 1.0, %v2681_v6 }
 0x5e4   :  { %v2378_v62 = vsel %vm2377_vm13, %v2679_v44, %v2374_v60  ;;  %v2386_v48 = vmul.f32 %v2683_v9, %v2307_v51  ;;  %2684 = vpow2.f32 %v2617_v2  ;;  %vm2391_vm15 = vweird.f32 %v2683_v9  ;;  %v2161_v50 = vpop.f32.mrf.mxu1 }
 0x5e5   :  { %v2383_v20 = vsel %vm2380_vm14, %v2382_v15, %v2378_v62  ;;  %2686 = vrcp.f32 %v2308_v16  ;;  %vm2392_vm1 = vmor %vm2390_vm0, %vm2391_vm15  ;;  %v2411_v19 = vand.u32 2147483648, %v2308_v16  ;;  %v2409_v27 = vand.u32 2147483647, %v2308_v16 }
 0x5e6   :  { %v2434_v13 = vmul.f32 %v2383_v20, %v2153_v47  ;;  %v2387_v32 = vsub.f32 1.0, %v2386_v48  ;;  %vm2405_vm5 = vweird.f32 %v2308_v16  ;;  %v2162_v58 = vadd.f32 %v2161_v50, %v2120_v49 }
 0x5e7   :  { %v2412_v30 = vor.u32 1.1754944e-38, %v2411_v19  ;;  %vm2410_vm7 = vcmp.eq.f32.partialorder %v2409_v27, 8.507059e+37 }
 0x5e8   :  { %2442 = vst [vmem:[%s4326_s7 + $0x20] sm:$0xff] %v2434_v13  ;;  %v2388_v14 = vmul.f32 %v2683_v9, %v2387_v32 }
 0x5ea   :  { %v2685_v38 = vpop.eup %2684  ;;  %v2389_v43 = vadd.f32 %v2683_v9, %v2388_v14 }
 0x5eb   :  { %v2687_v23 = vpop.eup %2686  ;;  %v2309_v3 = vadd.f32 1.0, %v2685_v38 }
 0x5ec   :  { %v2393_v11 = vsel %vm2392_vm1, %v2683_v9, %v2389_v43  ;;  %v2401_v53 = vmul.f32 %v2687_v23, %v2308_v16  ;;  %vm2406_vm4 = vweird.f32 %v2687_v23 }
 0x5ed   :  { %v2398_v12 = vsel %vm2395_vm3, %v2397_v22, %v2393_v11  ;;  %2688 = vrcp.f32 %v2309_v3  ;;  %vm2407_vm6 = vmor %vm2405_vm5, %vm2406_vm4  ;;  %v2426_v35 = vand.u32 2147483648, %v2309_v3  ;;  %v2424_v37 = vand.u32 2147483647, %v2309_v3 }
 0x5ee   :  { %v2435_v4 = vmul.f32 %v2398_v12, %v2156_v8  ;;  %v2402_v63 = vsub.f32 1.0, %v2401_v53  ;;  %vm2420_vm9 = vweird.f32 %v2309_v3 }
 0x5ef   :  { %v2427_v57 = vor.u32 1.1754944e-38, %v2426_v35  ;;  %vm2425_vm11 = vcmp.eq.f32.partialorder %v2424_v37, 8.507059e+37 }
 0x5f0   :  { %2443 = vst [vmem:[%s4326_s7 + $0x28] sm:$0xff] %v2435_v4  ;;  %v2403_v59 = vmul.f32 %v2687_v23, %v2402_v63 }
 0x5f2   :  { %v2404_v5 = vadd.f32 %v2687_v23, %v2403_v59 }
 0x5f3   :  { %v2689_v29 = vpop.eup %2688 }
 0x5f4   :  { %v2408_v39 = vsel %vm2407_vm6, %v2687_v23, %v2404_v5  ;;  %v2416_v40 = vmul.f32 %v2689_v29, %v2309_v3  ;;  %vm2421_vm8 = vweird.f32 %v2689_v29 }
 0x5f5   :  { %v2413_v28 = vsel %vm2410_vm7, %v2412_v30, %v2408_v39  ;;  %vm2422_vm10 = vmor %vm2420_vm9, %vm2421_vm8 }
 0x5f6   :  { %v2436_v31 = vmul.f32 %v2413_v28, %v2159_v24  ;;  %v2417_v34 = vsub.f32 1.0, %v2416_v40 }
 0x5f8   :  { %2444 = vst [vmem:[%s4326_s7 + $0x30] sm:$0xff] %v2436_v31  ;;  %v2418_v36 = vmul.f32 %v2689_v29, %v2417_v34 }
 0x5fa   :  { %v2419_v44 = vadd.f32 %v2689_v29, %v2418_v36 }
 0x5fc   :  { %v2423_v41 = vsel %vm2422_vm10, %v2689_v29, %v2419_v44 }
 0x5fd   :  { %v2428_v42 = vsel %vm2425_vm11, %v2427_v57, %v2423_v41 }
 0x5fe   :  { %v2437_v51 = vmul.f32 %v2428_v42, %v2162_v58 }
 0x600   :  { %2445 = vst [vmem:[%s4326_s7 + $0x38] sm:$0xff] %v2437_v51 }

</bundles_post_ra>
